<compile_context>
chip_gen: v5e
topology: v5e:2x2
jax: 0.10.0
libtpu: 0.0.40
codegen_flags: <defaults>
</compile_context>

<pallas_src>
import math

import jax
import jax.numpy as jnp
from jax.experimental import pallas as pl
from jax.experimental.pallas import tpu as pltpu

POLICY_LEN = 1858          # len(policyMoves.policy_index)
POLICY_PAD = 2048          # padded to a multiple of 256 (fills 256-wide MXU on v6e/v7x)
TN = 1024                  # fc507 output-column tile; 2048 / 1024 = 2 grid steps
                           # (one per TensorCore on v7x; 2-step loop on v5e/v6e)

_LAYER_DIMS = (
    ("fc0", 64, 256),
    ("fc1", 256, 512),
    ("fc2", 512, 32),
    ("fc3", 32, 32),
    ("fc4", 32, 512),
    ("fc507", 512, POLICY_LEN),
)


# --------------------------------------------------------------------------------------
# Fused kernel: the whole network for one tile of fc507 output columns.
#   Packed operands:
#     w14_ref : (384, 512) bf16  rows [0:256]   = fc1 weight (padded-in 256)
#                                rows [256:384] = fc4 weight (padded-in 128)
#     w23_ref : (640, 128) bf16  rows [0:512]   = fc2 weight (padded-out 128)
#                                rows [512:640] = fc3 weight (padded 128x128)
#     bsm_ref : (8, 512)   f32   rows 0..4 = b0..b4, each zero-padded to width 512
# --------------------------------------------------------------------------------------
def _fused_policy_kernel(x_ref, w0_ref, w14_ref, w23_ref, bsm_ref,
                         w507_ref, b507_ref, o_ref):
    def lin(h, w, b):
        # bf16 x bf16 MXU matmul, f32 accumulation, f32 bias add.
        return jnp.dot(h.astype(jnp.bfloat16), w,
                       preferred_element_type=jnp.float32) + b

    h = x_ref[...]                                                          # (B, 64)  f32
    h = jnp.maximum(lin(h, w0_ref[...],         bsm_ref[0:1, 0:256]), 0.0)  # (B, 256)
    h = jnp.maximum(lin(h, w14_ref[0:256, :],   bsm_ref[1:2, 0:512]), 0.0)  # (B, 512)
    h = jnp.maximum(lin(h, w23_ref[0:512, :],   bsm_ref[2:3, 0:128]), 0.0)  # (B, 128)
    h = jnp.maximum(lin(h, w23_ref[512:640, :], bsm_ref[3:4, 0:128]), 0.0)  # (B, 128)
    h = jnp.maximum(lin(h, w14_ref[256:384, :], bsm_ref[4:5, 0:512]), 0.0)  # (B, 512)
    o_ref[...] = jnp.tanh(lin(h, w507_ref[...], b507_ref[...]))             # (B, TN)


def policy_net_forward(packed_params, x):
    """y = policyNet(x) using a single fused Pallas kernel.  x: (B, 64) f32."""
    w0 = packed_params["w0"]
    w14 = packed_params["w14"]
    w23 = packed_params["w23"]
    bsm = packed_params["bsmall"]
    w507 = packed_params["w507"]
    b507 = packed_params["b507"]

    B, K0 = x.shape
    const = lambda j: (0, 0)     # full-extent operand: same block every step -> DMA'd once
    coltile = lambda j: (0, j)   # fc507 weight / bias / output column tile

    # Advisory cost model: bandwidth-heavy, compute-light custom call.
    flops = 2 * B * (64 * 256 + 256 * 512 + 512 * 128 + 128 * 128
                     + 128 * 512 + 512 * POLICY_PAD)
    bytes_accessed = (2 * (64 * 256 + 384 * 512 + 640 * 128 + 512 * POLICY_PAD)   # bf16 weights
                      + 4 * (B * K0 + 8 * 512 + POLICY_PAD + B * POLICY_PAD))     # f32 rest
    cost = pl.CostEstimate(flops=flops,
                           transcendentals=B * POLICY_PAD,
                           bytes_accessed=bytes_accessed)

    out = pl.pallas_call(
        _fused_policy_kernel,
        out_shape=jax.ShapeDtypeStruct((B, POLICY_PAD), jnp.float32),
        grid_spec=pltpu.PrefetchScalarGridSpec(
            num_scalar_prefetch=0,
            grid=(POLICY_PAD // TN,),
            in_specs=[
                pl.BlockSpec((B, K0), const),                 # x           (full block)
                pl.BlockSpec(w0.shape, const),                # fc0 weight  (full block)
                pl.BlockSpec(w14.shape, const),               # fc1|fc4 weight slab
                pl.BlockSpec(w23.shape, const),               # fc2|fc3 weight slab
                pl.BlockSpec(bsm.shape, const),               # b0..b4 bias slab
                pl.BlockSpec((w507.shape[0], TN), coltile),   # fc507 weight column tile
                pl.BlockSpec((1, TN), coltile),               # fc507 bias tile
            ],
            out_specs=pl.BlockSpec((B, TN), coltile),         # lane-dense output tile
        ),
        compiler_params=pltpu.CompilerParams(
            dimension_semantics=("parallel",),        # v7x: 2 TCs split the 2 column tiles
            vmem_limit_bytes=32 * 1024 * 1024,        # headroom; actual use is ~4-5 MiB
        ),
        cost_estimate=cost,
    )(x, w0, w14, w23, bsm, w507, b507)

    # Single slice back to the logical policy width (only post-kernel op).
    return out[:, :POLICY_LEN]


# --------------------------------------------------------------------------------------
# Parameters: logical init (mimics nn.Linear default) + one-time packed layout prep.
# --------------------------------------------------------------------------------------
def _init_linear(key, fan_in, fan_out):
    """U(-1/sqrt(fan_in), 1/sqrt(fan_in)) for W and b, like PyTorch nn.Linear defaults.
    W is stored [in_features, out_features] so the kernel computes y = x @ W + b."""
    kw, kb = jax.random.split(key)
    bound = 1.0 / math.sqrt(fan_in)
    w = jax.random.uniform(kw, (fan_in, fan_out), jnp.float32, -bound, bound)
    b = jax.random.uniform(kb, (fan_out,), jnp.float32, -bound, bound)
    return w, b


def init_params(key):
    # fc5..fc250 exist as parameters in the PyTorch module but are dead in forward()
    # (exec cannot rebind the local `x` in Python 3), so they are not created here.
    return {name: _init_linear(jax.random.fold_in(key, i), fi, fo)
            for i, (name, fi, fo) in enumerate(_LAYER_DIMS)}


def prepare_params(params):
    """One-time, outside-jit layout prep.

    Zero-pads each layer to lane-friendly widths (exact: relu(0)=0 and zero weight
    rows/cols contribute nothing), casts weights to bf16 (halves the dominant HBM
    traffic), and packs small operands so the kernel issues 7 DMAs instead of 13."""
    def padw(w, rin, rout):
        ki, ko = w.shape
        return jnp.zeros((rin, rout), jnp.float32).at[:ki, :ko].set(w)

    w0, b0 = params["fc0"]
    w1, b1 = params["fc1"]
    w2, b2 = params["fc2"]
    w3, b3 = params["fc3"]
    w4, b4 = params["fc4"]
    w507, b507 = params["fc507"]

    w0p = padw(w0, 64, 256)
    w14 = jnp.concatenate([padw(w1, 256, 512), padw(w4, 128, 512)], axis=0)  # (384, 512)
    w23 = jnp.concatenate([padw(w2, 512, 128), padw(w3, 128, 128)], axis=0)  # (640, 128)
    w507p = padw(w507, 512, POLICY_PAD)                                      # (512, 2048)

    bsm = jnp.zeros((8, 512), jnp.float32)
    for row, b in enumerate((b0, b1, b2, b3, b4)):
        bsm = bsm.at[row, :b.shape[0]].set(b)
    b507p = jnp.zeros((1, POLICY_PAD), jnp.float32).at[0, :b507.shape[0]].set(b507)

    return {
        "w0": w0p.astype(jnp.bfloat16),
        "w14": w14.astype(jnp.bfloat16),
        "w23": w23.astype(jnp.bfloat16),
        "bsmall": bsm,                       # f32
        "w507": w507p.astype(jnp.bfloat16),
        "b507": b507p,                       # f32
    }


# --------------------------------------------------------------------------------------
# Pure-JAX reference (unpadded f32 params) for correctness checking.
# --------------------------------------------------------------------------------------
def policy_net_reference(params, x):
    hi = jax.lax.Precision.HIGHEST

    def lin(h, wb):
        w, b = wb
        return jnp.dot(h, w, precision=hi) + b

    h = jnp.maximum(lin(x, params["fc0"]), 0.0)
    h = jnp.maximum(lin(h, params["fc1"]), 0.0)
    h = jnp.maximum(lin(h, params["fc2"]), 0.0)
    h = jnp.maximum(lin(h, params["fc3"]), 0.0)
    h = jnp.maximum(lin(h, params["fc4"]), 0.0)
    return jnp.tanh(lin(h, params["fc507"]))


if __name__ == "__main__":
    key = jax.random.PRNGKey(0)
    pkey, xkey = jax.random.split(key)

    params = init_params(pkey)               # logical (unpadded, f32) parameters
    packed_params = prepare_params(params)   # kernel-layout parameters (bf16, packed, once)

    batch = 8
    x = jax.random.normal(xkey, (batch, 64), jnp.float32)

    fwd = jax.jit(policy_net_forward)
    y = fwd(packed_params, x)
    jax.block_until_ready(y)

    assert y.shape == (batch, POLICY_LEN), y.shape
    assert y.dtype == jnp.float32
    assert bool(jnp.all(jnp.abs(y) <= 1.0))          # tanh output range

    y_ref = policy_net_reference(params, x)
    max_err = float(jnp.max(jnp.abs(y - y_ref)))
    # bf16 weights + bf16 activations (f32 accumulation) vs f32 HIGHEST reference.
    assert jnp.allclose(y, y_ref, atol=1e-2, rtol=1e-2), max_err

    print("KERNEL_OK")
</pallas_src>

<mosaic_0001>
module attributes {stable_mosaic.version = 11 : i64} {
  func.func @_fused_policy_kernel(%arg0: i32, %arg1: memref<8x64xf32, #tpu.memory_space<vmem>>, %arg2: memref<64x256xbf16, #tpu.memory_space<vmem>>, %arg3: memref<384x512xbf16, #tpu.memory_space<vmem>>, %arg4: memref<640x128xbf16, #tpu.memory_space<vmem>>, %arg5: memref<8x512xf32, #tpu.memory_space<vmem>>, %arg6: memref<512x1024xbf16, #tpu.memory_space<vmem>>, %arg7: memref<1x1024xf32, #tpu.memory_space<vmem>>, %arg8: memref<8x1024xf32, #tpu.memory_space<vmem>>) attributes {dimension_semantics = [#tpu.dimension_semantics<parallel>], iteration_bounds = array<i64: 2>, scalar_prefetch = 0 : i64, scratch_operands = 0 : i64, tpu.core_type = #tpu.core_type<tc>, window_params = [{pipeline_mode = #tpu.pipeline_mode<synchronous>, transform_indices = @transform_0, window_bounds = array<i64: 8, 64>}, {pipeline_mode = #tpu.pipeline_mode<synchronous>, transform_indices = @transform_1, window_bounds = array<i64: 64, 256>}, {pipeline_mode = #tpu.pipeline_mode<synchronous>, transform_indices = @transform_2, window_bounds = array<i64: 384, 512>}, {pipeline_mode = #tpu.pipeline_mode<synchronous>, transform_indices = @transform_3, window_bounds = array<i64: 640, 128>}, {pipeline_mode = #tpu.pipeline_mode<synchronous>, transform_indices = @transform_4, window_bounds = array<i64: 8, 512>}, {transform_indices = @transform_5, window_bounds = array<i64: 512, 1024>}, {transform_indices = @transform_6, window_bounds = array<i64: 1, 1024>}, {transform_indices = @transform_7, window_bounds = array<i64: 8, 1024>}]} {
    %c0 = arith.constant 0 : index
    %c0_0 = arith.constant 0 : index
    %0 = vector.load %arg1[%c0, %c0_0] : memref<8x64xf32, #tpu.memory_space<vmem>>, vector<8x64xf32>
    %c0_1 = arith.constant 0 : index
    %c0_2 = arith.constant 0 : index
    %1 = vector.load %arg2[%c0_1, %c0_2] : memref<64x256xbf16, #tpu.memory_space<vmem>>, vector<64x256xbf16>
    %c0_3 = arith.constant 0 : index
    %c0_4 = arith.constant 0 : index
    %2 = vector.load %arg5[%c0_3, %c0_4] : memref<8x512xf32, #tpu.memory_space<vmem>>, vector<1x256xf32>
    %3 = arith.truncf %0 : vector<8x64xf32> to vector<8x64xbf16>
    %cst = arith.constant dense<0.000000e+00> : vector<8x256xf32>
    %4 = tpu.matmul %3, %1, %cst {dimension_numbers = #tpu.dot_dimension_numbers<[1], [0], [0], [1], [0, 0, 1, 1], [], []>} : vector<8x64xbf16>, vector<64x256xbf16>, vector<8x256xf32> -> vector<8x256xf32>
    %5 = vector.broadcast %2 : vector<1x256xf32> to vector<8x256xf32>
    %6 = arith.addf %4, %5 : vector<8x256xf32>
    %cst_5 = arith.constant 0.000000e+00 : f32
    %7 = vector.broadcast %cst_5 : f32 to vector<8x256xf32>
    %8 = arith.maximumf %6, %7 : vector<8x256xf32>
    %c0_6 = arith.constant 0 : index
    %c0_7 = arith.constant 0 : index
    %9 = vector.load %arg3[%c0_6, %c0_7] : memref<384x512xbf16, #tpu.memory_space<vmem>>, vector<256x512xbf16>
    %c1 = arith.constant 1 : index
    %c0_8 = arith.constant 0 : index
    %10 = vector.load %arg5[%c1, %c0_8] : memref<8x512xf32, #tpu.memory_space<vmem>>, vector<1x512xf32>
    %11 = arith.truncf %8 : vector<8x256xf32> to vector<8x256xbf16>
    %cst_9 = arith.constant dense<0.000000e+00> : vector<8x512xf32>
    %12 = tpu.matmul %11, %9, %cst_9 {dimension_numbers = #tpu.dot_dimension_numbers<[1], [0], [0], [1], [0, 0, 1, 1], [], []>} : vector<8x256xbf16>, vector<256x512xbf16>, vector<8x512xf32> -> vector<8x512xf32>
    %13 = vector.broadcast %10 : vector<1x512xf32> to vector<8x512xf32>
    %14 = arith.addf %12, %13 : vector<8x512xf32>
    %cst_10 = arith.constant 0.000000e+00 : f32
    %15 = vector.broadcast %cst_10 : f32 to vector<8x512xf32>
    %16 = arith.maximumf %14, %15 : vector<8x512xf32>
    %c0_11 = arith.constant 0 : index
    %c0_12 = arith.constant 0 : index
    %17 = vector.load %arg4[%c0_11, %c0_12] : memref<640x128xbf16, #tpu.memory_space<vmem>>, vector<512x128xbf16>
    %c2 = arith.constant 2 : index
    %c0_13 = arith.constant 0 : index
    %18 = vector.load %arg5[%c2, %c0_13] : memref<8x512xf32, #tpu.memory_space<vmem>>, vector<1x128xf32>
    %19 = arith.truncf %16 : vector<8x512xf32> to vector<8x512xbf16>
    %cst_14 = arith.constant dense<0.000000e+00> : vector<8x128xf32>
    %20 = tpu.matmul %19, %17, %cst_14 {dimension_numbers = #tpu.dot_dimension_numbers<[1], [0], [0], [1], [0, 0, 1, 1], [], []>} : vector<8x512xbf16>, vector<512x128xbf16>, vector<8x128xf32> -> vector<8x128xf32>
    %21 = vector.broadcast %18 : vector<1x128xf32> to vector<8x128xf32>
    %22 = arith.addf %20, %21 : vector<8x128xf32>
    %cst_15 = arith.constant 0.000000e+00 : f32
    %23 = vector.broadcast %cst_15 : f32 to vector<8x128xf32>
    %24 = arith.maximumf %22, %23 : vector<8x128xf32>
    %c512 = arith.constant 512 : index
    %c0_16 = arith.constant 0 : index
    %25 = vector.load %arg4[%c512, %c0_16] : memref<640x128xbf16, #tpu.memory_space<vmem>>, vector<128x128xbf16>
    %c3 = arith.constant 3 : index
    %c0_17 = arith.constant 0 : index
    %26 = vector.load %arg5[%c3, %c0_17] : memref<8x512xf32, #tpu.memory_space<vmem>>, vector<1x128xf32>
    %27 = arith.truncf %24 : vector<8x128xf32> to vector<8x128xbf16>
    %cst_18 = arith.constant dense<0.000000e+00> : vector<8x128xf32>
    %28 = tpu.matmul %27, %25, %cst_18 {dimension_numbers = #tpu.dot_dimension_numbers<[1], [0], [0], [1], [0, 0, 1, 1], [], []>} : vector<8x128xbf16>, vector<128x128xbf16>, vector<8x128xf32> -> vector<8x128xf32>
    %29 = vector.broadcast %26 : vector<1x128xf32> to vector<8x128xf32>
    %30 = arith.addf %28, %29 : vector<8x128xf32>
    %cst_19 = arith.constant 0.000000e+00 : f32
    %31 = vector.broadcast %cst_19 : f32 to vector<8x128xf32>
    %32 = arith.maximumf %30, %31 : vector<8x128xf32>
    %c256 = arith.constant 256 : index
    %c0_20 = arith.constant 0 : index
    %33 = vector.load %arg3[%c256, %c0_20] : memref<384x512xbf16, #tpu.memory_space<vmem>>, vector<128x512xbf16>
    %c4 = arith.constant 4 : index
    %c0_21 = arith.constant 0 : index
    %34 = vector.load %arg5[%c4, %c0_21] : memref<8x512xf32, #tpu.memory_space<vmem>>, vector<1x512xf32>
    %35 = arith.truncf %32 : vector<8x128xf32> to vector<8x128xbf16>
    %cst_22 = arith.constant dense<0.000000e+00> : vector<8x512xf32>
    %36 = tpu.matmul %35, %33, %cst_22 {dimension_numbers = #tpu.dot_dimension_numbers<[1], [0], [0], [1], [0, 0, 1, 1], [], []>} : vector<8x128xbf16>, vector<128x512xbf16>, vector<8x512xf32> -> vector<8x512xf32>
    %37 = vector.broadcast %34 : vector<1x512xf32> to vector<8x512xf32>
    %38 = arith.addf %36, %37 : vector<8x512xf32>
    %cst_23 = arith.constant 0.000000e+00 : f32
    %39 = vector.broadcast %cst_23 : f32 to vector<8x512xf32>
    %40 = arith.maximumf %38, %39 : vector<8x512xf32>
    %c0_24 = arith.constant 0 : index
    %c0_25 = arith.constant 0 : index
    %41 = vector.load %arg6[%c0_24, %c0_25] : memref<512x1024xbf16, #tpu.memory_space<vmem>>, vector<512x1024xbf16>
    %c0_26 = arith.constant 0 : index
    %c0_27 = arith.constant 0 : index
    %42 = vector.load %arg7[%c0_26, %c0_27] : memref<1x1024xf32, #tpu.memory_space<vmem>>, vector<1x1024xf32>
    %43 = arith.truncf %40 : vector<8x512xf32> to vector<8x512xbf16>
    %cst_28 = arith.constant dense<0.000000e+00> : vector<8x1024xf32>
    %44 = tpu.matmul %43, %41, %cst_28 {dimension_numbers = #tpu.dot_dimension_numbers<[1], [0], [0], [1], [0, 0, 1, 1], [], []>} : vector<8x512xbf16>, vector<512x1024xbf16>, vector<8x1024xf32> -> vector<8x1024xf32>
    %45 = vector.broadcast %42 : vector<1x1024xf32> to vector<8x1024xf32>
    %46 = arith.addf %44, %45 : vector<8x1024xf32>
    %47 = math.tanh %46 : vector<8x1024xf32>
    %c0_29 = arith.constant 0 : index
    %c0_30 = arith.constant 0 : index
    %48 = vector.load %arg8[%c0_29, %c0_30] : memref<8x1024xf32, #tpu.memory_space<vmem>>, vector<8x1024xf32>
    tpu.vector_store %arg8[%c0_29, %c0_30], %47 {strides = array<i32>} : memref<8x1024xf32, #tpu.memory_space<vmem>>, vector<8x1024xf32>,
    return
  }
  func.func @transform_0(%arg0: i32) -> (i32, i32) {
    %c0_i32 = arith.constant 0 : i32
    %c0_i32_0 = arith.constant 0 : i32
    %c0_i32_1 = arith.constant 0 : i32
    return %c0_i32, %c0_i32_0 : i32, i32
  }
  func.func @transform_1(%arg0: i32) -> (i32, i32) {
    %c0_i32 = arith.constant 0 : i32
    %c0_i32_0 = arith.constant 0 : i32
    %c0_i32_1 = arith.constant 0 : i32
    return %c0_i32, %c0_i32_0 : i32, i32
  }
  func.func @transform_2(%arg0: i32) -> (i32, i32) {
    %c0_i32 = arith.constant 0 : i32
    %c0_i32_0 = arith.constant 0 : i32
    %c0_i32_1 = arith.constant 0 : i32
    return %c0_i32, %c0_i32_0 : i32, i32
  }
  func.func @transform_3(%arg0: i32) -> (i32, i32) {
    %c0_i32 = arith.constant 0 : i32
    %c0_i32_0 = arith.constant 0 : i32
    %c0_i32_1 = arith.constant 0 : i32
    return %c0_i32, %c0_i32_0 : i32, i32
  }
  func.func @transform_4(%arg0: i32) -> (i32, i32) {
    %c0_i32 = arith.constant 0 : i32
    %c0_i32_0 = arith.constant 0 : i32
    %c0_i32_1 = arith.constant 0 : i32
    return %c0_i32, %c0_i32_0 : i32, i32
  }
  func.func @transform_5(%arg0: i32) -> (i32, i32) {
    %c0_i32 = arith.constant 0 : i32
    %c0_i32_0 = arith.constant 0 : i32
    return %c0_i32, %arg0 : i32, i32
  }
  func.func @transform_6(%arg0: i32) -> (i32, i32) {
    %c0_i32 = arith.constant 0 : i32
    %c0_i32_0 = arith.constant 0 : i32
    return %c0_i32, %arg0 : i32, i32
  }
  func.func @transform_7(%arg0: i32) -> (i32, i32) {
    %c0_i32 = arith.constant 0 : i32
    %c0_i32_0 = arith.constant 0 : i32
    return %c0_i32, %arg0 : i32, i32
  }
}

</mosaic_0001>

<bundles_post_ra>
// kernel: policy_net_forward.1
= control target key start
LH: loop header
LB: loop body
LE: loop exit
PB: predicated region body
PF: predicated region fallthrough
CT: control target
= control target key end

     0   :  { %s7033_s0 = inlined_call_operand.hbm [shape: f32[8,64], index: 0, kind: input, shape index: {}]   ;;  %s7034_s1 = inlined_call_operand.hbm [shape: bf16[64,256], index: 1, kind: input, shape index: {}]   ;;  %s7035_s2 = inlined_call_operand.hbm [shape: bf16[384,512], index: 2, kind: input, shape index: {}]   ;;  %s7036_s3 = inlined_call_operand.hbm [shape: bf16[640,128], index: 3, kind: input, shape index: {}]   ;;  %s7037_s4 = inlined_call_operand.hbm [shape: f32[8,512], index: 4, kind: input, shape index: {}]   ;;  %s7038_s5 = inlined_call_operand.hbm [shape: bf16[512,2048], index: 5, kind: input, shape index: {}]   ;;  %s7039_s6 = inlined_call_operand.hbm [shape: f32[1,2048], index: 6, kind: input, shape index: {}]   ;;  %s7040_s7 = inlined_call_operand.vmem [shape: f32[8,2048], index: 7, kind: output, shape index: {}]  }
   0x1   :  { %7042 = sst [smem:[#allocation17_spill]] %s7033_s0 }
   0x2   :  { %7043 = sst [smem:[#allocation18_spill]] %s7034_s1 }
   0x3   :  { %7044 = sst [smem:[#allocation19_spill]] %s7035_s2 }
   0x4   :  { %7045 = sst [smem:[#allocation20_spill]] %s7036_s3 }
   0x5   :  { %12 = vsyncpa [#allocation3], 0 }
   0x6   :  { %13 = vsyncpa [#allocation5], 0 }
   0x7   :  { %14 = vsyncpa [#allocation8], 0 }
   0x8   :  { %15 = vsyncpa [#allocation11], 0 }
   0x9   :  { %17 = vsyncpa [#allocation11 + $0x1], 0  ;;  %s6255_s24 = smov 0   ;;  %s6257_s25 = smov 0  }
   0xa   :  { %s6259_s26 = smov 0   ;;  %s6261_s27 = smov 0  }
   0xb LB: > { %s6274_s28 = sadd.s32 4294967295, %s6199_s27   ;;  %p148_p0 = scmp.ne.s32.totalorder %s6191_s25, %s6187_s24  ;;  %s6199_s27 = sphi %s6261_s27, %s7059_s27   ;;  %s6195_s26 = sphi %s6259_s26, %s7058_s26   ;;  %s6191_s25 = sphi %s6257_s25, %s7057_s25   ;;  %s6187_s24 = sphi %s6255_s24, %s7056_s24  }
   0xc   : > { %p149_p1 = scmp.eq.s32.totalorder %s6274_s28, 0  ;;  %p3796_p2 = scmp.ge.s32.totalorder %s6199_s27, 1 }
   0xd   : > { %p211_p3 = scmp.lt.s32.totalorder %s6199_s27, 3  ;;  %s7047_s1 = sld [smem:[#allocation18_spill]] }
   0xe   : > { %p6282_p4 = por %p149_p1, %p148_p0  ;;  %s6201_s11 = smov [#allocation4]  }
   0xf   : > { %p6289_p5 = pnand %p3796_p2, %p211_p3  ;;  %s236_s12 = sshll.u32 %s6201_s11, 4  ;;  %s237_s12 = int_to_ptr.vmem [resolvable:$true] %s236_s12 }
  0x10   : > { %s7050_s3 = sld [smem:[#allocation20_spill]]  ;;  %s6202_s17 = smov 128  }
  0x11   : > { %p5847_p6 = pneg %p6289_p5  ;;  %s6203_s18 = smov 8  }
  0x12   : > { %s6204_s19 = smov [#allocation7]   ;;  %s6205_s21 = smov 64  }
  0x13   : > { %s234_s9 = sshll.u32 %s7047_s1, 4  ;;  %p6297_p7 = pnand %p5847_p6, %p149_p1  ;;  %s235_s9 = int_to_ptr.hbm [resolvable:$true] %s234_s9 }
  0x14   : > { %s264_s20 = sshll.u32 %s6204_s19, 4  ;;  %s6206_s22 = smov 4   ;;  %s265_s20 = int_to_ptr.vmem [resolvable:$true] %s264_s20 }
  0x15   : > { %5853 = dma.hbm_to_vmem [thread:$0]  (!%p6297_p7), %s235_s9, 1024, %s237_s12, [#allocation5], %s6202_s17, %s6202_s17, %s6203_s18  }
  0x16   : > { %s262_s16 = sshll.u32 %s7050_s3, 4  ;;  %s6309_s23 = sadd.s32 1, %s6199_s27   ;;  %s263_s16 = int_to_ptr.hbm [resolvable:$true] %s262_s16 }
  0x17   : > { %5859 = dma.hbm_to_vmem [thread:$0]  (!%p6297_p7), %s263_s16, 5120, %s265_s20, [#allocation8], %s6205_s21, %s6205_s21, %s6206_s22  }
  0x18   : > { %s132_s24 = ssub.s32 %s6199_s27, %s6309_s23  ;;  %s135_s30 = sadd.s32 1, %s6195_s26 }
  0x19   : > { %p133_p8 = scmp.eq.s32.totalorder %s132_s24, 0  ;;  %p142_p9 = scmp.ne.s32.totalorder %s6195_s26, %s6191_s25 }
  0x1a   : > { %p143_p10 = scmp.eq.s32.totalorder %s6199_s27, 0  ;;  %p5875_p12 = scmp.lt.s32.totalorder %s6199_s27, 2 }
  0x1b   : > { %s6318_s8 = scalar_select %p133_p8, %s6195_s26, %s135_s30  }
  0x1c   : > { %p144_p11 = por %p143_p10, %p142_p9  ;;  %s290_s9 = sand.u32 1, %s6199_s27  }
  0x1d   : > { %s7041_s11 = sand.u32 1, %s6195_s26   ;;  %s5422_s14 = sshll.u32 %s6199_s27, 5 }
  0x1e   : > { %s3803_s12 = sshll.u32 %s7041_s11, 11  ;;  %s299_s16 = scalar_lea.hbm %s7038_s5, %s5422_s14 }
  0x1f   : > { %s294_s18 = scalar_lea.vmem [#allocation10], %s3803_s12  ;;  %s300_s20 = sshll.u32 %s299_s16, 4  ;;  %s301_s20 = int_to_ptr.hbm [resolvable:$true] %s300_s20 }
  0x20   : > { %s302_s19 = sshll.u32 %s294_s18, 4  ;;  %p6329_p13 = pnand %p5875_p12, %p144_p11  ;;  %s303_s19 = int_to_ptr.vmem [resolvable:$true] %s302_s19 }
  0x21   : > { %s6333_s22 = scalar_lea.sflag [#allocation11], %s290_s9  ;;  %s6003_s24 = sshra.s32 %s301_s20, 4  ;;  %s6004_s24 = int_to_ptr.hbm [resolvable:$true] %s6003_s24 }
  0x22   : > { %s6005_s30 = scalar_lea.hbm %s6004_s24, 2048  ;;  %p6007_p2 = pneg %p6329_p13 }
  0x23   : > { %p6006_p0 = scmp.ne.s32.totalorder %s6004_s24, %s6005_s30  ;;  %s6010_s15 = scalar_lea.hbm %s7038_s5, 4096 }
  0x24   : > { %p6011_p8 = scmp.lt.s32.totalorder %s6004_s24, %s7038_s5  ;;  %p6012_p9 = scmp.lt.s32.totalorder %s6010_s15, %s6005_s30 }
  0x25   : > { %p6008_p3 = pnand %p6007_p2, %p6006_p0 }
  0x26   : > { %p6013_p10 = por %p6012_p9, %p6011_p8 }
  0x27   : > { %p6009_p6 = pneg %p6008_p3 }
  0x29   : > { %p6014_p11 = pnand %p6013_p10, %p6009_p6 }
  0x2b   : > { %6017 = shalt.err (!%p6014_p11)
}
  0x2c   : > { %s6207_s9 = smov 1024   ;;  %s6208_s18 = smov 512  }
  0x2d   : > { %s6209_s11 = smov 32   ;;  %s7052_s0 = sld [smem:[#allocation17_spill]] }
  0x2e   : > { %5866 = dma.hbm_to_vmem [thread:$0]  (!%p6329_p13), %s301_s20, 32768, %s303_s19, %s6333_s22, %s6207_s9, %s6208_s18, %s6209_s11  }
  0x2f   : > { %s6210_s17 = smov [#allocation2]   ;;  %s7053_s2 = sld [smem:[#allocation19_spill]] }
  0x30   : > { %s225_s24 = sshll.u32 %s6210_s17, 4  ;;  %s6211_s3 = smov [#allocation6]   ;;  %s226_s24 = int_to_ptr.vmem [resolvable:$true] %s225_s24 }
  0x31   : > { %s250_s11 = sshll.u32 %s6211_s3, 4  ;;  %s6212_s19 = smov 256   ;;  %s251_s11 = int_to_ptr.vmem [resolvable:$true] %s250_s11 }
  0x32   : > { %s6213_s1 = smov 16   ;;  %s277_s18 = sshll.u32 %s7037_s4, 4  ;;  %s278_s18 = int_to_ptr.hbm [resolvable:$true] %s277_s18 }
  0x33   : > { %s223_s14 = sshll.u32 %s7052_s0, 4  ;;  %s6214_s12 = smov [#allocation9]   ;;  %s224_s14 = int_to_ptr.hbm [resolvable:$true] %s223_s14 }
  0x34   : > { %5850 = dma.hbm_to_vmem [thread:$0]  (!%p6297_p7), %s224_s14, 128, %s226_s24, [#allocation3]  }
  0x35   : > { %s248_s16 = sshll.u32 %s7053_s2, 4  ;;  %s279_s17 = sshll.u32 %s6214_s12, 4  ;;  %s249_s16 = int_to_ptr.hbm [resolvable:$true] %s248_s16  ;;  %s280_s17 = int_to_ptr.vmem [resolvable:$true] %s279_s17 }
  0x36   : > { %5856 = dma.hbm_to_vmem [thread:$0]  (!%p6297_p7), %s249_s16, 12288, %s251_s11, [#allocation5], %s6212_s19, %s6212_s19, %s6213_s1  }
  0x37   : > { %s7054_s30 = sand.u32 1, %s6195_s26   ;;  %s3807_s14 = sshll.u32 %s6199_s27, 3 }
  0x38   : > { %s3806_s15 = sshll.u32 %s7054_s30, 3  ;;  %s320_s0 = scalar_lea.hbm %s7039_s6, %s3807_s14 }
  0x39   : > { %5862 = dma.hbm_to_vmem [thread:$0]  (!%p6297_p7), %s278_s18, 512, %s280_s17, [#allocation8]  }
  0x3a   : > { %s316_s2 = scalar_lea.vmem [#allocation12], %s3806_s15  ;;  %s322_s11 = sshll.u32 %s320_s0, 4  ;;  %s323_s11 = int_to_ptr.hbm [resolvable:$true] %s322_s11 }
  0x3b   : > { %s324_s16 = sshll.u32 %s316_s2, 4  ;;  %s6123_s19 = sshra.s32 %s323_s11, 4  ;;  %s325_s16 = int_to_ptr.vmem [resolvable:$true] %s324_s16  ;;  %s6124_s19 = int_to_ptr.hbm [resolvable:$true] %s6123_s19 }
  0x3c   : > { %s6125_s1 = scalar_lea.hbm %s6124_s19, 8  ;;  %s6130_s27 = scalar_lea.hbm %s7039_s6, 16 }
  0x3d   : > { %p6126_p12 = scmp.ne.s32.totalorder %s6124_s19, %s6125_s1  ;;  %p6131_p7 = scmp.lt.s32.totalorder %s6124_s19, %s7039_s6 }
  0x3e   : > { %p6132_p6 = scmp.lt.s32.totalorder %s6130_s27, %s6125_s1 }
  0x3f   : > { %p6128_p0 = pnand %p6126_p12, %p6007_p2 }
  0x40   : > { %p6133_p8 = por %p6132_p6, %p6131_p7 }
  0x41   : > { %p6129_p3 = pneg %p6128_p0 }
  0x43   : > { %p6134_p9 = pnand %p6133_p8, %p6129_p3 }
  0x45   : > { %6137 = shalt.err (!%p6134_p9)
}
  0x46   : > { %5869 = dma.hbm_to_vmem [thread:$0]  (!%p6329_p13), %s323_s11, 128, %s325_s16, %s6333_s22  }
  0x47   : > { %333 = sbr.rel (%p6289_p5) target bundleno = 1141 (0x475), region = 48 }
  0x4c   : > { %6170 = dma.done.wait (%p149_p1), [#allocation3], 128  }
  0x4d   : > { %6172 = vsyncadd (%p149_p1), [#allocation3], 4294967168 }
  0x4e   : > { %6174 = dma.done.wait (%p149_p1), [#allocation5], 13312  }
  0x4f   : > { %6176 = vsyncadd (%p149_p1), [#allocation5], 4294953984 }
  0x50   : > { %6178 = dma.done.wait (%p149_p1), [#allocation8], 5632  }
  0x51   : > { %6180 = vsyncadd (%p149_p1), [#allocation8], 4294961664  ;;  %s360_s0 = sand.u32 1, %s6274_s28   ;;  %s362_s2 = sand.u32 1, %s6191_s25  }
  0x52   : > { %s3814_s10 = sshll.u32 %s362_s2, 11  ;;  %s361_s21 = scalar_lea.sflag [#allocation11], %s360_s0 }
  0x53   : > { %s6400_s22 = scalar_lea.vmem [#allocation10], %s3814_s10 }
  0x54   : > { %6182 = dma.done.wait (%p6282_p4), %s361_s21, 32896  }
  0x55   : > { %6184 = vsyncadd (%p6282_p4), %s361_s21, 4294934400  ;;  %v3844_v0 = vld [vmem:[#allocation4 + $0x30] sm:$0xf]  ;;  %v5430_v1 = vld [vmem:[#allocation4 + $0x34] sm:$0xf0]  ;;  %vm476_vm0 = vcmask 523264  }
  0x56   : > { %v5429_v2 = vld [vmem:[#allocation4 + $0x34] sm:$0xf]  ;;  %v3845_v3 = vor.u32 %v5430_v1, %v3844_v0  ;;  %v3846_v4 = vld [vmem:[#allocation4 + $0x38] sm:$0xf0]  ;;  %v3836_v5 = vld [vmem:[#allocation4 + $0x20] sm:$0xf] }
  0x57   : > { %v5428_v6 = vld [vmem:[#allocation4 + $0x24] sm:$0xf0]  ;;  %v3849_v7 = vor.u32 %v5429_v2, %v3846_v4  ;;  %v5427_v8 = vld [vmem:[#allocation4 + $0x24] sm:$0xf]  ;;  %v3838_v9 = vld [vmem:[#allocation4 + $0x28] sm:$0xf0] }
  0x58   : > { %484 = vmatpush.bf16.msra.mxu0 %v3845_v3  ;;  %v3837_v10 = vor.u32 %v5428_v6, %v3836_v5  ;;  %v3841_v11 = vor.u32 %v5427_v8, %v3838_v9  ;;  %v3828_v12 = vld [vmem:[#allocation4 + $0x10] sm:$0xf]  ;;  %v5426_v13 = vld [vmem:[#allocation4 + $0x14] sm:$0xf0]  ;;  %v5425_v14 = vld [vmem:[#allocation4 + $0x14] sm:$0xf] }
  0x59   : > { %497 = vmatpush.bf16.msra.mxu1 %v3849_v7  ;;  %v3830_v15 = vld [vmem:[#allocation4 + $0x18] sm:$0xf0]  ;;  %v3966_v16 = vld [vmem:[#allocation6 + $0xe0] sm:$0xf]  ;;  %v5461_v18 = vld [vmem:[#allocation6 + $0xec] sm:$0xf0]  ;;  %v3829_v21 = vor.u32 %v5426_v13, %v3828_v12 }
  0x5a   : > { %v3820_v17 = vld [vmem:[#allocation4] sm:$0xf]  ;;  %v5493_v20 = vld [vmem:[#allocation6 + $0x1ec] sm:$0xf0]  ;;  %v5424_v22 = vld [vmem:[#allocation4 + $0x4] sm:$0xf0]  ;;  %v3967_v25 = vor.u32 %v5461_v18, %v3966_v16  ;;  %v3833_v27 = vor.u32 %v5425_v14, %v3830_v15 }
  0x5b   : > { %v4094_v19 = vld [vmem:[#allocation6 + $0x1e0] sm:$0xf]  ;;  %v5423_v23 = vld [vmem:[#allocation4 + $0x4] sm:$0xf]  ;;  %v3822_v24 = vld [vmem:[#allocation4 + $0x8] sm:$0xf0]  ;;  %v3821_v39 = vor.u32 %v5424_v22, %v3820_v17 }
  0x5c   : > { %485 = vmatpush.bf16.msra.mxu0 %v3837_v10  ;;  %v4095_v26 = vor.u32 %v5493_v20, %v4094_v19  ;;  %v5459_v28 = vld [vmem:[#allocation6 + $0xe4] sm:$0xf]  ;;  %v3950_v29 = vld [vmem:[#allocation6 + $0xc0] sm:$0xf]  ;;  %v5457_v30 = vld [vmem:[#allocation6 + $0xcc] sm:$0xf0]  ;;  %905 = vmatpush.bf16.msra.mxu2 %v3967_v25  ;;  %v3825_v43 = vor.u32 %v5423_v23, %v3822_v24 }
  0x5d   : > { %498 = vmatpush.bf16.msra.mxu1 %v3841_v11  ;;  %v3968_v31 = vld [vmem:[#allocation6 + $0xf0] sm:$0xf0]  ;;  %v3951_v32 = vor.u32 %v5457_v30, %v3950_v29  ;;  %v4078_v33 = vld [vmem:[#allocation6 + $0x1c0] sm:$0xf]  ;;  %v5489_v34 = vld [vmem:[#allocation6 + $0x1cc] sm:$0xf0] }
  0x5e   : > { %918 = vmatpush.bf16.msra.mxu3 %v4095_v26  ;;  %v420_v35 = vld [vmem:[#allocation2] sm:$0xff]  ;;  %v5491_v36 = vld [vmem:[#allocation6 + $0x1e4] sm:$0xf]  ;;  %v4096_v37 = vld [vmem:[#allocation6 + $0x1f0] sm:$0xf0]  ;;  %v4079_v38 = vor.u32 %v5489_v34, %v4078_v33  ;;  %v3971_v44 = vor.u32 %v5459_v28, %v3968_v31  ;;  %s3815_s29 = sshll.u32 %s362_s2, 3 }
  0x5f   : > { %v3934_v40 = vld [vmem:[#allocation6 + $0xa0] sm:$0xf]  ;;  %v5453_v41 = vld [vmem:[#allocation6 + $0xac] sm:$0xf0]  ;;  %v4099_v46 = vor.u32 %v5491_v36, %v4096_v37  ;;  %v5455_v47 = vld [vmem:[#allocation6 + $0xc4] sm:$0xf]  ;;  %v430_v51 = vpack.c.bf16 %v420_v35, %v420_v35 }
  0x60   : > { %486 = vmatpush.bf16.msra.mxu0 %v3829_v21  ;;  %v4062_v42 = vld [vmem:[#allocation6 + $0x1a0] sm:$0xf]  ;;  %v5485_v45 = vld [vmem:[#allocation6 + $0x1ac] sm:$0xf0]  ;;  %906 = vmatpush.bf16.msra.mxu2 %v3951_v32  ;;  %v3952_v48 = vld [vmem:[#allocation6 + $0xd0] sm:$0xf0]  ;;  %v3935_v50 = vor.u32 %v5453_v41, %v3934_v40 }
  0x61   : > { %499 = vmatpush.bf16.msra.mxu1 %v3833_v27  ;;  %v5487_v49 = vld [vmem:[#allocation6 + $0x1c4] sm:$0xf]  ;;  %v4080_v52 = vld [vmem:[#allocation6 + $0x1d0] sm:$0xf0]  ;;  %v4063_v53 = vor.u32 %v5485_v45, %v4062_v42  ;;  %v3918_v54 = vld [vmem:[#allocation6 + $0x80] sm:$0xf]  ;;  %v3955_v58 = vor.u32 %v5455_v47, %v3952_v48 }
  0x62   : > { %919 = vmatpush.bf16.msra.mxu3 %v4079_v38  ;;  %v5449_v55 = vld [vmem:[#allocation6 + $0x8c] sm:$0xf0]  ;;  %v4046_v56 = vld [vmem:[#allocation6 + $0x180] sm:$0xf]  ;;  %v4083_v59 = vor.u32 %v5487_v49, %v4080_v52  ;;  %v5451_v60 = vld [vmem:[#allocation6 + $0xa4] sm:$0xf] }
  0x63   : > { %v5481_v57 = vld [vmem:[#allocation6 + $0x18c] sm:$0xf0]  ;;  %v3936_v61 = vld [vmem:[#allocation6 + $0xb0] sm:$0xf0]  ;;  %v5483_v62 = vld [vmem:[#allocation6 + $0x1a4] sm:$0xf]  ;;  %v3919_v63 = vor.u32 %v5449_v55, %v3918_v54 }
  0x64   : > { %487 = vmatpush.bf16.msra.mxu0 %v3821_v39  ;;  %907 = vmatpush.bf16.msra.mxu2 %v3935_v50  ;;  %v4064_v0 = vld [vmem:[#allocation6 + $0x1b0] sm:$0xf0]  ;;  %v4047_v1 = vor.u32 %v5481_v57, %v4046_v56  ;;  %v3902_v2 = vld [vmem:[#allocation6 + $0x60] sm:$0xf]  ;;  %v5445_v3 = vld [vmem:[#allocation6 + $0x6c] sm:$0xf0]  ;;  %v3939_v6 = vor.u32 %v5451_v60, %v3936_v61 }
  0x65   : > { %500 = vmatpush.bf16.msra.mxu1 %v3825_v43  ;;  %v4030_v4 = vld [vmem:[#allocation6 + $0x160] sm:$0xf]  ;;  %v5477_v5 = vld [vmem:[#allocation6 + $0x16c] sm:$0xf0]  ;;  %v4067_v7 = vor.u32 %v5483_v62, %v4064_v0  ;;  %v5447_v8 = vld [vmem:[#allocation6 + $0x84] sm:$0xf]  ;;  %v3903_v11 = vor.u32 %v5445_v3, %v3902_v2 }
  0x66   : > { %920 = vmatpush.bf16.msra.mxu3 %v4063_v53  ;;  %v3920_v9 = vld [vmem:[#allocation6 + $0x90] sm:$0xf0]  ;;  %v5479_v10 = vld [vmem:[#allocation6 + $0x184] sm:$0xf]  ;;  %v4031_v13 = vor.u32 %v5477_v5, %v4030_v4  ;;  %v3886_v14 = vld [vmem:[#allocation6 + $0x40] sm:$0xf] }
  0x67   : > { %3850 = vmatmul.msk.bf16.vlgmr.msra.gmra.mxu0 %vm476_vm0, %v430_v51  ;;  %v4048_v12 = vld [vmem:[#allocation6 + $0x190] sm:$0xf0]  ;;  %v5441_v15 = vld [vmem:[#allocation6 + $0x4c] sm:$0xf0]  ;;  %v4014_v16 = vld [vmem:[#allocation6 + $0x140] sm:$0xf]  ;;  %v3923_v18 = vor.u32 %v5447_v8, %v3920_v9 }
  0x68   : > { %931 = vmatpush.bf16.msrb.mxu0 %v3971_v44  ;;  %3851 = vmatmul.msk.bf16.vlgmr.msra.gmra.mxu1 %vm476_vm0, %v430_v51  ;;  %v5473_v17 = vld [vmem:[#allocation6 + $0x14c] sm:$0xf0]  ;;  %v4051_v19 = vor.u32 %v5479_v10, %v4048_v12  ;;  %v5443_v20 = vld [vmem:[#allocation6 + $0x64] sm:$0xf]  ;;  %v3904_v21 = vld [vmem:[#allocation6 + $0x70] sm:$0xf0]  ;;  %v3887_v23 = vor.u32 %v5441_v15, %v3886_v14 }
  0x69   : > { %944 = vmatpush.bf16.msrb.mxu1 %v4099_v46  ;;  %908 = vmatpush.bf16.msra.mxu2 %v3919_v63  ;;  %v5475_v22 = vld [vmem:[#allocation6 + $0x164] sm:$0xf]  ;;  %v4032_v24 = vld [vmem:[#allocation6 + $0x170] sm:$0xf0]  ;;  %v4015_v25 = vor.u32 %v5473_v17, %v4014_v16  ;;  %v3870_v26 = vld [vmem:[#allocation6 + $0x20] sm:$0xf]  ;;  %v3907_v30 = vor.u32 %v5443_v20, %v3904_v21 }
  0x6a   : > { %921 = vmatpush.bf16.msra.mxu3 %v4047_v1  ;;  %v5437_v27 = vld [vmem:[#allocation6 + $0x2c] sm:$0xf0]  ;;  %v3998_v28 = vld [vmem:[#allocation6 + $0x120] sm:$0xf]  ;;  %v5439_v31 = vld [vmem:[#allocation6 + $0x44] sm:$0xf]  ;;  %v4035_v32 = vor.u32 %v5475_v22, %v4032_v24 }
  0x6b   : > { %v5469_v29 = vld [vmem:[#allocation6 + $0x12c] sm:$0xf0]  ;;  %v3888_v33 = vld [vmem:[#allocation6 + $0x50] sm:$0xf0]  ;;  %v5471_v34 = vld [vmem:[#allocation6 + $0x144] sm:$0xf]  ;;  %v3871_v36 = vor.u32 %v5437_v27, %v3870_v26 }
  0x6c   : > { %932 = vmatpush.bf16.msrb.mxu0 %v3955_v58  ;;  %v4016_v35 = vld [vmem:[#allocation6 + $0x150] sm:$0xf0]  ;;  %v3999_v37 = vor.u32 %v5469_v29, %v3998_v28  ;;  %v3854_v38 = vld [vmem:[#allocation6] sm:$0xf]  ;;  %v5433_v39 = vld [vmem:[#allocation6 + $0xc] sm:$0xf0]  ;;  %v3891_v44 = vor.u32 %v5439_v31, %v3888_v33 }
  0x6d   : > { %945 = vmatpush.bf16.msrb.mxu1 %v4083_v59  ;;  %909 = vmatpush.bf16.msra.mxu2 %v3903_v11  ;;  %v3982_v40 = vld [vmem:[#allocation6 + $0x100] sm:$0xf]  ;;  %v5465_v41 = vld [vmem:[#allocation6 + $0x10c] sm:$0xf0]  ;;  %v3974_v42 = vld [vmem:[#allocation6 + $0xe8] sm:$0xf]  ;;  %v4019_v47 = vor.u32 %v5471_v34, %v4016_v35  ;;  %v3855_v50 = vor.u32 %v5433_v39, %v3854_v38 }
  0x6e   : > { %922 = vmatpush.bf16.msra.mxu3 %v4031_v13  ;;  %v5462_v43 = vld [vmem:[#allocation6 + $0xf4] sm:$0xf0]  ;;  %v4102_v45 = vld [vmem:[#allocation6 + $0x1e8] sm:$0xf]  ;;  %v5435_v48 = vld [vmem:[#allocation6 + $0x24] sm:$0xf]  ;;  %v3983_v53 = vor.u32 %v5465_v41, %v3982_v40 }
  0x6f   : > { %v5494_v46 = vld [vmem:[#allocation6 + $0x1f4] sm:$0xf0]  ;;  %v3872_v49 = vld [vmem:[#allocation6 + $0x30] sm:$0xf0]  ;;  %v5467_v51 = vld [vmem:[#allocation6 + $0x124] sm:$0xf]  ;;  %v3975_v54 = vor.u32 %v5462_v43, %v3974_v42 }
  0x70   : > { %933 = vmatpush.bf16.msrb.mxu0 %v3939_v6  ;;  %v4000_v52 = vld [vmem:[#allocation6 + $0x130] sm:$0xf0]  ;;  %v4103_v55 = vor.u32 %v5494_v46, %v4102_v45  ;;  %v3958_v56 = vld [vmem:[#allocation6 + $0xc8] sm:$0xf]  ;;  %v5458_v57 = vld [vmem:[#allocation6 + $0xd4] sm:$0xf0]  ;;  %v3875_v58 = vor.u32 %v5435_v48, %v3872_v49 }
  0x71   : > { %946 = vmatpush.bf16.msrb.mxu1 %v4067_v7  ;;  %910 = vmatpush.bf16.msra.mxu2 %v3887_v23  ;;  %v4086_v59 = vld [vmem:[#allocation6 + $0x1c8] sm:$0xf]  ;;  %v5490_v60 = vld [vmem:[#allocation6 + $0x1d4] sm:$0xf0]  ;;  %v4003_v61 = vor.u32 %v5467_v51, %v4000_v52  ;;  %v5431_v62 = vld [vmem:[#allocation6 + $0x4] sm:$0xf]  ;;  %v3959_v4 = vor.u32 %v5458_v57, %v3958_v56 }
  0x72   : > { %923 = vmatpush.bf16.msra.mxu3 %v4015_v25  ;;  %v3856_v63 = vld [vmem:[#allocation6 + $0x10] sm:$0xf0]  ;;  %v5463_v0 = vld [vmem:[#allocation6 + $0x104] sm:$0xf]  ;;  %v5460_v2 = vld [vmem:[#allocation6 + $0xec] sm:$0xf]  ;;  %v4087_v7 = vor.u32 %v5490_v60, %v4086_v59 }
  0x73   : > { %v3984_v1 = vld [vmem:[#allocation6 + $0x110] sm:$0xf0]  ;;  %v3976_v3 = vld [vmem:[#allocation6 + $0xf8] sm:$0xf0]  ;;  %v5492_v5 = vld [vmem:[#allocation6 + $0x1ec] sm:$0xf]  ;;  %v3859_v8 = vor.u32 %v5431_v62, %v3856_v63 }
  0x74   : > { %934 = vmatpush.bf16.msrb.mxu0 %v3923_v18  ;;  %v4104_v6 = vld [vmem:[#allocation6 + $0x1f8] sm:$0xf0]  ;;  %v3987_v9 = vor.u32 %v5463_v0, %v3984_v1  ;;  %v3979_v10 = vor.u32 %v5460_v2, %v3976_v3  ;;  %v5456_v12 = vld [vmem:[#allocation6 + $0xcc] sm:$0xf]  ;;  %v3942_v18 = vld [vmem:[#allocation6 + $0xa8] sm:$0xf] }
  0x75   : > { %947 = vmatpush.bf16.msrb.mxu1 %v4051_v19  ;;  %911 = vmatpush.bf16.msra.mxu2 %v3871_v36  ;;  %v4107_v11 = vor.u32 %v5492_v5, %v4104_v6  ;;  %v3960_v13 = vld [vmem:[#allocation6 + $0xd8] sm:$0xf0]  ;;  %v5488_v14 = vld [vmem:[#allocation6 + $0x1cc] sm:$0xf]  ;;  %v5454_v19 = vld [vmem:[#allocation6 + $0xb4] sm:$0xf0] }
  0x76   : > { %924 = vmatpush.bf16.msra.mxu3 %v3999_v37  ;;  %v4088_v15 = vld [vmem:[#allocation6 + $0x1d8] sm:$0xf0]  ;;  %v3963_v16 = vor.u32 %v5456_v12, %v3960_v13  ;;  %v4070_v20 = vld [vmem:[#allocation6 + $0x1a8] sm:$0xf]  ;;  %v3943_v21 = vor.u32 %v5454_v19, %v3942_v18  ;;  %v5486_v22 = vld [vmem:[#allocation6 + $0x1b4] sm:$0xf0] }
  0x77   : > { %v4091_v17 = vor.u32 %v5488_v14, %v4088_v15  ;;  %v5452_v23 = vld [vmem:[#allocation6 + $0xac] sm:$0xf]  ;;  %v3944_v24 = vld [vmem:[#allocation6 + $0xb8] sm:$0xf0]  ;;  %v4071_v25 = vor.u32 %v5486_v22, %v4070_v20  ;;  %v5450_v31 = vld [vmem:[#allocation6 + $0x94] sm:$0xf0] }
  0x78   : > { %935 = vmatpush.bf16.msrb.mxu0 %v3907_v30  ;;  %v3947_v26 = vor.u32 %v5452_v23, %v3944_v24  ;;  %v5484_v27 = vld [vmem:[#allocation6 + $0x1ac] sm:$0xf]  ;;  %v4072_v28 = vld [vmem:[#allocation6 + $0x1b8] sm:$0xf0]  ;;  %v3926_v30 = vld [vmem:[#allocation6 + $0x88] sm:$0xf] }
  0x79   : > { %948 = vmatpush.bf16.msrb.mxu1 %v4035_v32  ;;  %912 = vmatpush.bf16.msra.mxu2 %v3855_v50  ;;  %v4075_v29 = vor.u32 %v5484_v27, %v4072_v28  ;;  %v4054_v32 = vld [vmem:[#allocation6 + $0x188] sm:$0xf]  ;;  %v3927_v33 = vor.u32 %v5450_v31, %v3926_v30  ;;  %v5482_v34 = vld [vmem:[#allocation6 + $0x194] sm:$0xf0]  ;;  %v5448_v35 = vld [vmem:[#allocation6 + $0x8c] sm:$0xf] }
  0x7a   : > { %925 = vmatpush.bf16.msra.mxu3 %v3983_v53  ;;  %v3928_v36 = vld [vmem:[#allocation6 + $0x98] sm:$0xf0]  ;;  %v4055_v37 = vor.u32 %v5482_v34, %v4054_v32  ;;  %v5480_v39 = vld [vmem:[#allocation6 + $0x18c] sm:$0xf]  ;;  %v3910_v42 = vld [vmem:[#allocation6 + $0x68] sm:$0xf] }
  0x7b   : > { %v3931_v38 = vor.u32 %v5448_v35, %v3928_v36  ;;  %v4056_v40 = vld [vmem:[#allocation6 + $0x198] sm:$0xf0]  ;;  %v5446_v43 = vld [vmem:[#allocation6 + $0x74] sm:$0xf0]  ;;  %v5476_v51 = vld [vmem:[#allocation6 + $0x16c] sm:$0xf] }
  0x7c   : > { %936 = vmatpush.bf16.msrb.mxu0 %v3891_v44  ;;  %v4059_v41 = vor.u32 %v5480_v39, %v4056_v40  ;;  %v4038_v44 = vld [vmem:[#allocation6 + $0x168] sm:$0xf]  ;;  %v3911_v45 = vor.u32 %v5446_v43, %v3910_v42  ;;  %v5478_v46 = vld [vmem:[#allocation6 + $0x174] sm:$0xf0]  ;;  %v3912_v48 = vld [vmem:[#allocation6 + $0x78] sm:$0xf0] }
  0x7d   : > { %949 = vmatpush.bf16.msrb.mxu1 %v4019_v47  ;;  %957 = vmatpush.bf16.msrb.mxu2 %v3975_v54  ;;  %v5444_v47 = vld [vmem:[#allocation6 + $0x6c] sm:$0xf]  ;;  %v4039_v49 = vor.u32 %v5478_v46, %v4038_v44  ;;  %v4040_v52 = vld [vmem:[#allocation6 + $0x178] sm:$0xf0]  ;;  %v3894_v54 = vld [vmem:[#allocation6 + $0x48] sm:$0xf] }
  0x7e   : > { %970 = vmatpush.bf16.msrb.mxu3 %v4103_v55  ;;  %v3915_v50 = vor.u32 %v5444_v47, %v3912_v48  ;;  %v4043_v53 = vor.u32 %v5476_v51, %v4040_v52  ;;  %v5442_v55 = vld [vmem:[#allocation6 + $0x54] sm:$0xf0]  ;;  %v4022_v56 = vld [vmem:[#allocation6 + $0x148] sm:$0xf]  ;;  %v5440_v59 = vld [vmem:[#allocation6 + $0x4c] sm:$0xf] }
  0x7f   : > { %v3895_v57 = vor.u32 %v5442_v55, %v3894_v54  ;;  %v3896_v60 = vld [vmem:[#allocation6 + $0x58] sm:$0xf0]  ;;  %v5472_v63 = vld [vmem:[#allocation6 + $0x14c] sm:$0xf]  ;;  %v3878_v1 = vld [vmem:[#allocation6 + $0x28] sm:$0xf] }
  0x80   : > { %937 = vmatpush.bf16.msrb.mxu0 %v3875_v58  ;;  %v5474_v58 = vld [vmem:[#allocation6 + $0x154] sm:$0xf0]  ;;  %v3899_v62 = vor.u32 %v5440_v59, %v3896_v60  ;;  %v4024_v0 = vld [vmem:[#allocation6 + $0x158] sm:$0xf0]  ;;  %v3862_v13 = vld [vmem:[#allocation6 + $0x8] sm:$0xf] }
  0x81   : > { %950 = vmatpush.bf16.msrb.mxu1 %v4003_v61  ;;  %958 = vmatpush.bf16.msrb.mxu2 %v3959_v4  ;;  %v4023_v61 = vor.u32 %v5474_v58, %v4022_v56  ;;  %v4027_v2 = vor.u32 %v5472_v63, %v4024_v0  ;;  %v5438_v3 = vld [vmem:[#allocation6 + $0x34] sm:$0xf0]  ;;  %v4006_v4 = vld [vmem:[#allocation6 + $0x128] sm:$0xf]  ;;  %v4008_v12 = vld [vmem:[#allocation6 + $0x138] sm:$0xf0] }
  0x82   : > { %971 = vmatpush.bf16.msrb.mxu3 %v4087_v7  ;;  %v5470_v5 = vld [vmem:[#allocation6 + $0x134] sm:$0xf0]  ;;  %v3879_v6 = vor.u32 %v5438_v3, %v3878_v1  ;;  %v5436_v7 = vld [vmem:[#allocation6 + $0x2c] sm:$0xf]  ;;  %v3864_v19 = vld [vmem:[#allocation6 + $0x18] sm:$0xf0] }
  0x83   : > { %v5434_v14 = vld [vmem:[#allocation6 + $0x14] sm:$0xf0]  ;;  %v5432_v18 = vld [vmem:[#allocation6 + $0xc] sm:$0xf]  ;;  %v5509_v42 = vld [vmem:[#allocation7 + $0x70] sm:$0xff]  ;;  %s374_s12 = scalar_lea.vmem [#allocation12], %s3815_s29 }
  0x84   : > { %938 = vmatpush.bf16.msrb.mxu0 %v3859_v8  ;;  %v3880_v8 = vld [vmem:[#allocation6 + $0x38] sm:$0xf0]  ;;  %v5464_v20 = vld [vmem:[#allocation6 + $0x10c] sm:$0xf]  ;;  %v3863_v22 = vor.u32 %v5434_v14, %v3862_v13  ;;  %v3867_v24 = vor.u32 %v5432_v18, %v3864_v19  ;;  %v5501_v43 = vld [vmem:[#allocation7 + $0x30] sm:$0xff]  ;;  %s3816_s17 = sshll.u32 %s6274_s28, 3 }
  0x85   : > { %951 = vmatpush.bf16.msrb.mxu1 %v3987_v9  ;;  %959 = vmatpush.bf16.msrb.mxu2 %v3943_v21  ;;  %v5468_v9 = vld [vmem:[#allocation6 + $0x12c] sm:$0xf]  ;;  %v3992_v21 = vld [vmem:[#allocation6 + $0x118] sm:$0xf0]  ;;  %v5525_v44 = vld [vmem:[#allocation7 + $0xf0] sm:$0xff]  ;;  %p6887_p1 = scmp.lt.s32.totalorder %s3816_s17, 15 }
  0x86   : > { %972 = vmatpush.bf16.msrb.mxu3 %v4071_v25  ;;  %v4011_v15 = vor.u32 %v5468_v9, %v4008_v12  ;;  %v3995_v25 = vor.u32 %v5464_v20, %v3992_v21  ;;  %v5510_v36 = vld [vmem:[#allocation7 + $0x78] sm:$0xff]  ;;  %v5500_v46 = vld [vmem:[#allocation7 + $0x28] sm:$0xff]  ;;  %v5507_v47 = vld [vmem:[#allocation7 + $0x60] sm:$0xff] }
  0x87   : > { %v5526_v39 = vld [vmem:[#allocation7 + $0xf8] sm:$0xff]  ;;  %v5499_v48 = vld [vmem:[#allocation7 + $0x20] sm:$0xff]  ;;  %v5524_v54 = vld [vmem:[#allocation7 + $0xe8] sm:$0xff]  ;;  %s7061_s17 = smov (!%p6887_p1, %s3816_s17), 15 }
  0x88   : > { %983 = vmatpush.bf16.msra.mxu0 %v3979_v10  ;;  %v4007_v10 = vor.u32 %v5470_v5, %v4006_v4  ;;  %v5498_v51 = vld [vmem:[#allocation7 + $0x18] sm:$0xff]  ;;  %v5497_v55 = vld [vmem:[#allocation7 + $0x10] sm:$0xff]  ;;  %v5523_v58 = vld [vmem:[#allocation7 + $0xe0] sm:$0xff]  ;;  %s3817_s28 = sshll.u32 %s7061_s17, 3 }
  0x89   : > { %996 = vmatpush.bf16.msra.mxu1 %v4107_v11  ;;  %960 = vmatpush.bf16.msrb.mxu2 %v3927_v33  ;;  %v3883_v11 = vor.u32 %v5436_v7, %v3880_v8  ;;  %v5518_v52 = vld [vmem:[#allocation7 + $0xb8] sm:$0xff]  ;;  %v5517_v56 = vld [vmem:[#allocation7 + $0xb0] sm:$0xff]  ;;  %v5496_v59 = vld [vmem:[#allocation7 + $0x8] sm:$0xff]  ;;  %s6943_s3 = scalar_lea.vmem %s7040_s7, %s3817_s28 }
  0x8a   : > { %973 = vmatpush.bf16.msrb.mxu3 %v4055_v37  ;;  %v5502_v37 = vld [vmem:[#allocation7 + $0x38] sm:$0xff]  ;;  %v5516_v60 = vld [vmem:[#allocation7 + $0xa8] sm:$0xff]  ;;  %v5515_v63 = vld [vmem:[#allocation7 + $0xa0] sm:$0xff] }
  0x8b   : > { %v5521_v0 = vld [vmem:[#allocation7 + $0xd0] sm:$0xff]  ;;  %v5514_v1 = vld [vmem:[#allocation7 + $0x98] sm:$0xff]  ;;  %v5519_v4 = vld [vmem:[#allocation7 + $0xc0] sm:$0xff] }
  0x8c   : > { %984 = vmatpush.bf16.msra.mxu0 %v3963_v16  ;;  %v3990_v16 = vld [vmem:[#allocation6 + $0x108] sm:$0xf]  ;;  %v5513_v3 = vld [vmem:[#allocation7 + $0x90] sm:$0xff]  ;;  %v5511_v7 = vld [vmem:[#allocation7 + $0x80] sm:$0xff] }
  0x8d   : > { %997 = vmatpush.bf16.msra.mxu1 %v4091_v17  ;;  %961 = vmatpush.bf16.msrb.mxu2 %v3911_v45  ;;  %v5466_v17 = vld [vmem:[#allocation6 + $0x114] sm:$0xf0]  ;;  %v5508_v45 = vld [vmem:[#allocation7 + $0x68] sm:$0xff]  ;;  %v5533_v13 = vld [vmem:[#allocation7 + $0x130] sm:$0xff] }
  0x8e   : > { %974 = vmatpush.bf16.msrb.mxu3 %v4039_v49  ;;  %v3991_v23 = vor.u32 %v5466_v17, %v3990_v16  ;;  %v5506_v49 = vld [vmem:[#allocation7 + $0x58] sm:$0xff]  ;;  %v5512_v5 = vld [vmem:[#allocation7 + $0x88] sm:$0xff] }
  0x8f   : > { %v5534_v9 = vld [vmem:[#allocation7 + $0x138] sm:$0xff] }
  0x90   : > { %985 = vmatpush.bf16.msra.mxu0 %v3947_v26  ;;  %v429_v26 = vld [vmem:[#allocation9] ss:$8 sm:$0x3] }
  0x91   : > { %998 = vmatpush.bf16.msra.mxu1 %v4075_v29  ;;  %962 = vmatpush.bf16.msrb.mxu2 %v3895_v57  ;;  %v432_v27 = vperm.slane %v429_v26, 0  ;;  %v433_v28 = vperm.slane %v429_v26, 1  ;;  %v5503_v57 = vld [vmem:[#allocation7 + $0x40] sm:$0xff] }
  0x92   : > { %975 = vmatpush.bf16.msrb.mxu3 %v4023_v61  ;;  %v5522_v61 = vld [vmem:[#allocation7 + $0xd8] sm:$0xff] }
  0x94   : > { %986 = vmatpush.bf16.msra.mxu0 %v3931_v38 }
  0x95   : > { %999 = vmatpush.bf16.msra.mxu1 %v4059_v41  ;;  %963 = vmatpush.bf16.msrb.mxu2 %v3879_v6  ;;  %v573_v6 = vld [vmem:[#allocation9 + $0x1] ss:$8 sm:$0xf] }
  0x96   : > { %976 = vmatpush.bf16.msrb.mxu3 %v4007_v10  ;;  %v578_v8 = vperm.slane %v573_v6, 1  ;;  %v580_v26 = vperm.slane %v573_v6, 3 }
  0x98   : > { %987 = vmatpush.bf16.msra.mxu0 %v3915_v50  ;;  %v5505_v50 = vld [vmem:[#allocation7 + $0x50] sm:$0xff] }
  0x99   : > { %1000 = vmatpush.bf16.msra.mxu1 %v4043_v53  ;;  %964 = vmatpush.bf16.msrb.mxu2 %v3863_v22  ;;  %v5504_v53 = vld [vmem:[#allocation7 + $0x48] sm:$0xff] }
  0x9a   : > { %977 = vmatpush.bf16.msrb.mxu3 %v3991_v23 }
  0x9c   : > { %988 = vmatpush.bf16.msra.mxu0 %v3899_v62  ;;  %v5495_v62 = vld [vmem:[#allocation7] sm:$0xff] }
  0x9d   : > { %1001 = vmatpush.bf16.msra.mxu1 %v4027_v2  ;;  %v5520_v2 = vld [vmem:[#allocation7 + $0xc8] sm:$0xff] }
  0xa0   : > { %989 = vmatpush.bf16.msra.mxu0 %v3883_v11 }
  0xa1   : > { %1002 = vmatpush.bf16.msra.mxu1 %v4011_v15  ;;  %v577_v15 = vperm.slane %v573_v6, 0 }
  0xa4   : > { %990 = vmatpush.bf16.msra.mxu0 %v3867_v24 }
  0xa5   : > { %1003 = vmatpush.bf16.msra.mxu1 %v3995_v25 }
  0xe4   : > { %v489_v29 = vpop.f32.mrf.mxu0 }
  0xe5   : > { %v490_v30 = vadd.f32 %v489_v29, %v432_v27  ;;  %v502_v31 = vpop.f32.mrf.mxu1 }
  0xe6   : > { %v503_v32 = vadd.f32 %v502_v31, %v433_v28 }
  0xe7   : > { %v506_v33 = vmax.f32 %v490_v30, 0.0 }
  0xe8   : > { %v507_v34 = vmax.f32 %v503_v32, 0.0 }
  0xe9   : > { %v574_v35 = vpack.c.bf16 %v506_v33, %v506_v33  ;;  %v579_v33 = vperm.slane %v573_v6, 2  ;;  %v4374_v6 = vld [vmem:[#allocation6 + $0x2c8] sm:$0xf] }
  0xea   : > { %v575_v38 = vpack.c.bf16 %v507_v34, %v507_v34 }
  0xeb   : > { %913 = vmatmul.bf16.vlgmr.msra.gmra.mxu2 %v574_v35  ;;  %939 = vmatmul.bf16.vlgmr.msrb.gmra.mxu0 %v574_v35 }
  0xec   : > { %926 = vmatmul.bf16.vlgmr.msra.gmra.mxu3 %v575_v38  ;;  %952 = vmatmul.bf16.vlgmr.msrb.gmra.mxu1 %v575_v38  ;;  %v491_v40 = vpop.f32.mrf.mxu0 }
  0xed   : > { %v504_v41 = vpop.f32.mrf.mxu1  ;;  %1287 = vmatpush.bf16.msra.mxu3 %v5510_v36  ;;  %1274 = vmatpush.bf16.msra.mxu2 %v5502_v37 }
  0xee   : > { %1313 = vmatpush.bf16.msrb.mxu1 %v5526_v39  ;;  %1300 = vmatpush.bf16.msrb.mxu0 %v5518_v52  ;;  %v4382_v52 = vld [vmem:[#allocation6 + $0x2e0] sm:$0xf] }
  0xf1   : > { %1288 = vmatpush.bf16.msra.mxu3 %v5509_v42  ;;  %1275 = vmatpush.bf16.msra.mxu2 %v5501_v43 }
  0xf2   : > { %1314 = vmatpush.bf16.msrb.mxu1 %v5525_v44  ;;  %1301 = vmatpush.bf16.msrb.mxu0 %v5517_v56  ;;  %v4384_v56 = vld [vmem:[#allocation6 + $0x2f0] sm:$0xf0] }
  0xf5   : > { %1289 = vmatpush.bf16.msra.mxu3 %v5508_v45  ;;  %1276 = vmatpush.bf16.msra.mxu2 %v5500_v46  ;;  %v5532_v46 = vld [vmem:[#allocation7 + $0x128] sm:$0xff] }
  0xf6   : > { %1315 = vmatpush.bf16.msrb.mxu1 %v5524_v54  ;;  %1302 = vmatpush.bf16.msrb.mxu0 %v5516_v60  ;;  %v5563_v54 = vld [vmem:[#allocation6 + $0x2e4] sm:$0xf] }
  0xf9   : > { %1290 = vmatpush.bf16.msra.mxu3 %v5507_v47  ;;  %1277 = vmatpush.bf16.msra.mxu2 %v5499_v48  ;;  %v5531_v47 = vld [vmem:[#allocation7 + $0x120] sm:$0xff]  ;;  %v5530_v48 = vld [vmem:[#allocation7 + $0x118] sm:$0xff] }
  0xfa   : > { %1316 = vmatpush.bf16.msrb.mxu1 %v5523_v58  ;;  %1303 = vmatpush.bf16.msrb.mxu0 %v5515_v63  ;;  %v5566_v58 = vld [vmem:[#allocation6 + $0x2f4] sm:$0xf0]  ;;  %v4366_v63 = vld [vmem:[#allocation6 + $0x2c0] sm:$0xf] }
  0xfb   : > { %965 = vmatmul.bf16.vlgmr.msrb.gmra.mxu2 %v574_v35  ;;  %991 = vmatmul.bf16.vlgmr.msra.gmra.mxu0 %v574_v35 }
  0xfc   : > { %978 = vmatmul.bf16.vlgmr.msrb.gmra.mxu3 %v575_v38  ;;  %1004 = vmatmul.bf16.vlgmr.msra.gmra.mxu1 %v575_v38 }
  0xfd   : > { %1291 = vmatpush.bf16.msra.mxu3 %v5506_v49  ;;  %1278 = vmatpush.bf16.msra.mxu2 %v5498_v51  ;;  %v5529_v49 = vld [vmem:[#allocation7 + $0x110] sm:$0xff]  ;;  %v5527_v51 = vld [vmem:[#allocation7 + $0x100] sm:$0xff] }
  0xfe   : > { %1317 = vmatpush.bf16.msrb.mxu1 %v5522_v61  ;;  %1304 = vmatpush.bf16.msrb.mxu0 %v5514_v1  ;;  %v5564_v61 = vld [vmem:[#allocation6 + $0x2ec] sm:$0xf]  ;;  %v5561_v1 = vld [vmem:[#allocation6 + $0x2cc] sm:$0xf0] }
 0x101   : > { %1292 = vmatpush.bf16.msra.mxu3 %v5505_v50  ;;  %1279 = vmatpush.bf16.msra.mxu2 %v5497_v55  ;;  %v5528_v50 = vld [vmem:[#allocation7 + $0x108] sm:$0xff] }
 0x102   : > { %1318 = vmatpush.bf16.msrb.mxu1 %v5521_v0  ;;  %1305 = vmatpush.bf16.msrb.mxu0 %v5513_v3  ;;  %v4368_v3 = vld [vmem:[#allocation6 + $0x2d0] sm:$0xf0] }
 0x105   : > { %1293 = vmatpush.bf16.msra.mxu3 %v5504_v53  ;;  %1280 = vmatpush.bf16.msra.mxu2 %v5496_v59  ;;  %v5565_v53 = vld [vmem:[#allocation6 + $0x2ec] sm:$0xf0]  ;;  %v4387_v59 = vor.u32 %v5563_v54, %v4384_v56  ;;  %v4304_v56 = vld [vmem:[#allocation6 + $0x250] sm:$0xf0] }
 0x106   : > { %1319 = vmatpush.bf16.msrb.mxu1 %v5520_v2  ;;  %1306 = vmatpush.bf16.msrb.mxu0 %v5512_v5  ;;  %v4383_v55 = vor.u32 %v5565_v53, %v4382_v52  ;;  %v5559_v2 = vld [vmem:[#allocation6 + $0x2c4] sm:$0xf]  ;;  %v5545_v52 = vld [vmem:[#allocation6 + $0x24c] sm:$0xf0] }
 0x107   : > { %v4371_v5 = vor.u32 %v5559_v2, %v4368_v3  ;;  %v5543_v53 = vld [vmem:[#allocation6 + $0x244] sm:$0xf] }
 0x109   : > { %1294 = vmatpush.bf16.msra.mxu3 %v5503_v57  ;;  %1281 = vmatpush.bf16.msra.mxu2 %v5495_v62  ;;  %v4390_v57 = vld [vmem:[#allocation6 + $0x2e8] sm:$0xf]  ;;  %v4392_v62 = vld [vmem:[#allocation6 + $0x2f8] sm:$0xf0] }
 0x10a   : > { %1320 = vmatpush.bf16.msrb.mxu1 %v5519_v4  ;;  %1307 = vmatpush.bf16.msrb.mxu0 %v5511_v7  ;;  %v4391_v60 = vor.u32 %v5566_v58, %v4390_v57  ;;  %v4395_v0 = vor.u32 %v5564_v61, %v4392_v62  ;;  %v4367_v4 = vor.u32 %v5561_v1, %v4366_v63  ;;  %v5562_v7 = vld [vmem:[#allocation6 + $0x2d4] sm:$0xf0]  ;;  %v4310_v57 = vld [vmem:[#allocation6 + $0x248] sm:$0xf]  ;;  %v4312_v61 = vld [vmem:[#allocation6 + $0x258] sm:$0xf0] }
 0x10b   : > { %v5546_v58 = vld [vmem:[#allocation6 + $0x254] sm:$0xf0]  ;;  %v4307_v63 = vor.u32 %v5543_v53, %v4304_v56  ;;  %v4814_v53 = vld [vmem:[%s6400_s22 + $0x340] sm:$0xf] }
 0x10c   : > { %v5739_v56 = vld [vmem:[%s6400_s22 + $0x55c] sm:$0xf0] }
 0x10d   : > { %1393 = vmatpush.bf16.msrb.mxu2 %v5534_v9  ;;  %1611 = vmatpush.bf16.msrb.mxu3 %v4383_v55  ;;  %v4375_v9 = vor.u32 %v5562_v7, %v4374_v6 }
 0x10e   : > { %1624 = vmatpush.bf16.msra.mxu0 %v4387_v59  ;;  %1637 = vmatpush.bf16.msra.mxu1 %v4391_v60  ;;  %v5544_v60 = vld [vmem:[#allocation6 + $0x24c] sm:$0xf] }
 0x10f   : > { %v4315_v2 = vor.u32 %v5544_v60, %v4312_v61  ;;  %v5358_v60 = vld [vmem:[%s6400_s22 + $0x780] sm:$0xf] }
 0x110   : > { %v5811_v61 = vld [vmem:[%s6400_s22 + $0x79c] sm:$0xf0] }
 0x111   : > { %1394 = vmatpush.bf16.msrb.mxu2 %v5533_v13  ;;  %1612 = vmatpush.bf16.msrb.mxu3 %v4367_v4 }
 0x112   : > { %1625 = vmatpush.bf16.msra.mxu0 %v4371_v5  ;;  %1638 = vmatpush.bf16.msra.mxu1 %v4375_v9 }
 0x115   : > { %1395 = vmatpush.bf16.msrb.mxu2 %v5532_v46  ;;  %v1077_v46 = vld [vmem:[#allocation9 + $0x2] ss:$0 sm:$0xff] }
 0x119   : > { %1396 = vmatpush.bf16.msrb.mxu2 %v5531_v47 }
 0x11d   : > { %1397 = vmatpush.bf16.msrb.mxu2 %v5530_v48 }
 0x121   : > { %1398 = vmatpush.bf16.msrb.mxu2 %v5529_v49 }
 0x125   : > { %1399 = vmatpush.bf16.msrb.mxu2 %v5528_v50 }
 0x129   : > { %1400 = vmatpush.bf16.msrb.mxu2 %v5527_v51  ;;  %v4302_v51 = vld [vmem:[#allocation6 + $0x240] sm:$0xf] }
 0x12a   : > { %v4303_v62 = vor.u32 %v5545_v52, %v4302_v51 }
 0x168   : > { %v940_v10 = vpop.f32.mrf.mxu0 }
 0x169   : > { %v941_v11 = vadd.f32 %v940_v10, %v578_v8  ;;  %v953_v12 = vpop.f32.mrf.mxu1  ;;  %v5560_v8 = vld [vmem:[#allocation6 + $0x2cc] sm:$0xf]  ;;  %v4376_v10 = vld [vmem:[#allocation6 + $0x2d8] sm:$0xf0] }
 0x16a   : > { %v4379_v13 = vor.u32 %v5560_v8, %v4376_v10 }
 0x16b   : > { %v954_v14 = vadd.f32 %v953_v12, %v941_v11  ;;  %v4350_v11 = vld [vmem:[#allocation6 + $0x2a0] sm:$0xf]  ;;  %v5557_v12 = vld [vmem:[#allocation6 + $0x2ac] sm:$0xf0] }
 0x16d   : > { %v1010_v16 = vmax.f32 %v954_v14, 0.0  ;;  %v5555_v14 = vld [vmem:[#allocation6 + $0x2a4] sm:$0xf] }
 0x16e   : > { %v914_v17 = vpop.f32.mrf.mxu2 }
 0x16f   : > { %v1079_v18 = vpack.c.bf16 %v1010_v16, %v1010_v16  ;;  %v915_v19 = vadd.f32 %v914_v17, %v577_v15  ;;  %v927_v20 = vpop.f32.mrf.mxu3  ;;  %v4352_v15 = vld [vmem:[#allocation6 + $0x2b0] sm:$0xf0]  ;;  %v4358_v16 = vld [vmem:[#allocation6 + $0x2a8] sm:$0xf] }
 0x170   : > { %v942_v21 = vpop.f32.mrf.mxu0 }
 0x171   : > { %v928_v22 = vadd.f32 %v927_v20, %v915_v19  ;;  %v955_v23 = vpop.f32.mrf.mxu1  ;;  %1295 = vmatmul.bf16.vlgmr.msra.gmra.mxu3 %v1079_v18  ;;  %v4351_v18 = vor.u32 %v5557_v12, %v4350_v11  ;;  %v5558_v19 = vld [vmem:[#allocation6 + $0x2b4] sm:$0xf0]  ;;  %v5556_v20 = vld [vmem:[#allocation6 + $0x2ac] sm:$0xf]  ;;  %v4360_v21 = vld [vmem:[#allocation6 + $0x2b8] sm:$0xf0] }
 0x172   : > { %v4359_v23 = vor.u32 %v5558_v19, %v4358_v16  ;;  %v4286_v11 = vld [vmem:[#allocation6 + $0x220] sm:$0xf]  ;;  %v5541_v12 = vld [vmem:[#allocation6 + $0x22c] sm:$0xf0]  ;;  %v4294_v16 = vld [vmem:[#allocation6 + $0x228] sm:$0xf] }
 0x173   : > { %v1009_v24 = vmax.f32 %v928_v22, 0.0  ;;  %v4355_v22 = vor.u32 %v5555_v14, %v4352_v15  ;;  %1613 = vmatpush.bf16.msrb.mxu3 %v4351_v18  ;;  %v4287_v14 = vor.u32 %v5541_v12, %v4286_v11  ;;  %v4288_v15 = vld [vmem:[#allocation6 + $0x230] sm:$0xf0]  ;;  %v5542_v18 = vld [vmem:[#allocation6 + $0x234] sm:$0xf0] }
 0x174   : > { %1639 = vmatpush.bf16.msra.mxu1 %v4359_v23  ;;  %v4295_v19 = vor.u32 %v5542_v18, %v4294_v16  ;;  %v4270_v23 = vld [vmem:[#allocation6 + $0x200] sm:$0xf] }
 0x175   : > { %v1078_v25 = vpack.c.bf16 %v1009_v24, %v1009_v24  ;;  %v4334_v24 = vld [vmem:[#allocation6 + $0x280] sm:$0xf]  ;;  %1626 = vmatpush.bf16.msra.mxu0 %v4355_v22 }
 0x176   : > { %v916_v27 = vpop.f32.mrf.mxu2  ;;  %v4526_v11 = vld [vmem:[%s6400_s22 + $0x100] sm:$0xf] }
 0x177   : > { %v929_v28 = vpop.f32.mrf.mxu3  ;;  %1282 = vmatmul.bf16.vlgmr.msra.gmra.mxu2 %v1078_v25  ;;  %v5553_v25 = vld [vmem:[#allocation6 + $0x28c] sm:$0xf0]  ;;  %v4363_v27 = vor.u32 %v5556_v20, %v4360_v21  ;;  %v5540_v20 = vld [vmem:[#allocation6 + $0x22c] sm:$0xf]  ;;  %v4296_v21 = vld [vmem:[#allocation6 + $0x238] sm:$0xf0] }
 0x178   : > { %v992_v29 = vpop.f32.mrf.mxu0  ;;  %1650 = vmatpush.bf16.msra.mxu2 %v4395_v0  ;;  %v4336_v28 = vld [vmem:[#allocation6 + $0x290] sm:$0xf0]  ;;  %v4311_v0 = vor.u32 %v5546_v58, %v4310_v57  ;;  %v4299_v22 = vor.u32 %v5540_v20, %v4296_v21  ;;  %v4590_v57 = vld [vmem:[%s6400_s22 + $0x180] sm:$0xf] }
 0x179   : > { %v993_v30 = vadd.f32 %v992_v29, %v580_v26  ;;  %v1005_v31 = vpop.f32.mrf.mxu1  ;;  %v5551_v26 = vld [vmem:[#allocation6 + $0x284] sm:$0xf]  ;;  %v4342_v29 = vld [vmem:[#allocation6 + $0x288] sm:$0xf]  ;;  %v5619_v58 = vld [vmem:[%s6400_s22 + $0x19c] sm:$0xf0] }
 0x17a   : > { %v4750_v18 = vld [vmem:[%s6400_s22 + $0x2c0] sm:$0xf] }
 0x17b   : > { %v1006_v32 = vadd.f32 %v1005_v31, %v993_v30  ;;  %v5554_v30 = vld [vmem:[#allocation6 + $0x294] sm:$0xf0]  ;;  %v5552_v31 = vld [vmem:[#allocation6 + $0x28c] sm:$0xf]  ;;  %v5723_v20 = vld [vmem:[%s6400_s22 + $0x4dc] sm:$0xf0] }
 0x17c   : > { %1651 = vmatpush.bf16.msra.mxu2 %v4379_v13  ;;  %v5539_v13 = vld [vmem:[#allocation6 + $0x224] sm:$0xf] }
 0x17d   : > { %v1012_v34 = vmax.f32 %v1006_v32, 0.0  ;;  %v4344_v32 = vld [vmem:[#allocation6 + $0x298] sm:$0xf0] }
 0x17e   : > { %v966_v35 = vpop.f32.mrf.mxu2 }
 0x17f   : > { %v1081_v36 = vpack.c.bf16 %v1012_v34, %v1012_v34  ;;  %v967_v37 = vadd.f32 %v966_v35, %v579_v33  ;;  %v979_v38 = vpop.f32.mrf.mxu3  ;;  %v4335_v33 = vor.u32 %v5553_v25, %v4334_v24  ;;  %v4339_v34 = vor.u32 %v5551_v26, %v4336_v28  ;;  %v5537_v24 = vld [vmem:[#allocation6 + $0x20c] sm:$0xf0]  ;;  %v5535_v25 = vld [vmem:[#allocation6 + $0x204] sm:$0xf]  ;;  %v4278_v28 = vld [vmem:[#allocation6 + $0x208] sm:$0xf] }
 0x180   : > { %v994_v39 = vpop.f32.mrf.mxu0  ;;  %v4343_v35 = vor.u32 %v5554_v30, %v4342_v29  ;;  %1652 = vmatpush.bf16.msra.mxu2 %v4363_v27  ;;  %v4271_v26 = vor.u32 %v5537_v24, %v4270_v23  ;;  %v4272_v27 = vld [vmem:[#allocation6 + $0x210] sm:$0xf0]  ;;  %v5538_v29 = vld [vmem:[#allocation6 + $0x214] sm:$0xf0]  ;;  %v4494_v23 = vld [vmem:[%s6400_s22 + $0xc0] sm:$0xf] }
 0x181   : > { %v980_v40 = vadd.f32 %v979_v38, %v967_v37  ;;  %v1007_v41 = vpop.f32.mrf.mxu1  ;;  %1321 = vmatmul.bf16.vlgmr.msrb.gmra.mxu1 %v1081_v36  ;;  %v4318_v36 = vld [vmem:[#allocation6 + $0x260] sm:$0xf]  ;;  %v5549_v37 = vld [vmem:[#allocation6 + $0x26c] sm:$0xf0]  ;;  %v5547_v38 = vld [vmem:[#allocation6 + $0x264] sm:$0xf]  ;;  %1614 = vmatpush.bf16.msrb.mxu3 %v4335_v33  ;;  %v4275_v30 = vor.u32 %v5535_v25, %v4272_v27 }
 0x182   : > { %v4320_v41 = vld [vmem:[#allocation6 + $0x270] sm:$0xf0]  ;;  %v4319_v48 = vor.u32 %v5549_v37, %v4318_v36  ;;  %1627 = vmatpush.bf16.msra.mxu0 %v4339_v34  ;;  %1640 = vmatpush.bf16.msra.mxu1 %v4343_v35  ;;  %v4280_v33 = vld [vmem:[#allocation6 + $0x218] sm:$0xf0]  ;;  %v4878_v35 = vld [vmem:[%s6400_s22 + $0x3c0] sm:$0xf] }
 0x183   : > { %v1011_v42 = vmax.f32 %v980_v40, 0.0  ;;  %v4347_v40 = vor.u32 %v5552_v31, %v4344_v32  ;;  %v4323_v49 = vor.u32 %v5547_v38, %v4320_v41  ;;  %v4279_v31 = vor.u32 %v5538_v29, %v4278_v28  ;;  %v5536_v32 = vld [vmem:[#allocation6 + $0x20c] sm:$0xf]  ;;  %v5691_v36 = vld [vmem:[%s6400_s22 + $0x3dc] sm:$0xf0] }
 0x184   : > { %v4283_v34 = vor.u32 %v5536_v32, %v4280_v33  ;;  %v5134_v37 = vld [vmem:[%s6400_s22 + $0x5c0] sm:$0xf]  ;;  %v4879_v38 = vor.u32 %v5691_v36, %v4878_v35 }
 0x185   : > { %v1080_v43 = vpack.c.bf16 %v1011_v42, %v1011_v42  ;;  %v4326_v42 = vld [vmem:[#allocation6 + $0x268] sm:$0xf]  ;;  %1653 = vmatpush.bf16.msra.mxu2 %v4347_v40  ;;  %1615 = vmatpush.bf16.msrb.mxu3 %v4319_v48  ;;  %v4846_v40 = vld [vmem:[%s6400_s22 + $0x380] sm:$0xf] }
 0x186   : > { %v968_v44 = vpop.f32.mrf.mxu2  ;;  %1628 = vmatpush.bf16.msra.mxu0 %v4323_v49  ;;  %v5683_v41 = vld [vmem:[%s6400_s22 + $0x39c] sm:$0xf0] }
 0x187   : > { %v981_v45 = vpop.f32.mrf.mxu3  ;;  %1308 = vmatmul.bf16.vlgmr.msrb.gmra.mxu0 %v1080_v43  ;;  %v5550_v43 = vld [vmem:[#allocation6 + $0x274] sm:$0xf0]  ;;  %v5548_v44 = vld [vmem:[#allocation6 + $0x26c] sm:$0xf]  ;;  %v5390_v48 = vld [vmem:[%s6400_s22 + $0x7c0] sm:$0xf] }
 0x188   : > { %v4328_v45 = vld [vmem:[#allocation6 + $0x278] sm:$0xf0]  ;;  %v4327_v50 = vor.u32 %v5550_v43, %v4326_v42  ;;  %v5102_v43 = vld [vmem:[%s6400_s22 + $0x580] sm:$0xf] }
 0x189   : > { %v4331_v55 = vor.u32 %v5548_v44, %v4328_v45  ;;  %1616 = vmatpush.bf16.msrb.mxu3 %v4303_v62  ;;  %v5747_v44 = vld [vmem:[%s6400_s22 + $0x59c] sm:$0xf0] }
 0x18a   : > { %1641 = vmatpush.bf16.msra.mxu1 %v4327_v50  ;;  %1629 = vmatpush.bf16.msra.mxu0 %v4307_v63  ;;  %v4622_v45 = vld [vmem:[%s6400_s22 + $0x1c0] sm:$0xf]  ;;  %v5103_v50 = vor.u32 %v5747_v44, %v5102_v43  ;;  %v5359_v63 = vor.u32 %v5811_v61, %v5358_v60  ;;  %v5687_v60 = vld [vmem:[%s6400_s22 + $0x3c4] sm:$0xf] }
 0x18b   : > { %1654 = vmatpush.bf16.msra.mxu2 %v4331_v55  ;;  %v5819_v49 = vld [vmem:[%s6400_s22 + $0x7dc] sm:$0xf0]  ;;  %v4880_v61 = vld [vmem:[%s6400_s22 + $0x3e0] sm:$0xf0] }
 0x18c   : > { %v5391_v52 = vor.u32 %v5819_v49, %v5390_v48  ;;  %v5070_v55 = vld [vmem:[%s6400_s22 + $0x540] sm:$0xf] }
 0x18d   : > { %1617 = vmatpush.bf16.msrb.mxu3 %v4287_v14  ;;  %v5294_v14 = vld [vmem:[%s6400_s22 + $0x700] sm:$0xf] }
 0x18e   : > { %1642 = vmatpush.bf16.msra.mxu1 %v4311_v0  ;;  %v4782_v0 = vld [vmem:[%s6400_s22 + $0x300] sm:$0xf] }
 0x18f   : > { %1655 = vmatpush.bf16.msra.mxu2 %v4315_v2  ;;  %v5071_v2 = vor.u32 %v5739_v56, %v5070_v55  ;;  %v5595_v25 = vld [vmem:[%s6400_s22 + $0xdc] sm:$0xf0] }
 0x190   : > { %v5787_v27 = vld [vmem:[%s6400_s22 + $0x6dc] sm:$0xf0]  ;;  %v4495_v33 = vor.u32 %v5595_v25, %v4494_v23  ;;  %v5615_v25 = vld [vmem:[%s6400_s22 + $0x184] sm:$0xf] }
 0x191   : > { %1618 = vmatpush.bf16.msrb.mxu3 %v4271_v26  ;;  %v5262_v26 = vld [vmem:[%s6400_s22 + $0x6c0] sm:$0xf] }
 0x192   : > { %1643 = vmatpush.bf16.msra.mxu1 %v4295_v19  ;;  %v5006_v19 = vld [vmem:[%s6400_s22 + $0x4c0] sm:$0xf] }
 0x193   : > { %1656 = vmatpush.bf16.msra.mxu2 %v4299_v22  ;;  %v5007_v28 = vor.u32 %v5723_v20, %v5006_v19  ;;  %v4718_v29 = vld [vmem:[%s6400_s22 + $0x280] sm:$0xf]  ;;  %v5104_v19 = vld [vmem:[%s6400_s22 + $0x5a0] sm:$0xf0] }
 0x194   : > { %v5715_v32 = vld [vmem:[%s6400_s22 + $0x49c] sm:$0xf0] }
 0x195   : > { %v4462_v35 = vld [vmem:[%s6400_s22 + $0x80] sm:$0xf] }
 0x196   : > { %1644 = vmatpush.bf16.msra.mxu1 %v4279_v31  ;;  %v4974_v31 = vld [vmem:[%s6400_s22 + $0x480] sm:$0xf] }
 0x197   : > { %1657 = vmatpush.bf16.msra.mxu2 %v4283_v34  ;;  %v5263_v34 = vor.u32 %v5787_v27, %v5262_v26  ;;  %v4942_v43 = vld [vmem:[%s6400_s22 + $0x440] sm:$0xf]  ;;  %v4592_v26 = vld [vmem:[%s6400_s22 + $0x1a0] sm:$0xf0] }
 0x198   : > { %v5707_v44 = vld [vmem:[%s6400_s22 + $0x45c] sm:$0xf0]  ;;  %v5807_v27 = vld [vmem:[%s6400_s22 + $0x784] sm:$0xf] }
 0x199   : > { %v4430_v48 = vld [vmem:[%s6400_s22 + $0x40] sm:$0xf] }
 0x19a   : > { %v4654_v55 = vld [vmem:[%s6400_s22 + $0x200] sm:$0xf] }
 0x19b   : > { %v5635_v56 = vld [vmem:[%s6400_s22 + $0x21c] sm:$0xf0] }
 0x1f4   : > { %v6408_v17 = vpop.f32.mrf.mxu3 }
 0x1fa   : > { %v1283_v39 = vpop.f32.mrf.mxu2 }
 0x1fb   : > { %v1284_v59 = vadd.f32 %v1283_v39, %v1077_v46  ;;  %v5755_v39 = vld [vmem:[%s6400_s22 + $0x5dc] sm:$0xf0]  ;;  %v4847_v46 = vor.u32 %v5683_v41, %v4846_v40  ;;  %v4975_v40 = vor.u32 %v5715_v32, %v4974_v31  ;;  %v5671_v31 = vld [vmem:[%s6400_s22 + $0x344] sm:$0xf] }
 0x1fc   : > { %v1298_v47 = vpop.f32.mrf.mxu3  ;;  %v5135_v42 = vor.u32 %v5755_v39, %v5134_v37  ;;  %v5587_v37 = vld [vmem:[%s6400_s22 + $0x9c] sm:$0xf0]  ;;  %v4816_v32 = vld [vmem:[%s6400_s22 + $0x360] sm:$0xf0] }
 0x1fd   : > { %v1297_v3 = vadd.f32 %v6408_v17, %v1284_v59  ;;  %v4291_v17 = vor.u32 %v5539_v13, %v4288_v15  ;;  %v5627_v47 = vld [vmem:[%s6400_s22 + $0x1dc] sm:$0xf0]  ;;  %v4591_v59 = vor.u32 %v5619_v58, %v4590_v57 }
 0x1fe   : > { %v1322_v54 = vpop.f32.mrf.mxu1  ;;  %3251 = vmatpush.bf16.msrb.mxu1 %v5135_v42  ;;  %v4623_v51 = vor.u32 %v5627_v47, %v4622_v45  ;;  %v5603_v13 = vld [vmem:[%s6400_s22 + $0x11c] sm:$0xf0] }
 0x1ff   : > { %1630 = vmatpush.bf16.msra.mxu0 %v4291_v17  ;;  %v5795_v15 = vld [vmem:[%s6400_s22 + $0x71c] sm:$0xf0]  ;;  %v4527_v21 = vor.u32 %v5603_v13, %v4526_v11  ;;  %v4624_v11 = vld [vmem:[%s6400_s22 + $0x1e0] sm:$0xf0] }
 0x200   : > { %3225 = vmatpush.bf16.msra.mxu3 %v4623_v51  ;;  %v5659_v17 = vld [vmem:[%s6400_s22 + $0x2dc] sm:$0xf0]  ;;  %v5295_v22 = vor.u32 %v5795_v15, %v5294_v14  ;;  %v5392_v13 = vld [vmem:[%s6400_s22 + $0x7e0] sm:$0xf0]  ;;  %v4883_v14 = vor.u32 %v5687_v60, %v4880_v61 }
 0x201   : > { %v4751_v24 = vor.u32 %v5659_v17, %v4750_v18  ;;  %v5779_v39 = vld [vmem:[%s6400_s22 + $0x69c] sm:$0xf0]  ;;  %v4848_v18 = vld [vmem:[%s6400_s22 + $0x3a0] sm:$0xf0] }
 0x202   : > { %v1285_v1 = vpop.f32.mrf.mxu2  ;;  %3252 = vmatpush.bf16.msrb.mxu1 %v5103_v50  ;;  %v4686_v41 = vld [vmem:[%s6400_s22 + $0x240] sm:$0xf]  ;;  %v5743_v17 = vld [vmem:[%s6400_s22 + $0x584] sm:$0xf] }
 0x203   : > { %1631 = vmatpush.bf16.msra.mxu0 %v4275_v30  ;;  %v5667_v1 = vld [vmem:[%s6400_s22 + $0x31c] sm:$0xf0] }
 0x204   : > { %v1309_v4 = vpop.f32.mrf.mxu0  ;;  %3226 = vmatpush.bf16.msra.mxu3 %v4591_v59  ;;  %v4783_v12 = vor.u32 %v5667_v1, %v4782_v0  ;;  %v5651_v30 = vld [vmem:[%s6400_s22 + $0x29c] sm:$0xf0] }
 0x205   : > { %v1310_v5 = vadd.f32 %v1309_v4, %v1297_v3  ;;  %v4558_v3 = vld [vmem:[%s6400_s22 + $0x140] sm:$0xf]  ;;  %v4719_v36 = vor.u32 %v5651_v30, %v4718_v29  ;;  %v5107_v30 = vor.u32 %v5743_v17, %v5104_v19  ;;  %v4464_v17 = vld [vmem:[%s6400_s22 + $0xa0] sm:$0xf0] }
 0x206   : > { %v1324_v6 = vpop.f32.mrf.mxu1  ;;  %v5611_v4 = vld [vmem:[%s6400_s22 + $0x15c] sm:$0xf0]  ;;  %3253 = vmatpush.bf16.msrb.mxu1 %v5071_v2  ;;  %v5775_v19 = vld [vmem:[%s6400_s22 + $0x684] sm:$0xf] }
 0x207   : > { %v1323_v7 = vadd.f32 %v1322_v54, %v1310_v5  ;;  %3238 = vmatpush.bf16.msrb.mxu0 %v4879_v38  ;;  %v5675_v54 = vld [vmem:[%s6400_s22 + $0x35c] sm:$0xf0] }
 0x208   : > { %v4815_v62 = vor.u32 %v5675_v54, %v4814_v53  ;;  %v5326_v5 = vld [vmem:[%s6400_s22 + $0x740] sm:$0xf]  ;;  %v4943_v54 = vor.u32 %v5707_v44, %v4942_v43  ;;  %v5663_v43 = vld [vmem:[%s6400_s22 + $0x304] sm:$0xf] }
 0x209   : > { %v1326_v8 = vmax.f32 %v1323_v7, 0.0  ;;  %v5038_v6 = vld [vmem:[%s6400_s22 + $0x500] sm:$0xf]  ;;  %v4784_v44 = vld [vmem:[%s6400_s22 + $0x320] sm:$0xf0] }
 0x20a   : > { %v5731_v7 = vld [vmem:[%s6400_s22 + $0x51c] sm:$0xf0] }
 0x20b   : > { %v1344_v9 = vpack.c.bf16 %v1326_v8, %v1326_v8  ;;  %3239 = vmatpush.bf16.msrb.mxu0 %v4847_v46  ;;  %v5803_v8 = vld [vmem:[%s6400_s22 + $0x75c] sm:$0xf0]  ;;  %v5039_v16 = vor.u32 %v5731_v7, %v5038_v6  ;;  %v4463_v46 = vor.u32 %v5587_v37, %v4462_v35  ;;  %v5623_v7 = vld [vmem:[%s6400_s22 + $0x1c4] sm:$0xf]  ;;  %v4595_v35 = vor.u32 %v5615_v25, %v4592_v26 }
 0x20c   : > { %v1311_v10 = vpop.f32.mrf.mxu0  ;;  %v5230_v38 = vld [vmem:[%s6400_s22 + $0x680] sm:$0xf]  ;;  %v4627_v23 = vor.u32 %v5623_v7, %v4624_v11  ;;  %v5607_v37 = vld [vmem:[%s6400_s22 + $0x144] sm:$0xf] }
 0x20d   : > { %1401 = vmatmul.bf16.vlgmr.msrb.gmra.mxu2 %v1344_v9  ;;  %v4559_v9 = vor.u32 %v5611_v4, %v4558_v3  ;;  %v5327_v10 = vor.u32 %v5803_v8, %v5326_v5  ;;  %3254 = vmatpush.bf16.msrb.mxu1 %v5039_v16  ;;  %v5643_v42 = vld [vmem:[%s6400_s22 + $0x25c] sm:$0xf0]  ;;  %v5231_v47 = vor.u32 %v5779_v39, %v5230_v38  ;;  %v5679_v16 = vld [vmem:[%s6400_s22 + $0x384] sm:$0xf] }
 0x20e   : > { %3264 = vmatpush.bf16.msrb.mxu2 %v5391_v52  ;;  %v1343_v45 = vld [vmem:[#allocation9 + $0x3] ss:$0 sm:$0xff]  ;;  %v4687_v49 = vor.u32 %v5643_v42, %v4686_v41  ;;  %v4851_v29 = vor.u32 %v5679_v16, %v4848_v18  ;;  %v4560_v38 = vld [vmem:[%s6400_s22 + $0x160] sm:$0xf0]  ;;  %v4819_v41 = vor.u32 %v5671_v31, %v4816_v32 }
 0x20f   : > { %3240 = vmatpush.bf16.msrb.mxu0 %v4815_v62  ;;  %3227 = vmatpush.bf16.msra.mxu3 %v4559_v9  ;;  %v5579_v50 = vld [vmem:[%s6400_s22 + $0x5c] sm:$0xf0]  ;;  %v5751_v62 = vld [vmem:[%s6400_s22 + $0x5c4] sm:$0xf]  ;;  %v4655_v9 = vor.u32 %v5635_v56, %v4654_v55 }
 0x210   : > { %v5198_v51 = vld [vmem:[%s6400_s22 + $0x640] sm:$0xf]  ;;  %v4431_v0 = vor.u32 %v5579_v50, %v4430_v48  ;;  %v5799_v39 = vld [vmem:[%s6400_s22 + $0x744] sm:$0xf] }
 0x211   : > { %3255 = vmatpush.bf16.msrb.mxu1 %v5007_v28  ;;  %v5771_v52 = vld [vmem:[%s6400_s22 + $0x65c] sm:$0xf0]  ;;  %v5360_v28 = vld [vmem:[%s6400_s22 + $0x7a0] sm:$0xf0] }
 0x212   : > { %3265 = vmatpush.bf16.msrb.mxu2 %v5359_v63  ;;  %v4910_v58 = vld [vmem:[%s6400_s22 + $0x400] sm:$0xf]  ;;  %v5136_v63 = vld [vmem:[%s6400_s22 + $0x5e0] sm:$0xf0]  ;;  %v5199_v1 = vor.u32 %v5771_v52, %v5198_v51 }
 0x213   : > { %3241 = vmatpush.bf16.msrb.mxu0 %v4783_v12  ;;  %3228 = vmatpush.bf16.msra.mxu3 %v4527_v21  ;;  %v5699_v59 = vld [vmem:[%s6400_s22 + $0x41c] sm:$0xf0]  ;;  %v5815_v12 = vld [vmem:[%s6400_s22 + $0x7c4] sm:$0xf]  ;;  %v5139_v15 = vor.u32 %v5751_v62, %v5136_v63 }
 0x214   : > { %v4398_v3 = vld [vmem:[%s6400_s22] sm:$0xf]  ;;  %v4528_v50 = vld [vmem:[%s6400_s22 + $0x120] sm:$0xf0] }
 0x215   : > { %3256 = vmatpush.bf16.msrb.mxu1 %v4975_v40  ;;  %v5571_v4 = vld [vmem:[%s6400_s22 + $0x1c] sm:$0xf0]  ;;  %v5328_v40 = vld [vmem:[%s6400_s22 + $0x760] sm:$0xf0] }
 0x216   : > { %3266 = vmatpush.bf16.msrb.mxu2 %v5327_v10  ;;  %v5166_v5 = vld [vmem:[%s6400_s22 + $0x600] sm:$0xf]  ;;  %v4911_v10 = vor.u32 %v5699_v59, %v4910_v58  ;;  %v4399_v20 = vor.u32 %v5571_v4, %v4398_v3  ;;  %v5331_v48 = vor.u32 %v5799_v39, %v5328_v40  ;;  %v5791_v51 = vld [vmem:[%s6400_s22 + $0x704] sm:$0xf] }
 0x217   : > { %3242 = vmatpush.bf16.msrb.mxu0 %v4751_v24  ;;  %3229 = vmatpush.bf16.msra.mxu3 %v4495_v33  ;;  %v5763_v6 = vld [vmem:[%s6400_s22 + $0x61c] sm:$0xf0]  ;;  %v5395_v24 = vor.u32 %v5815_v12, %v5392_v13  ;;  %v5735_v33 = vld [vmem:[%s6400_s22 + $0x544] sm:$0xf] }
 0x218   : > { %v5167_v21 = vor.u32 %v5763_v6, %v5166_v5  ;;  %v5296_v52 = vld [vmem:[%s6400_s22 + $0x720] sm:$0xf0] }
 0x219   : > { %3257 = vmatpush.bf16.msrb.mxu1 %v4943_v54  ;;  %v5655_v55 = vld [vmem:[%s6400_s22 + $0x2c4] sm:$0xf]  ;;  %v5299_v60 = vor.u32 %v5791_v51, %v5296_v52  ;;  %v5756_v51 = vld [vmem:[%s6400_s22 + $0x5e4] sm:$0xf0] }
 0x21a   : > { %3267 = vmatpush.bf16.msrb.mxu2 %v5295_v22  ;;  %v4752_v56 = vld [vmem:[%s6400_s22 + $0x2e0] sm:$0xf0] }
 0x21b   : > { %3243 = vmatpush.bf16.msrb.mxu0 %v4719_v36  ;;  %3230 = vmatpush.bf16.msra.mxu3 %v4463_v46  ;;  %v5363_v36 = vor.u32 %v5807_v27, %v5360_v28  ;;  %v5040_v46 = vld [vmem:[%s6400_s22 + $0x520] sm:$0xf0]  ;;  %v4755_v61 = vor.u32 %v5655_v55, %v4752_v56 }
 0x21c   : > { %v5008_v58 = vld [vmem:[%s6400_s22 + $0x4e0] sm:$0xf0] }
 0x21d   : > { %3258 = vmatpush.bf16.msrb.mxu1 %v4911_v10  ;;  %v5647_v63 = vld [vmem:[%s6400_s22 + $0x284] sm:$0xf] }
 0x21e   : > { %3268 = vmatpush.bf16.msrb.mxu2 %v5263_v34  ;;  %v5072_v34 = vld [vmem:[%s6400_s22 + $0x560] sm:$0xf0] }
 0x21f   : > { %3244 = vmatpush.bf16.msrb.mxu0 %v4687_v49  ;;  %3231 = vmatpush.bf16.msra.mxu3 %v4431_v0  ;;  %v5075_v42 = vor.u32 %v5735_v33, %v5072_v34  ;;  %v5599_v49 = vld [vmem:[%s6400_s22 + $0x104] sm:$0xf] }
 0x220   : > { %v4531_v59 = vor.u32 %v5599_v49, %v4528_v50  ;;  %v4720_v0 = vld [vmem:[%s6400_s22 + $0x2a0] sm:$0xf0]  ;;  %v5142_v50 = vld [vmem:[%s6400_s22 + $0x5c8] sm:$0xf] }
 0x221   : > { %v4723_v3 = vor.u32 %v5647_v63, %v4720_v0  ;;  %v5591_v5 = vld [vmem:[%s6400_s22 + $0xc4] sm:$0xf]  ;;  %v5110_v63 = vld [vmem:[%s6400_s22 + $0x588] sm:$0xf] }
 0x222   : > { %3269 = vmatpush.bf16.msrb.mxu2 %v5231_v47  ;;  %v4563_v47 = vor.u32 %v5607_v37, %v4560_v38  ;;  %v4496_v6 = vld [vmem:[%s6400_s22 + $0xe0] sm:$0xf0]  ;;  %v5748_v0 = vld [vmem:[%s6400_s22 + $0x5a4] sm:$0xf0] }
 0x223   : > { %3245 = vmatpush.bf16.msrb.mxu0 %v4655_v9  ;;  %3232 = vmatpush.bf16.msra.mxu3 %v4399_v20  ;;  %v5783_v7 = vld [vmem:[%s6400_s22 + $0x6c4] sm:$0xf] }
 0x224   : > { %v5264_v9 = vld [vmem:[%s6400_s22 + $0x6e0] sm:$0xf0] }
 0x225   : > { %v5267_v10 = vor.u32 %v5783_v7, %v5264_v9  ;;  %v5639_v11 = vld [vmem:[%s6400_s22 + $0x244] sm:$0xf]  ;;  %v5820_v9 = vld [vmem:[%s6400_s22 + $0x7e4] sm:$0xf0] }
 0x226   : > { %3270 = vmatpush.bf16.msrb.mxu2 %v5199_v1  ;;  %v5711_v1 = vld [vmem:[%s6400_s22 + $0x484] sm:$0xf] }
 0x227   : > { %v4688_v12 = vld [vmem:[%s6400_s22 + $0x260] sm:$0xf0] }
 0x228   : > { %v4691_v13 = vor.u32 %v5639_v11, %v4688_v12  ;;  %v5583_v18 = vld [vmem:[%s6400_s22 + $0x84] sm:$0xf]  ;;  %v5111_v12 = vor.u32 %v5748_v0, %v5110_v63  ;;  %v5596_v63 = vld [vmem:[%s6400_s22 + $0xe4] sm:$0xf0] }
 0x229   : > { %v4467_v20 = vor.u32 %v5583_v18, %v4464_v17  ;;  %v5695_v25 = vld [vmem:[%s6400_s22 + $0x404] sm:$0xf]  ;;  %v5078_v18 = vld [vmem:[%s6400_s22 + $0x548] sm:$0xf] }
 0x22a   : > { %3271 = vmatpush.bf16.msrb.mxu2 %v5167_v21  ;;  %v5232_v21 = vld [vmem:[%s6400_s22 + $0x6a0] sm:$0xf0]  ;;  %v5740_v17 = vld [vmem:[%s6400_s22 + $0x564] sm:$0xf0] }
 0x22b   : > { %v4912_v27 = vld [vmem:[%s6400_s22 + $0x420] sm:$0xf0] }
 0x22c   : > { %v4915_v28 = vor.u32 %v5695_v25, %v4912_v27  ;;  %v5767_v31 = vld [vmem:[%s6400_s22 + $0x644] sm:$0xf]  ;;  %v5366_v25 = vld [vmem:[%s6400_s22 + $0x788] sm:$0xf]  ;;  %v5079_v27 = vor.u32 %v5740_v17, %v5078_v18 }
 0x22d   : > { %v5200_v33 = vld [vmem:[%s6400_s22 + $0x660] sm:$0xf0]  ;;  %v5636_v18 = vld [vmem:[%s6400_s22 + $0x224] sm:$0xf0] }
 0x22e   : > { %v5203_v34 = vor.u32 %v5767_v31, %v5200_v33  ;;  %v5759_v38 = vld [vmem:[%s6400_s22 + $0x604] sm:$0xf]  ;;  %v5732_v33 = vld [vmem:[%s6400_s22 + $0x524] sm:$0xf0] }
 0x22f   : > { %v5168_v39 = vld [vmem:[%s6400_s22 + $0x620] sm:$0xf0]  ;;  %v4918_v17 = vld [vmem:[%s6400_s22 + $0x408] sm:$0xf] }
 0x230   : > { %v5171_v40 = vor.u32 %v5759_v38, %v5168_v39  ;;  %v5334_v39 = vld [vmem:[%s6400_s22 + $0x748] sm:$0xf] }
 0x290   : > { %v1402_v53 = vpop.f32.mrf.mxu2 }
 0x291   : > { %v1403_v57 = vadd.f32 %v1402_v53, %v1343_v45  ;;  %v5727_v45 = vld [vmem:[%s6400_s22 + $0x504] sm:$0xf]  ;;  %v4787_v53 = vor.u32 %v5663_v43, %v4784_v44 }
 0x292   : > { %v5043_v54 = vor.u32 %v5727_v45, %v5040_v46 }
 0x293   : > { %v1406_v2 = vmax.f32 %v1403_v57, 0.0  ;;  %v5719_v57 = vld [vmem:[%s6400_s22 + $0x4c4] sm:$0xf] }
 0x294   : > { %v5011_v62 = vor.u32 %v5719_v57, %v5008_v58  ;;  %v5143_v58 = vor.u32 %v5756_v51, %v5142_v50  ;;  %v5302_v51 = vld [vmem:[%s6400_s22 + $0x708] sm:$0xf] }
 0x295   : > { %v1441_v8 = vpack.c.bf16 %v1406_v2, %v1406_v2  ;;  %v4976_v2 = vld [vmem:[%s6400_s22 + $0x4a0] sm:$0xf0] }
 0x296   : > { %v4979_v4 = vor.u32 %v5711_v1, %v4976_v2 }
 0x297   : > { %1619 = vmatmul.bf16.vlgmr.msrb.gmra.mxu3 %v1441_v8  ;;  %1632 = vmatmul.bf16.vlgmr.msra.gmra.mxu0 %v1441_v8 }
 0x298   : > { %1645 = vmatmul.bf16.vlgmr.msra.gmra.mxu1 %v1441_v8  ;;  %1658 = vmatmul.bf16.vlgmr.msra.gmra.mxu2 %v1441_v8  ;;  %v1404_v22 = vpop.f32.mrf.mxu2  ;;  %v4499_v8 = vor.u32 %v5591_v5, %v4496_v6 }
 0x299   : > { %3290 = vmatpush.bf16.msra.mxu0 %v4883_v14  ;;  %3303 = vmatpush.bf16.msra.mxu1 %v5139_v15  ;;  %v5703_v14 = vld [vmem:[%s6400_s22 + $0x444] sm:$0xf]  ;;  %v5235_v22 = vor.u32 %v5775_v19, %v5232_v21  ;;  %v4598_v21 = vld [vmem:[%s6400_s22 + $0x188] sm:$0xf] }
 0x29a   : > { %3277 = vmatpush.bf16.msrb.mxu3 %v4627_v23  ;;  %3316 = vmatpush.bf16.msra.mxu2 %v5395_v24  ;;  %v4944_v15 = vld [vmem:[%s6400_s22 + $0x460] sm:$0xf0] }
 0x29b   : > { %v4947_v16 = vor.u32 %v5703_v14, %v4944_v15  ;;  %v5631_v23 = vld [vmem:[%s6400_s22 + $0x204] sm:$0xf]  ;;  %v5676_v14 = vld [vmem:[%s6400_s22 + $0x364] sm:$0xf0] }
 0x29c   : > { %v4656_v24 = vld [vmem:[%s6400_s22 + $0x220] sm:$0xf0] }
 0x29d   : > { %3291 = vmatpush.bf16.msra.mxu0 %v4851_v29  ;;  %3304 = vmatpush.bf16.msra.mxu1 %v5107_v30  ;;  %v4659_v26 = vor.u32 %v5631_v23, %v4656_v24  ;;  %v5575_v29 = vld [vmem:[%s6400_s22 + $0x44] sm:$0xf] }
 0x29e   : > { %3278 = vmatpush.bf16.msrb.mxu3 %v4595_v35  ;;  %3317 = vmatpush.bf16.msra.mxu2 %v5363_v36  ;;  %v4432_v30 = vld [vmem:[%s6400_s22 + $0x60] sm:$0xf0] }
 0x29f   : > { %v4435_v32 = vor.u32 %v5575_v29, %v4432_v30  ;;  %v5567_v35 = vld [vmem:[%s6400_s22 + $0x4] sm:$0xf]  ;;  %v5668_v29 = vld [vmem:[%s6400_s22 + $0x324] sm:$0xf0] }
 0x2a0   : > { %v4400_v36 = vld [vmem:[%s6400_s22 + $0x20] sm:$0xf0] }
 0x2a1   : > { %3292 = vmatpush.bf16.msra.mxu0 %v4819_v41  ;;  %3305 = vmatpush.bf16.msra.mxu1 %v5075_v42  ;;  %v4403_v37 = vor.u32 %v5567_v35, %v4400_v36  ;;  %v1440_v41 = vld [vmem:[#allocation9 + $0x4] ss:$8 sm:$0xf]  ;;  %v4566_v36 = vld [vmem:[%s6400_s22 + $0x148] sm:$0xf] }
 0x2a2   : > { %3279 = vmatpush.bf16.msrb.mxu3 %v4563_v47  ;;  %3318 = vmatpush.bf16.msra.mxu2 %v5331_v48  ;;  %v1444_v42 = vperm.slane %v1440_v41, 1  ;;  %v1445_v43 = vperm.slane %v1440_v41, 2  ;;  %v4886_v47 = vld [vmem:[%s6400_s22 + $0x3c8] sm:$0xf]  ;;  %v1446_v55 = vperm.slane %v1440_v41, 3 }
 0x2a3   : > { %v5692_v48 = vld [vmem:[%s6400_s22 + $0x3e4] sm:$0xf0] }
 0x2a4   : > { %v4887_v56 = vor.u32 %v5692_v48, %v4886_v47  ;;  %v4534_v48 = vld [vmem:[%s6400_s22 + $0x108] sm:$0xf] }
 0x2a5   : > { %3293 = vmatpush.bf16.msra.mxu0 %v4787_v53  ;;  %3306 = vmatpush.bf16.msra.mxu1 %v5043_v54  ;;  %v1443_v53 = vperm.slane %v1440_v41, 0 }
 0x2a6   : > { %3280 = vmatpush.bf16.msrb.mxu3 %v4531_v59  ;;  %3319 = vmatpush.bf16.msra.mxu2 %v5299_v60  ;;  %v4854_v59 = vld [vmem:[%s6400_s22 + $0x388] sm:$0xf] }
 0x2a7   : > { %v5684_v60 = vld [vmem:[%s6400_s22 + $0x3a4] sm:$0xf0] }
 0x2a8   : > { %v4855_v7 = vor.u32 %v5684_v60, %v4854_v59  ;;  %v5716_v59 = vld [vmem:[%s6400_s22 + $0x4a4] sm:$0xf0] }
 0x2a9   : > { %3294 = vmatpush.bf16.msra.mxu0 %v4755_v61  ;;  %3307 = vmatpush.bf16.msra.mxu1 %v5011_v62 }
 0x2aa   : > { %3281 = vmatpush.bf16.msrb.mxu3 %v4499_v8  ;;  %3320 = vmatpush.bf16.msra.mxu2 %v5267_v10  ;;  %v5398_v8 = vld [vmem:[%s6400_s22 + $0x7c8] sm:$0xf] }
 0x2ad   : > { %3295 = vmatpush.bf16.msra.mxu0 %v4723_v3  ;;  %3308 = vmatpush.bf16.msra.mxu1 %v4979_v4  ;;  %v4630_v3 = vld [vmem:[%s6400_s22 + $0x1c8] sm:$0xf] }
 0x2ae   : > { %3282 = vmatpush.bf16.msrb.mxu3 %v4467_v20  ;;  %3321 = vmatpush.bf16.msra.mxu2 %v5235_v22  ;;  %v5628_v4 = vld [vmem:[%s6400_s22 + $0x1e4] sm:$0xf0]  ;;  %v5399_v20 = vor.u32 %v5820_v9, %v5398_v8 }
 0x2af   : > { %v5620_v22 = vld [vmem:[%s6400_s22 + $0x1a4] sm:$0xf0] }
 0x2b0   : > { %v4599_v31 = vor.u32 %v5620_v22, %v4598_v21  ;;  %v5708_v8 = vld [vmem:[%s6400_s22 + $0x464] sm:$0xf0]  ;;  %v5688_v22 = vld [vmem:[%s6400_s22 + $0x3cc] sm:$0xf] }
 0x2b1   : > { %3296 = vmatpush.bf16.msra.mxu0 %v4691_v13  ;;  %3309 = vmatpush.bf16.msra.mxu1 %v4947_v16  ;;  %v4822_v13 = vld [vmem:[%s6400_s22 + $0x348] sm:$0xf]  ;;  %v4631_v16 = vor.u32 %v5628_v4, %v4630_v3 }
 0x2b2   : > { %3283 = vmatpush.bf16.msrb.mxu3 %v4435_v32  ;;  %3322 = vmatpush.bf16.msra.mxu2 %v5203_v34  ;;  %v4823_v24 = vor.u32 %v5676_v14, %v4822_v13  ;;  %v5046_v32 = vld [vmem:[%s6400_s22 + $0x508] sm:$0xf] }
 0x2b3   : > { %v5047_v41 = vor.u32 %v5732_v33, %v5046_v32  ;;  %v4694_v4 = vld [vmem:[%s6400_s22 + $0x248] sm:$0xf] }
 0x2b4   : > { %v5238_v13 = vld [vmem:[%s6400_s22 + $0x688] sm:$0xf] }
 0x2b5   : > { %3297 = vmatpush.bf16.msra.mxu0 %v4659_v26  ;;  %3310 = vmatpush.bf16.msra.mxu1 %v4915_v28  ;;  %v5812_v26 = vld [vmem:[%s6400_s22 + $0x7a4] sm:$0xf0] }
 0x2b6   : > { %3284 = vmatpush.bf16.msrb.mxu3 %v4403_v37  ;;  %3323 = vmatpush.bf16.msra.mxu2 %v5171_v40  ;;  %v4790_v28 = vld [vmem:[%s6400_s22 + $0x308] sm:$0xf]  ;;  %v5367_v35 = vor.u32 %v5812_v26, %v5366_v25  ;;  %v5752_v25 = vld [vmem:[%s6400_s22 + $0x5cc] sm:$0xf] }
 0x2b7   : > { %v5612_v37 = vld [vmem:[%s6400_s22 + $0x164] sm:$0xf0]  ;;  %v4791_v38 = vor.u32 %v5668_v29, %v4790_v28 }
 0x2b8   : > { %v5804_v40 = vld [vmem:[%s6400_s22 + $0x764] sm:$0xf0] }
 0x2b9   : > { %v5335_v47 = vor.u32 %v5804_v40, %v5334_v39  ;;  %v5780_v14 = vld [vmem:[%s6400_s22 + $0x6a4] sm:$0xf0]  ;;  %v5744_v39 = vld [vmem:[%s6400_s22 + $0x58c] sm:$0xf] }
 0x2ba   : > { %v5239_v26 = vor.u32 %v5780_v14, %v5238_v13  ;;  %v4438_v28 = vld [vmem:[%s6400_s22 + $0x48] sm:$0xf]  ;;  %v5112_v40 = vld [vmem:[%s6400_s22 + $0x5a8] sm:$0xf0] }
 0x2bb   : > { %v5580_v29 = vld [vmem:[%s6400_s22 + $0x64] sm:$0xf0]  ;;  %v5800_v13 = vld [vmem:[%s6400_s22 + $0x74c] sm:$0xf] }
 0x2bc   : > { %v5772_v32 = vld [vmem:[%s6400_s22 + $0x664] sm:$0xf0]  ;;  %v5336_v14 = vld [vmem:[%s6400_s22 + $0x768] sm:$0xf0] }
 0x314   : > { %v1633_v44 = vpop.f32.mrf.mxu0 }
 0x315   : > { %v1634_v45 = vadd.f32 %v1633_v44, %v1444_v42  ;;  %v1646_v46 = vpop.f32.mrf.mxu1  ;;  %v4758_v42 = vld [vmem:[%s6400_s22 + $0x2c8] sm:$0xf]  ;;  %v4567_v44 = vor.u32 %v5612_v37, %v4566_v36  ;;  %v4439_v37 = vor.u32 %v5580_v29, %v4438_v28  ;;  %v5304_v28 = vld [vmem:[%s6400_s22 + $0x728] sm:$0xf0] }
 0x316   : > { %v1647_v49 = vadd.f32 %v1646_v46, %v1445_v43  ;;  %v5660_v43 = vld [vmem:[%s6400_s22 + $0x2e4] sm:$0xf0] }
 0x317   : > { %v1664_v52 = vmax.f32 %v1634_v45, 0.0  ;;  %v5014_v45 = vld [vmem:[%s6400_s22 + $0x4c8] sm:$0xf]  ;;  %v4759_v50 = vor.u32 %v5660_v43, %v4758_v42 }
 0x318   : > { %v1665_v54 = vmax.f32 %v1647_v49, 0.0  ;;  %v5724_v46 = vld [vmem:[%s6400_s22 + $0x4e4] sm:$0xf0] }
 0x319   : > { %v6543_v57 = vpack.c.bf16 %v1664_v52, %v1664_v52  ;;  %v5604_v49 = vld [vmem:[%s6400_s22 + $0x124] sm:$0xf0] }
 0x31a   : > { %v6547_v61 = vpack.c.bf16 %v1665_v54, %v1665_v54  ;;  %v1620_v62 = vpop.f32.mrf.mxu3  ;;  %v5796_v52 = vld [vmem:[%s6400_s22 + $0x724] sm:$0xf0] }
 0x31b   : > { %v1621_v1 = vadd.f32 %v1620_v62, %v1443_v53  ;;  %v1659_v2 = vpop.f32.mrf.mxu2  ;;  %3246 = vmatmul.bf16.vlgmr.msrb.gmra.mxu0 %v6543_v57  ;;  %v5015_v53 = vor.u32 %v5724_v46, %v5014_v45  ;;  %v4726_v54 = vld [vmem:[%s6400_s22 + $0x288] sm:$0xf]  ;;  %v5303_v60 = vor.u32 %v5796_v52, %v5302_v51  ;;  %v5624_v46 = vld [vmem:[%s6400_s22 + $0x1cc] sm:$0xf]  ;;  %v5115_v51 = vor.u32 %v5744_v39, %v5112_v40 }
 0x31c   : > { %v1660_v5 = vadd.f32 %v1659_v2, %v1446_v55  ;;  %3259 = vmatmul.bf16.vlgmr.msrb.gmra.mxu1 %v6547_v61  ;;  %3342 = vmatpush.bf16.msrb.mxu0 %v4887_v56  ;;  %v1635_v6 = vpop.f32.mrf.mxu0  ;;  %v5652_v55 = vld [vmem:[%s6400_s22 + $0x2a4] sm:$0xf0]  ;;  %v4535_v56 = vor.u32 %v5604_v49, %v4534_v48  ;;  %v5816_v49 = vld [vmem:[%s6400_s22 + $0x7cc] sm:$0xf] }
 0x31d   : > { %v1663_v10 = vmax.f32 %v1621_v1, 0.0  ;;  %3355 = vmatpush.bf16.msrb.mxu1 %v5143_v58  ;;  %v1648_v11 = vpop.f32.mrf.mxu1  ;;  %v4982_v58 = vld [vmem:[%s6400_s22 + $0x488] sm:$0xf]  ;;  %v4727_v0 = vor.u32 %v5652_v55, %v4726_v54  ;;  %v4824_v54 = vld [vmem:[%s6400_s22 + $0x368] sm:$0xf0] }
 0x31e   : > { %v1666_v15 = vmax.f32 %v1660_v5, 0.0  ;;  %v4502_v62 = vld [vmem:[%s6400_s22 + $0xc8] sm:$0xf]  ;;  %v4983_v3 = vor.u32 %v5716_v59, %v4982_v58  ;;  %v5736_v58 = vld [vmem:[%s6400_s22 + $0x54c] sm:$0xf] }
 0x31f   : > { %v6561_v19 = vpack.c.bf16 %v1663_v10, %v1663_v10  ;;  %v5270_v1 = vld [vmem:[%s6400_s22 + $0x6c8] sm:$0xf]  ;;  %v4503_v6 = vor.u32 %v5596_v63, %v4502_v62  ;;  %v5080_v59 = vld [vmem:[%s6400_s22 + $0x568] sm:$0xf0] }
 0x320   : > { %v6565_v23 = vpack.c.bf16 %v1666_v15, %v1666_v15  ;;  %3343 = vmatpush.bf16.msrb.mxu0 %v4855_v7  ;;  %v5788_v2 = vld [vmem:[%s6400_s22 + $0x6e4] sm:$0xf0]  ;;  %v5616_v62 = vld [vmem:[%s6400_s22 + $0x18c] sm:$0xf] }
 0x321   : > { %3356 = vmatpush.bf16.msrb.mxu1 %v5111_v12  ;;  %3233 = vmatmul.bf16.vlgmr.msra.gmra.mxu3 %v6561_v19  ;;  %v5644_v5 = vld [vmem:[%s6400_s22 + $0x264] sm:$0xf0]  ;;  %v5271_v9 = vor.u32 %v5788_v2, %v5270_v1  ;;  %v4600_v63 = vld [vmem:[%s6400_s22 + $0x1a8] sm:$0xf0] }
 0x322   : > { %3272 = vmatmul.bf16.vlgmr.msrb.gmra.mxu2 %v6565_v23  ;;  %3329 = vmatpush.bf16.msra.mxu3 %v4631_v16  ;;  %v1622_v30 = vpop.f32.mrf.mxu3  ;;  %v4950_v7 = vld [vmem:[%s6400_s22 + $0x448] sm:$0xf]  ;;  %v4695_v12 = vor.u32 %v5644_v5, %v4694_v4  ;;  %v5808_v1 = vld [vmem:[%s6400_s22 + $0x78c] sm:$0xf] }
 0x323   : > { %3368 = vmatpush.bf16.msrb.mxu2 %v5399_v20  ;;  %v1661_v34 = vpop.f32.mrf.mxu2  ;;  %v4470_v10 = vld [vmem:[%s6400_s22 + $0x88] sm:$0xf]  ;;  %v4951_v16 = vor.u32 %v5708_v8, %v4950_v7  ;;  %v5368_v2 = vld [vmem:[%s6400_s22 + $0x7a8] sm:$0xf0] }
 0x324   : > { %3344 = vmatpush.bf16.msrb.mxu0 %v4823_v24  ;;  %v5588_v11 = vld [vmem:[%s6400_s22 + $0xa4] sm:$0xf0]  ;;  %v4888_v24 = vld [vmem:[%s6400_s22 + $0x3e8] sm:$0xf0] }
 0x325   : > { %3357 = vmatpush.bf16.msrb.mxu1 %v5079_v27  ;;  %v4662_v15 = vld [vmem:[%s6400_s22 + $0x208] sm:$0xf]  ;;  %v4471_v21 = vor.u32 %v5588_v11, %v4470_v10  ;;  %v5144_v27 = vld [vmem:[%s6400_s22 + $0x5e8] sm:$0xf0]  ;;  %v4891_v34 = vor.u32 %v5688_v22, %v4888_v24  ;;  %v5339_v22 = vor.u32 %v5800_v13, %v5336_v14  ;;  %v5118_v13 = vld [vmem:[%s6400_s22 + $0x590] sm:$0xf] }
 0x326   : > { %3330 = vmatpush.bf16.msra.mxu3 %v4599_v31  ;;  %v5700_v20 = vld [vmem:[%s6400_s22 + $0x424] sm:$0xf0]  ;;  %v4663_v30 = vor.u32 %v5636_v18, %v4662_v15  ;;  %v5147_v36 = vor.u32 %v5752_v25, %v5144_v27  ;;  %v5664_v4 = vld [vmem:[%s6400_s22 + $0x30c] sm:$0xf]  ;;  %v5749_v14 = vld [vmem:[%s6400_s22 + $0x5ac] sm:$0xf0] }
 0x327   : > { %3369 = vmatpush.bf16.msrb.mxu2 %v5367_v35  ;;  %v5206_v31 = vld [vmem:[%s6400_s22 + $0x648] sm:$0xf]  ;;  %v4919_v33 = vor.u32 %v5700_v20, %v4918_v17  ;;  %v5680_v35 = vld [vmem:[%s6400_s22 + $0x38c] sm:$0xf] }
 0x328   : > { %3345 = vmatpush.bf16.msrb.mxu0 %v4791_v38  ;;  %v4856_v38 = vld [vmem:[%s6400_s22 + $0x3a8] sm:$0xf0]  ;;  %v4406_v42 = vld [vmem:[%s6400_s22 + $0x8] sm:$0xf] }
 0x329   : > { %3358 = vmatpush.bf16.msrb.mxu1 %v5047_v41  ;;  %v5207_v41 = vor.u32 %v5772_v32, %v5206_v31  ;;  %v5572_v43 = vld [vmem:[%s6400_s22 + $0x24] sm:$0xf0]  ;;  %v4859_v48 = vor.u32 %v5680_v35, %v4856_v38  ;;  %v4792_v5 = vld [vmem:[%s6400_s22 + $0x328] sm:$0xf0] }
 0x32a   : > { %3331 = vmatpush.bf16.msra.mxu3 %v4567_v44  ;;  %v5174_v44 = vld [vmem:[%s6400_s22 + $0x608] sm:$0xf]  ;;  %v4407_v52 = vor.u32 %v5572_v43, %v4406_v42  ;;  %v5728_v7 = vld [vmem:[%s6400_s22 + $0x50c] sm:$0xf] }
 0x32b   : > { %3370 = vmatpush.bf16.msrb.mxu2 %v5335_v47  ;;  %3298 = vmatmul.bf16.vlgmr.msra.gmra.mxu0 %v6543_v57  ;;  %v5764_v45 = vld [vmem:[%s6400_s22 + $0x624] sm:$0xf0]  ;;  %v4632_v47 = vld [vmem:[%s6400_s22 + $0x1e8] sm:$0xf0] }
 0x32c   : > { %3311 = vmatmul.bf16.vlgmr.msra.gmra.mxu1 %v6547_v61  ;;  %3346 = vmatpush.bf16.msrb.mxu0 %v4759_v50  ;;  %v5400_v50 = vld [vmem:[%s6400_s22 + $0x7e8] sm:$0xf0]  ;;  %v5175_v55 = vor.u32 %v5764_v45, %v5174_v44 }
 0x32d   : > { %3359 = vmatpush.bf16.msrb.mxu1 %v5015_v53  ;;  %v5672_v53 = vld [vmem:[%s6400_s22 + $0x34c] sm:$0xf] }
 0x32e   : > { %3332 = vmatpush.bf16.msra.mxu3 %v4535_v56  ;;  %v4635_v56 = vor.u32 %v5624_v46, %v4632_v47  ;;  %v5048_v8 = vld [vmem:[%s6400_s22 + $0x528] sm:$0xf0] }
 0x32f   : > { %3371 = vmatpush.bf16.msrb.mxu2 %v5303_v60  ;;  %v5403_v60 = vor.u32 %v5816_v49, %v5400_v50  ;;  %v5608_v10 = vld [vmem:[%s6400_s22 + $0x14c] sm:$0xf]  ;;  %v5051_v15 = vor.u32 %v5728_v7, %v5048_v8 }
 0x330   : > { %3347 = vmatpush.bf16.msrb.mxu0 %v4727_v0  ;;  %v4827_v0 = vor.u32 %v5672_v53, %v4824_v54  ;;  %v4568_v11 = vld [vmem:[%s6400_s22 + $0x168] sm:$0xf0] }
 0x331   : > { %3360 = vmatpush.bf16.msrb.mxu1 %v4983_v3  ;;  %3285 = vmatmul.bf16.vlgmr.msrb.gmra.mxu3 %v6561_v19  ;;  %v5083_v3 = vor.u32 %v5736_v58, %v5080_v59  ;;  %v4760_v18 = vld [vmem:[%s6400_s22 + $0x2e8] sm:$0xf0]  ;;  %v4571_v17 = vor.u32 %v5608_v10, %v4568_v11 }
 0x332   : > { %3324 = vmatmul.bf16.vlgmr.msra.gmra.mxu2 %v6565_v23  ;;  %3333 = vmatpush.bf16.msra.mxu3 %v4503_v6  ;;  %v4603_v6 = vor.u32 %v5616_v62, %v4600_v63  ;;  %v5720_v20 = vld [vmem:[%s6400_s22 + $0x4cc] sm:$0xf]  ;;  %v5693_v62 = vld [vmem:[%s6400_s22 + $0x3ec] sm:$0xf0] }
 0x333   : > { %3372 = vmatpush.bf16.msrb.mxu2 %v5271_v9  ;;  %v5371_v9 = vor.u32 %v5808_v1, %v5368_v2  ;;  %v5600_v24 = vld [vmem:[%s6400_s22 + $0x10c] sm:$0xf]  ;;  %v5150_v63 = vld [vmem:[%s6400_s22 + $0x5d0] sm:$0xf] }
 0x334   : > { %3348 = vmatpush.bf16.msrb.mxu0 %v4695_v12  ;;  %v4795_v12 = vor.u32 %v5664_v4, %v4792_v5  ;;  %v4536_v25 = vld [vmem:[%s6400_s22 + $0x128] sm:$0xf0]  ;;  %v5757_v1 = vld [vmem:[%s6400_s22 + $0x5ec] sm:$0xf0] }
 0x335   : > { %3361 = vmatpush.bf16.msrb.mxu1 %v4951_v16  ;;  %v5656_v16 = vld [vmem:[%s6400_s22 + $0x2cc] sm:$0xf]  ;;  %v4539_v32 = vor.u32 %v5600_v24, %v4536_v25  ;;  %v5151_v10 = vor.u32 %v5757_v1, %v5150_v63  ;;  %v5406_v25 = vld [vmem:[%s6400_s22 + $0x7d0] sm:$0xf] }
 0x336   : > { %3334 = vmatpush.bf16.msra.mxu3 %v4471_v21  ;;  %v5016_v21 = vld [vmem:[%s6400_s22 + $0x4e8] sm:$0xf0]  ;;  %v5605_v63 = vld [vmem:[%s6400_s22 + $0x12c] sm:$0xf0] }
 0x337   : > { %3373 = vmatpush.bf16.msrb.mxu2 %v5239_v26  ;;  %v4763_v26 = vor.u32 %v5656_v16, %v4760_v18  ;;  %v5792_v27 = vld [vmem:[%s6400_s22 + $0x70c] sm:$0xf]  ;;  %v5019_v29 = vor.u32 %v5720_v20, %v5016_v21  ;;  %v4638_v21 = vld [vmem:[%s6400_s22 + $0x1d0] sm:$0xf] }
 0x338   : > { %3349 = vmatpush.bf16.msrb.mxu0 %v4663_v30  ;;  %v5648_v30 = vld [vmem:[%s6400_s22 + $0x28c] sm:$0xf]  ;;  %v5307_v35 = vor.u32 %v5792_v27, %v5304_v28  ;;  %v5119_v27 = vor.u32 %v5749_v14, %v5118_v13  ;;  %v5310_v1 = vld [vmem:[%s6400_s22 + $0x710] sm:$0xf] }
 0x339   : > { %3362 = vmatpush.bf16.msrb.mxu1 %v4919_v33  ;;  %v4728_v31 = vld [vmem:[%s6400_s22 + $0x2a8] sm:$0xf0]  ;;  %v5278_v13 = vld [vmem:[%s6400_s22 + $0x6d0] sm:$0xf] }
 0x33a   : > { %3335 = vmatpush.bf16.msra.mxu3 %v4439_v37  ;;  %v5712_v33 = vld [vmem:[%s6400_s22 + $0x48c] sm:$0xf]  ;;  %v4731_v38 = vor.u32 %v5648_v30, %v4728_v31  ;;  %v5677_v30 = vld [vmem:[%s6400_s22 + $0x36c] sm:$0xf0] }
 0x33b   : > { %3374 = vmatpush.bf16.msrb.mxu2 %v5207_v41  ;;  %3350 = vmatmul.bf16.vlgmr.msrb.gmra.mxu0 %v6543_v57  ;;  %v4504_v37 = vld [vmem:[%s6400_s22 + $0xe8] sm:$0xf0]  ;;  %v5789_v14 = vld [vmem:[%s6400_s22 + $0x6ec] sm:$0xf0] }
 0x33c   : > { %3394 = vmatpush.bf16.msra.mxu0 %v4891_v34  ;;  %3363 = vmatmul.bf16.vlgmr.msrb.gmra.mxu1 %v6547_v61  ;;  %v4984_v34 = vld [vmem:[%s6400_s22 + $0x4a8] sm:$0xf0] }
 0x33d   : > { %3407 = vmatpush.bf16.msra.mxu1 %v5147_v36  ;;  %v5592_v36 = vld [vmem:[%s6400_s22 + $0xcc] sm:$0xf]  ;;  %v4987_v41 = vor.u32 %v5712_v33, %v4984_v34  ;;  %v5086_v33 = vld [vmem:[%s6400_s22 + $0x550] sm:$0xf] }
 0x33e   : > { %3336 = vmatpush.bf16.msra.mxu3 %v4407_v52  ;;  %v5784_v39 = vld [vmem:[%s6400_s22 + $0x6cc] sm:$0xf]  ;;  %v4507_v44 = vor.u32 %v5592_v36, %v4504_v37  ;;  %v5741_v34 = vld [vmem:[%s6400_s22 + $0x56c] sm:$0xf0] }
 0x33f   : > { %3375 = vmatpush.bf16.msrb.mxu2 %v5175_v55  ;;  %v5272_v40 = vld [vmem:[%s6400_s22 + $0x6e8] sm:$0xf0]  ;;  %v4606_v36 = vld [vmem:[%s6400_s22 + $0x190] sm:$0xf] }
 0x340   : > { %3395 = vmatpush.bf16.msra.mxu0 %v4859_v48  ;;  %v5640_v42 = vld [vmem:[%s6400_s22 + $0x24c] sm:$0xf]  ;;  %v5275_v47 = vor.u32 %v5784_v39, %v5272_v40  ;;  %v5621_v37 = vld [vmem:[%s6400_s22 + $0x1ac] sm:$0xf0] }
 0x341   : > { %3408 = vmatpush.bf16.msra.mxu1 %v5115_v51  ;;  %3337 = vmatmul.bf16.vlgmr.msra.gmra.mxu3 %v6561_v19  ;;  %v4696_v43 = vld [vmem:[%s6400_s22 + $0x268] sm:$0xf0]  ;;  %v5374_v39 = vld [vmem:[%s6400_s22 + $0x790] sm:$0xf] }
 0x342   : > { %3381 = vmatpush.bf16.msrb.mxu3 %v4635_v56  ;;  %3376 = vmatmul.bf16.vlgmr.msrb.gmra.mxu2 %v6565_v23  ;;  %v5704_v45 = vld [vmem:[%s6400_s22 + $0x44c] sm:$0xf]  ;;  %v4699_v50 = vor.u32 %v5640_v42, %v4696_v43  ;;  %v5813_v40 = vld [vmem:[%s6400_s22 + $0x7ac] sm:$0xf0] }
 0x343   : > { %3420 = vmatpush.bf16.msra.mxu2 %v5403_v60  ;;  %v4952_v46 = vld [vmem:[%s6400_s22 + $0x468] sm:$0xf0]  ;;  %v4894_v60 = vld [vmem:[%s6400_s22 + $0x3d0] sm:$0xf] }
 0x344   : > { %3396 = vmatpush.bf16.msra.mxu0 %v4827_v0  ;;  %v5584_v48 = vld [vmem:[%s6400_s22 + $0x8c] sm:$0xf]  ;;  %v4955_v54 = vor.u32 %v5704_v45, %v4952_v46  ;;  %v4895_v8 = vor.u32 %v5693_v62, %v4894_v60  ;;  %v4798_v42 = vld [vmem:[%s6400_s22 + $0x310] sm:$0xf] }
 0x345   : > { %3409 = vmatpush.bf16.msra.mxu1 %v5083_v3  ;;  %v4472_v49 = vld [vmem:[%s6400_s22 + $0xa8] sm:$0xf0]  ;;  %v5669_v43 = vld [vmem:[%s6400_s22 + $0x32c] sm:$0xf0] }
 0x346   : > { %3382 = vmatpush.bf16.msrb.mxu3 %v4603_v6  ;;  %v5776_v51 = vld [vmem:[%s6400_s22 + $0x68c] sm:$0xf]  ;;  %v4475_v59 = vor.u32 %v5584_v48, %v4472_v49  ;;  %v5054_v45 = vld [vmem:[%s6400_s22 + $0x510] sm:$0xf] }
 0x347   : > { %3421 = vmatpush.bf16.msra.mxu2 %v5371_v9  ;;  %v5240_v52 = vld [vmem:[%s6400_s22 + $0x6a8] sm:$0xf0]  ;;  %v4862_v9 = vld [vmem:[%s6400_s22 + $0x390] sm:$0xf] }
 0x348   : > { %3397 = vmatpush.bf16.msra.mxu0 %v4795_v12  ;;  %v5632_v53 = vld [vmem:[%s6400_s22 + $0x20c] sm:$0xf]  ;;  %v5243_v0 = vor.u32 %v5776_v51, %v5240_v52  ;;  %v5685_v12 = vld [vmem:[%s6400_s22 + $0x3ac] sm:$0xf0] }
 0x349   : > { %3410 = vmatpush.bf16.msra.mxu1 %v5051_v15  ;;  %v4664_v55 = vld [vmem:[%s6400_s22 + $0x228] sm:$0xf0]  ;;  %v4863_v24 = vor.u32 %v5685_v12, %v4862_v9  ;;  %v5733_v46 = vld [vmem:[%s6400_s22 + $0x52c] sm:$0xf0] }
 0x34a   : > { %3383 = vmatpush.bf16.msrb.mxu3 %v4571_v17  ;;  %v5696_v56 = vld [vmem:[%s6400_s22 + $0x40c] sm:$0xf]  ;;  %v4667_v4 = vor.u32 %v5632_v53, %v4664_v55  ;;  %v4574_v48 = vld [vmem:[%s6400_s22 + $0x150] sm:$0xf]  ;;  %v5055_v53 = vor.u32 %v5733_v46, %v5054_v45 }
 0x34b   : > { %3422 = vmatpush.bf16.msra.mxu2 %v5339_v22  ;;  %v4920_v58 = vld [vmem:[%s6400_s22 + $0x428] sm:$0xf0]  ;;  %v5629_v22 = vld [vmem:[%s6400_s22 + $0x1ec] sm:$0xf0] }
 0x34c   : > { %3398 = vmatpush.bf16.msra.mxu0 %v4763_v26  ;;  %v5576_v2 = vld [vmem:[%s6400_s22 + $0x4c] sm:$0xf]  ;;  %v4923_v7 = vor.u32 %v5696_v56, %v4920_v58  ;;  %v5821_v26 = vld [vmem:[%s6400_s22 + $0x7ec] sm:$0xf0] }
 0x34d   : > { %3411 = vmatpush.bf16.msra.mxu1 %v5019_v29  ;;  %v4440_v3 = vld [vmem:[%s6400_s22 + $0x68] sm:$0xf0]  ;;  %v4830_v29 = vld [vmem:[%s6400_s22 + $0x350] sm:$0xf] }
 0x34e   : > { %3384 = vmatpush.bf16.msrb.mxu3 %v4539_v32  ;;  %v5768_v5 = vld [vmem:[%s6400_s22 + $0x64c] sm:$0xf]  ;;  %v4443_v11 = vor.u32 %v5576_v2, %v4440_v3  ;;  %v4639_v32 = vor.u32 %v5629_v22, %v4638_v21  ;;  %v5613_v49 = vld [vmem:[%s6400_s22 + $0x16c] sm:$0xf0]  ;;  %v5279_v22 = vor.u32 %v5789_v14, %v5278_v13  ;;  %v5809_v13 = vld [vmem:[%s6400_s22 + $0x794] sm:$0xf] }
 0x34f   : > { %3423 = vmatpush.bf16.msra.mxu2 %v5307_v35  ;;  %v5208_v6 = vld [vmem:[%s6400_s22 + $0x668] sm:$0xf0]  ;;  %v5407_v35 = vor.u32 %v5821_v26, %v5406_v25  ;;  %v5342_v51 = vld [vmem:[%s6400_s22 + $0x750] sm:$0xf]  ;;  %v4575_v56 = vor.u32 %v5613_v49, %v4574_v48  ;;  %v5376_v14 = vld [vmem:[%s6400_s22 + $0x7b0] sm:$0xf0] }
 0x350   : > { %3399 = vmatpush.bf16.msra.mxu0 %v4731_v38  ;;  %v5211_v15 = vor.u32 %v5768_v5, %v5208_v6  ;;  %v5568_v16 = vld [vmem:[%s6400_s22 + $0xc] sm:$0xf]  ;;  %v4831_v38 = vor.u32 %v5677_v30, %v4830_v29  ;;  %v5805_v52 = vld [vmem:[%s6400_s22 + $0x76c] sm:$0xf0] }
 0x351   : > { %3412 = vmatpush.bf16.msra.mxu1 %v4987_v41  ;;  %v4408_v18 = vld [vmem:[%s6400_s22 + $0x28] sm:$0xf0]  ;;  %v5087_v41 = vor.u32 %v5741_v34, %v5086_v33  ;;  %v5661_v55 = vld [vmem:[%s6400_s22 + $0x2ec] sm:$0xf0]  ;;  %v5343_v60 = vor.u32 %v5805_v52, %v5342_v51  ;;  %v5745_v51 = vld [vmem:[%s6400_s22 + $0x594] sm:$0xf] }
 0x352   : > { %3385 = vmatpush.bf16.msrb.mxu3 %v4507_v44  ;;  %v5760_v17 = vld [vmem:[%s6400_s22 + $0x60c] sm:$0xf]  ;;  %v4411_v28 = vor.u32 %v5568_v16, %v4408_v18  ;;  %v4607_v44 = vor.u32 %v5621_v37, %v4606_v36  ;;  %v5022_v58 = vld [vmem:[%s6400_s22 + $0x4d0] sm:$0xf]  ;;  %v4896_v36 = vld [vmem:[%s6400_s22 + $0x3f0] sm:$0xf0] }
 0x353   : > { %3424 = vmatpush.bf16.msra.mxu2 %v5275_v47  ;;  %v5176_v20 = vld [vmem:[%s6400_s22 + $0x628] sm:$0xf0]  ;;  %v5375_v47 = vor.u32 %v5813_v40, %v5374_v39  ;;  %v4542_v62 = vld [vmem:[%s6400_s22 + $0x110] sm:$0xf]  ;;  %v5753_v37 = vld [vmem:[%s6400_s22 + $0x5d4] sm:$0xf] }
 0x354   : > { %3400 = vmatpush.bf16.msra.mxu0 %v4699_v50  ;;  %v5179_v31 = vor.u32 %v5760_v17, %v5176_v20  ;;  %v4799_v50 = vor.u32 %v5669_v43, %v4798_v42  ;;  %v5797_v2 = vld [vmem:[%s6400_s22 + $0x72c] sm:$0xf0]  ;;  %v4543_v6 = vor.u32 %v5605_v63, %v4542_v62  ;;  %v5152_v39 = vld [vmem:[%s6400_s22 + $0x5f0] sm:$0xf0] }
 0x355   : > { %3413 = vmatpush.bf16.msra.mxu1 %v4955_v54  ;;  %v4766_v54 = vld [vmem:[%s6400_s22 + $0x2d0] sm:$0xf]  ;;  %v5311_v9 = vor.u32 %v5797_v2, %v5310_v1  ;;  %v5155_v48 = vor.u32 %v5753_v37, %v5152_v39  ;;  %v5120_v52 = vld [vmem:[%s6400_s22 + $0x5b0] sm:$0xf0] }
 0x356   : > { %3386 = vmatpush.bf16.msrb.mxu3 %v4475_v59  ;;  %v5725_v59 = vld [vmem:[%s6400_s22 + $0x4ec] sm:$0xf0]  ;;  %v5817_v63 = vld [vmem:[%s6400_s22 + $0x7d4] sm:$0xf]  ;;  %v5123_v1 = vor.u32 %v5745_v51, %v5120_v52 }
 0x357   : > { %3425 = vmatpush.bf16.msra.mxu2 %v5243_v0  ;;  %v4767_v0 = vor.u32 %v5661_v55, %v4766_v54  ;;  %v5023_v3 = vor.u32 %v5725_v59, %v5022_v58  ;;  %v5653_v5 = vld [vmem:[%s6400_s22 + $0x2ac] sm:$0xf0]  ;;  %v5625_v59 = vld [vmem:[%s6400_s22 + $0x1d4] sm:$0xf] }
 0x358   : > { %3401 = vmatpush.bf16.msra.mxu0 %v4667_v4  ;;  %v4734_v4 = vld [vmem:[%s6400_s22 + $0x290] sm:$0xf]  ;;  %v4544_v37 = vld [vmem:[%s6400_s22 + $0x130] sm:$0xf0] }
 0x359   : > { %3414 = vmatpush.bf16.msra.mxu1 %v4923_v7  ;;  %v4990_v7 = vld [vmem:[%s6400_s22 + $0x490] sm:$0xf]  ;;  %v4735_v12 = vor.u32 %v5653_v5, %v4734_v4  ;;  %v4832_v4 = vld [vmem:[%s6400_s22 + $0x370] sm:$0xf0] }
 0x35a   : > { %3387 = vmatpush.bf16.msrb.mxu3 %v4443_v11  ;;  %v5597_v11 = vld [vmem:[%s6400_s22 + $0xec] sm:$0xf0]  ;;  %v5793_v39 = vld [vmem:[%s6400_s22 + $0x714] sm:$0xf] }
 0x35b   : > { %3426 = vmatpush.bf16.msra.mxu2 %v5211_v15  ;;  %3402 = vmatmul.bf16.vlgmr.msra.gmra.mxu0 %v6543_v57  ;;  %v4702_v16 = vld [vmem:[%s6400_s22 + $0x250] sm:$0xf]  ;;  %v5785_v51 = vld [vmem:[%s6400_s22 + $0x6d4] sm:$0xf] }
 0x35c   : > { %3446 = vmatpush.bf16.msrb.mxu0 %v4895_v8  ;;  %3415 = vmatmul.bf16.vlgmr.msra.gmra.mxu1 %v6547_v61  ;;  %v5717_v8 = vld [vmem:[%s6400_s22 + $0x4ac] sm:$0xf0]  ;;  %v5280_v52 = vld [vmem:[%s6400_s22 + $0x6f0] sm:$0xf0] }
 0x35d   : > { %3459 = vmatpush.bf16.msrb.mxu1 %v5151_v10  ;;  %v4510_v10 = vld [vmem:[%s6400_s22 + $0xd0] sm:$0xf]  ;;  %v4991_v15 = vor.u32 %v5717_v8, %v4990_v7  ;;  %v5737_v7 = vld [vmem:[%s6400_s22 + $0x554] sm:$0xf] }
 0x35e   : > { %3388 = vmatpush.bf16.msrb.mxu3 %v4411_v28  ;;  %v5645_v18 = vld [vmem:[%s6400_s22 + $0x26c] sm:$0xf0]  ;;  %v4511_v17 = vor.u32 %v5597_v11, %v4510_v10  ;;  %v5088_v8 = vld [vmem:[%s6400_s22 + $0x570] sm:$0xf0] }
 0x35f   : > { %3427 = vmatpush.bf16.msra.mxu2 %v5179_v31  ;;  %v4958_v20 = vld [vmem:[%s6400_s22 + $0x450] sm:$0xf]  ;;  %v4703_v26 = vor.u32 %v5645_v18, %v4702_v16  ;;  %v5617_v10 = vld [vmem:[%s6400_s22 + $0x194] sm:$0xf] }
 0x360   : > { %3447 = vmatpush.bf16.msrb.mxu0 %v4863_v24  ;;  %v5709_v21 = vld [vmem:[%s6400_s22 + $0x46c] sm:$0xf0]  ;;  %v4608_v11 = vld [vmem:[%s6400_s22 + $0x1b0] sm:$0xf0] }
 0x361   : > { %3460 = vmatpush.bf16.msrb.mxu1 %v5119_v27  ;;  %3389 = vmatmul.bf16.vlgmr.msrb.gmra.mxu3 %v6561_v19  ;;  %v4478_v24 = vld [vmem:[%s6400_s22 + $0x90] sm:$0xf]  ;;  %v4959_v30 = vor.u32 %v5709_v21, %v4958_v20  ;;  %v5665_v16 = vld [vmem:[%s6400_s22 + $0x314] sm:$0xf] }
 0x362   : > { %3433 = vmatpush.bf16.msra.mxu3 %v4639_v32  ;;  %3428 = vmatmul.bf16.vlgmr.msra.gmra.mxu2 %v6565_v23  ;;  %v5589_v25 = vld [vmem:[%s6400_s22 + $0xac] sm:$0xf0]  ;;  %v4800_v18 = vld [vmem:[%s6400_s22 + $0x330] sm:$0xf0] }
 0x363   : > { %3472 = vmatpush.bf16.msrb.mxu2 %v5407_v35  ;;  %v5246_v27 = vld [vmem:[%s6400_s22 + $0x690] sm:$0xf]  ;;  %v4479_v34 = vor.u32 %v5589_v25, %v4478_v24  ;;  %v5689_v35 = vld [vmem:[%s6400_s22 + $0x3d4] sm:$0xf] }
 0x364   : > { %3448 = vmatpush.bf16.msrb.mxu0 %v4831_v38  ;;  %v5781_v28 = vld [vmem:[%s6400_s22 + $0x6ac] sm:$0xf0]  ;;  %v4899_v46 = vor.u32 %v5689_v35, %v4896_v36  ;;  %v5729_v20 = vld [vmem:[%s6400_s22 + $0x514] sm:$0xf] }
 0x365   : > { %3461 = vmatpush.bf16.msrb.mxu1 %v5087_v41  ;;  %v4670_v29 = vld [vmem:[%s6400_s22 + $0x210] sm:$0xf]  ;;  %v5247_v38 = vor.u32 %v5781_v28, %v5246_v27  ;;  %v5056_v21 = vld [vmem:[%s6400_s22 + $0x530] sm:$0xf0] }
 0x366   : > { %3434 = vmatpush.bf16.msra.mxu3 %v4607_v44  ;;  %v5637_v31 = vld [vmem:[%s6400_s22 + $0x22c] sm:$0xf0]  ;;  %v5609_v24 = vld [vmem:[%s6400_s22 + $0x154] sm:$0xf] }
 0x367   : > { %3473 = vmatpush.bf16.msrb.mxu2 %v5375_v47  ;;  %v4926_v32 = vld [vmem:[%s6400_s22 + $0x410] sm:$0xf]  ;;  %v4671_v42 = vor.u32 %v5637_v31, %v4670_v29  ;;  %v5681_v47 = vld [vmem:[%s6400_s22 + $0x394] sm:$0xf]  ;;  %v5059_v29 = vor.u32 %v5729_v20, %v5056_v21 }
 0x368   : > { %3449 = vmatpush.bf16.msrb.mxu0 %v4799_v50  ;;  %v5701_v33 = vld [vmem:[%s6400_s22 + $0x42c] sm:$0xf0]  ;;  %v4864_v50 = vld [vmem:[%s6400_s22 + $0x3b0] sm:$0xf0] }
 0x369   : > { %3462 = vmatpush.bf16.msrb.mxu1 %v5055_v53  ;;  %v4446_v40 = vld [vmem:[%s6400_s22 + $0x50] sm:$0xf]  ;;  %v4927_v45 = vor.u32 %v5701_v33, %v4926_v32  ;;  %v4867_v62 = vor.u32 %v5681_v47, %v4864_v50  ;;  %v4576_v25 = vld [vmem:[%s6400_s22 + $0x170] sm:$0xf0] }
 0x36a   : > { %3435 = vmatpush.bf16.msra.mxu3 %v4575_v56  ;;  %v5581_v41 = vld [vmem:[%s6400_s22 + $0x6c] sm:$0xf0]  ;;  %v5801_v27 = vld [vmem:[%s6400_s22 + $0x754] sm:$0xf]  ;;  %v4579_v32 = vor.u32 %v5609_v24, %v4576_v25 }
 0x36b   : > { %3474 = vmatpush.bf16.msrb.mxu2 %v5343_v60  ;;  %v5214_v43 = vld [vmem:[%s6400_s22 + $0x650] sm:$0xf]  ;;  %v4447_v49 = vor.u32 %v5581_v41, %v4446_v40  ;;  %v4640_v60 = vld [vmem:[%s6400_s22 + $0x1f0] sm:$0xf0] }
 0x36c   : > { %3450 = vmatpush.bf16.msrb.mxu0 %v4767_v0  ;;  %v5773_v44 = vld [vmem:[%s6400_s22 + $0x66c] sm:$0xf0]  ;;  %v5408_v0 = vld [vmem:[%s6400_s22 + $0x7f0] sm:$0xf0] }
 0x36d   : > { %3463 = vmatpush.bf16.msrb.mxu1 %v5023_v3  ;;  %v5215_v53 = vor.u32 %v5773_v44, %v5214_v43  ;;  %v4414_v54 = vld [vmem:[%s6400_s22 + $0x10] sm:$0xf]  ;;  %v5673_v3 = vld [vmem:[%s6400_s22 + $0x354] sm:$0xf] }
 0x36e   : > { %3436 = vmatpush.bf16.msra.mxu3 %v4543_v6  ;;  %v5573_v55 = vld [vmem:[%s6400_s22 + $0x2c] sm:$0xf0]  ;;  %v4643_v6 = vor.u32 %v5625_v59, %v4640_v60  ;;  %v5344_v28 = vld [vmem:[%s6400_s22 + $0x770] sm:$0xf0]  ;;  %v5283_v60 = vor.u32 %v5785_v51, %v5280_v52  ;;  %v5382_v51 = vld [vmem:[%s6400_s22 + $0x798] sm:$0xf] }
 0x36f   : > { %3475 = vmatpush.bf16.msrb.mxu2 %v5311_v9  ;;  %v5182_v56 = vld [vmem:[%s6400_s22 + $0x610] sm:$0xf]  ;;  %v4415_v2 = vor.u32 %v5573_v55, %v4414_v54  ;;  %v5411_v9 = vor.u32 %v5817_v63, %v5408_v0  ;;  %v4768_v31 = vld [vmem:[%s6400_s22 + $0x2f0] sm:$0xf0]  ;;  %v5347_v35 = vor.u32 %v5801_v27, %v5344_v28  ;;  %v5126_v27 = vld [vmem:[%s6400_s22 + $0x598] sm:$0xf] }
 0x370   : > { %3451 = vmatpush.bf16.msrb.mxu0 %v4735_v12  ;;  %v5765_v58 = vld [vmem:[%s6400_s22 + $0x62c] sm:$0xf0]  ;;  %v4835_v12 = vor.u32 %v5673_v3, %v4832_v4  ;;  %v5721_v33 = vld [vmem:[%s6400_s22 + $0x4d4] sm:$0xf]  ;;  %v5750_v28 = vld [vmem:[%s6400_s22 + $0x5b4] sm:$0xf0] }
 0x371   : > { %3464 = vmatpush.bf16.msrb.mxu1 %v4991_v15  ;;  %v5183_v5 = vor.u32 %v5765_v58, %v5182_v56  ;;  %v5091_v15 = vor.u32 %v5737_v7, %v5088_v8  ;;  %v5601_v36 = vld [vmem:[%s6400_s22 + $0x114] sm:$0xf]  ;;  %v5814_v52 = vld [vmem:[%s6400_s22 + $0x7b4] sm:$0xf0] }
 0x372   : > { %3437 = vmatpush.bf16.msra.mxu3 %v4511_v17  ;;  %v4611_v17 = vor.u32 %v5617_v10, %v4608_v11  ;;  %v5312_v40 = vld [vmem:[%s6400_s22 + $0x730] sm:$0xf0]  ;;  %v4547_v44 = vor.u32 %v5601_v36, %v4544_v37  ;;  %v5694_v10 = vld [vmem:[%s6400_s22 + $0x3f4] sm:$0xf0] }
 0x373   : > { %3476 = vmatpush.bf16.msrb.mxu2 %v5279_v22  ;;  %v5379_v22 = vor.u32 %v5809_v13, %v5376_v14  ;;  %v4736_v43 = vld [vmem:[%s6400_s22 + $0x2b0] sm:$0xf0]  ;;  %v5315_v47 = vor.u32 %v5793_v39, %v5312_v40  ;;  %v5158_v11 = vld [vmem:[%s6400_s22 + $0x5d8] sm:$0xf]  ;;  %v5127_v39 = vor.u32 %v5750_v28, %v5126_v27 }
 0x374   : > { %3452 = vmatpush.bf16.msrb.mxu0 %v4703_v26  ;;  %v4803_v26 = vor.u32 %v5665_v16, %v4800_v18  ;;  %v5641_v54 = vld [vmem:[%s6400_s22 + $0x254] sm:$0xf]  ;;  %v5758_v13 = vld [vmem:[%s6400_s22 + $0x5f4] sm:$0xf0] }
 0x375   : > { %3465 = vmatpush.bf16.msrb.mxu1 %v4959_v30  ;;  %v5657_v30 = vld [vmem:[%s6400_s22 + $0x2d4] sm:$0xf]  ;;  %v5159_v24 = vor.u32 %v5758_v13, %v5158_v11  ;;  %v5414_v37 = vld [vmem:[%s6400_s22 + $0x7d8] sm:$0xf] }
 0x376   : > { %3438 = vmatpush.bf16.msra.mxu3 %v4479_v34  ;;  %v5024_v34 = vld [vmem:[%s6400_s22 + $0x4f0] sm:$0xf0]  ;;  %v5606_v13 = vld [vmem:[%s6400_s22 + $0x134] sm:$0xf0] }
 0x377   : > { %3477 = vmatpush.bf16.msrb.mxu2 %v5247_v38  ;;  %v4771_v38 = vor.u32 %v5657_v30, %v4768_v31  ;;  %v5027_v41 = vor.u32 %v5721_v33, %v5024_v34  ;;  %v4704_v55 = vld [vmem:[%s6400_s22 + $0x270] sm:$0xf0]  ;;  %v4646_v34 = vld [vmem:[%s6400_s22 + $0x1d8] sm:$0xf] }
 0x378   : > { %3453 = vmatpush.bf16.msrb.mxu0 %v4671_v42  ;;  %v5649_v42 = vld [vmem:[%s6400_s22 + $0x294] sm:$0xf]  ;;  %v4707_v0 = vor.u32 %v5641_v54, %v4704_v55  ;;  %v4806_v54 = vld [vmem:[%s6400_s22 + $0x318] sm:$0xf] }
 0x379   : > { %3466 = vmatpush.bf16.msrb.mxu1 %v4927_v45  ;;  %v5713_v45 = vld [vmem:[%s6400_s22 + $0x494] sm:$0xf]  ;;  %v4739_v50 = vor.u32 %v5649_v42, %v4736_v43  ;;  %v5678_v42 = vld [vmem:[%s6400_s22 + $0x374] sm:$0xf0] }
 0x37a   : > { %3439 = vmatpush.bf16.msra.mxu3 %v4447_v49  ;;  %v4512_v49 = vld [vmem:[%s6400_s22 + $0xf0] sm:$0xf0]  ;;  %v5670_v55 = vld [vmem:[%s6400_s22 + $0x334] sm:$0xf0] }
 0x37b   : > { %3478 = vmatpush.bf16.msrb.mxu2 %v5215_v53  ;;  %3454 = vmatmul.bf16.vlgmr.msrb.gmra.mxu0 %v6543_v57  ;;  %v5705_v58 = vld [vmem:[%s6400_s22 + $0x454] sm:$0xf]  ;;  %v4518_v27 = vld [vmem:[%s6400_s22 + $0xd8] sm:$0xf] }
 0x37c   : > { %3498 = vmatpush.bf16.msra.mxu0 %v4899_v46  ;;  %3467 = vmatmul.bf16.vlgmr.msrb.gmra.mxu1 %v6547_v61  ;;  %v4992_v46 = vld [vmem:[%s6400_s22 + $0x4b0] sm:$0xf0]  ;;  %v5598_v28 = vld [vmem:[%s6400_s22 + $0xf4] sm:$0xf0] }
 0x37d   : > { %3511 = vmatpush.bf16.msra.mxu1 %v5155_v48  ;;  %v5593_v48 = vld [vmem:[%s6400_s22 + $0xd4] sm:$0xf]  ;;  %v4995_v53 = vor.u32 %v5713_v45, %v4992_v46  ;;  %v5094_v45 = vld [vmem:[%s6400_s22 + $0x558] sm:$0xf] }
 0x37e   : > { %3440 = vmatpush.bf16.msra.mxu3 %v4415_v2  ;;  %v4515_v56 = vor.u32 %v5593_v48, %v4512_v49  ;;  %v4960_v59 = vld [vmem:[%s6400_s22 + $0x470] sm:$0xf0]  ;;  %v5742_v46 = vld [vmem:[%s6400_s22 + $0x574] sm:$0xf0] }
 0x37f   : > { %3479 = vmatpush.bf16.msrb.mxu2 %v5183_v5  ;;  %v4480_v63 = vld [vmem:[%s6400_s22 + $0xb0] sm:$0xf0]  ;;  %v4963_v4 = vor.u32 %v5705_v58, %v4960_v59  ;;  %v4614_v48 = vld [vmem:[%s6400_s22 + $0x198] sm:$0xf] }
 0x380   : > { %3499 = vmatpush.bf16.msra.mxu0 %v4867_v62  ;;  %v5585_v62 = vld [vmem:[%s6400_s22 + $0x94] sm:$0xf]  ;;  %v5622_v49 = vld [vmem:[%s6400_s22 + $0x1b4] sm:$0xf0] }
 0x381   : > { %3512 = vmatpush.bf16.msra.mxu1 %v5123_v1  ;;  %3441 = vmatmul.bf16.vlgmr.msra.gmra.mxu3 %v6561_v19  ;;  %v5777_v1 = vld [vmem:[%s6400_s22 + $0x694] sm:$0xf]  ;;  %v4483_v8 = vor.u32 %v5585_v62, %v4480_v63  ;;  %v5062_v58 = vld [vmem:[%s6400_s22 + $0x518] sm:$0xf] }
 0x382   : > { %3485 = vmatpush.bf16.msrb.mxu3 %v4643_v6  ;;  %3480 = vmatmul.bf16.vlgmr.msrb.gmra.mxu2 %v6565_v23  ;;  %v5248_v2 = vld [vmem:[%s6400_s22 + $0x6b0] sm:$0xf0]  ;;  %v5734_v59 = vld [vmem:[%s6400_s22 + $0x534] sm:$0xf0] }
 0x383   : > { %3524 = vmatpush.bf16.msra.mxu2 %v5411_v9  ;;  %v5633_v3 = vld [vmem:[%s6400_s22 + $0x214] sm:$0xf]  ;;  %v4902_v9 = vld [vmem:[%s6400_s22 + $0x3d8] sm:$0xf] }
 0x384   : > { %3500 = vmatpush.bf16.msra.mxu0 %v4835_v12  ;;  %v4672_v5 = vld [vmem:[%s6400_s22 + $0x230] sm:$0xf0]  ;;  %v5251_v12 = vor.u32 %v5777_v1, %v5248_v2  ;;  %v4903_v21 = vor.u32 %v5694_v10, %v4902_v9  ;;  %v4582_v62 = vld [vmem:[%s6400_s22 + $0x158] sm:$0xf]  ;;  %v4807_v1 = vor.u32 %v5670_v55, %v4806_v54 }
 0x385   : > { %3513 = vmatpush.bf16.msra.mxu1 %v5091_v15  ;;  %v5697_v6 = vld [vmem:[%s6400_s22 + $0x414] sm:$0xf]  ;;  %v4675_v16 = vor.u32 %v5633_v3, %v4672_v5  ;;  %v5614_v63 = vld [vmem:[%s6400_s22 + $0x174] sm:$0xf0]  ;;  %v5063_v5 = vor.u32 %v5734_v59, %v5062_v58  ;;  %v4904_v58 = vld [vmem:[%s6400_s22 + $0x3f8] sm:$0xf0] }
 0x386   : > { %3486 = vmatpush.bf16.msrb.mxu3 %v4611_v17  ;;  %v4928_v7 = vld [vmem:[%s6400_s22 + $0x430] sm:$0xf0]  ;;  %v5350_v2 = vld [vmem:[%s6400_s22 + $0x758] sm:$0xf]  ;;  %v5754_v59 = vld [vmem:[%s6400_s22 + $0x5dc] sm:$0xf] }
 0x387   : > { %3525 = vmatpush.bf16.msra.mxu2 %v5379_v22  ;;  %v5577_v14 = vld [vmem:[%s6400_s22 + $0x54] sm:$0xf]  ;;  %v4931_v20 = vor.u32 %v5697_v6, %v4928_v7  ;;  %v4870_v22 = vld [vmem:[%s6400_s22 + $0x398] sm:$0xf] }
 0x388   : > { %3501 = vmatpush.bf16.msra.mxu0 %v4803_v26  ;;  %v4448_v15 = vld [vmem:[%s6400_s22 + $0x70] sm:$0xf0]  ;;  %v5686_v26 = vld [vmem:[%s6400_s22 + $0x3b4] sm:$0xf0] }
 0x389   : > { %3514 = vmatpush.bf16.msra.mxu1 %v5059_v29  ;;  %v5769_v18 = vld [vmem:[%s6400_s22 + $0x654] sm:$0xf]  ;;  %v4451_v25 = vor.u32 %v5577_v14, %v4448_v15  ;;  %v4871_v36 = vor.u32 %v5686_v26, %v4870_v22  ;;  %v5806_v3 = vld [vmem:[%s6400_s22 + $0x774] sm:$0xf0] }
 0x38a   : > { %3487 = vmatpush.bf16.msrb.mxu3 %v4579_v32  ;;  %v5216_v17 = vld [vmem:[%s6400_s22 + $0x670] sm:$0xf0]  ;;  %v4774_v6 = vld [vmem:[%s6400_s22 + $0x2d8] sm:$0xf]  ;;  %v5351_v11 = vor.u32 %v5806_v3, %v5350_v2 }
 0x38b   : > { %3526 = vmatpush.bf16.msra.mxu2 %v5347_v35  ;;  %v5219_v29 = vor.u32 %v5769_v18, %v5216_v17  ;;  %v5569_v30 = vld [vmem:[%s6400_s22 + $0x14] sm:$0xf]  ;;  %v5630_v35 = vld [vmem:[%s6400_s22 + $0x1f4] sm:$0xf0] }
 0x38c   : > { %3502 = vmatpush.bf16.msra.mxu0 %v4771_v38  ;;  %v4416_v31 = vld [vmem:[%s6400_s22 + $0x30] sm:$0xf0]  ;;  %v5822_v38 = vld [vmem:[%s6400_s22 + $0x7f4] sm:$0xf0] }
 0x38d   : > { %3515 = vmatpush.bf16.msra.mxu1 %v5027_v41  ;;  %v5761_v32 = vld [vmem:[%s6400_s22 + $0x614] sm:$0xf]  ;;  %v4419_v40 = vor.u32 %v5569_v30, %v4416_v31  ;;  %v4838_v41 = vld [vmem:[%s6400_s22 + $0x358] sm:$0xf] }
 0x38e   : > { %3488 = vmatpush.bf16.msrb.mxu3 %v4547_v44  ;;  %v5184_v33 = vld [vmem:[%s6400_s22 + $0x630] sm:$0xf0]  ;;  %v4647_v44 = vor.u32 %v5630_v35, %v4646_v34  ;;  %v5662_v7 = vld [vmem:[%s6400_s22 + $0x2f4] sm:$0xf0] }
 0x38f   : > { %3527 = vmatpush.bf16.msra.mxu2 %v5315_v47  ;;  %v5187_v43 = vor.u32 %v5761_v32, %v5184_v33  ;;  %v5415_v47 = vor.u32 %v5822_v38, %v5414_v37  ;;  %v5030_v9 = vld [vmem:[%s6400_s22 + $0x4d8] sm:$0xf]  ;;  %v4775_v14 = vor.u32 %v5662_v7, %v4774_v6  ;;  %v4519_v38 = vor.u32 %v5598_v28, %v4518_v27  ;;  %v4648_v27 = vld [vmem:[%s6400_s22 + $0x1f8] sm:$0xf0] }
 0x390   : > { %3503 = vmatpush.bf16.msra.mxu0 %v4739_v50  ;;  %v4839_v50 = vor.u32 %v5678_v42, %v4838_v41  ;;  %v5726_v10 = vld [vmem:[%s6400_s22 + $0x4f4] sm:$0xf0] }
 0x391   : > { %3516 = vmatpush.bf16.msra.mxu1 %v4995_v53  ;;  %v5095_v53 = vor.u32 %v5742_v46, %v5094_v45  ;;  %v5318_v15 = vld [vmem:[%s6400_s22 + $0x718] sm:$0xf]  ;;  %v5031_v18 = vor.u32 %v5726_v10, %v5030_v9 }
 0x392   : > { %3489 = vmatpush.bf16.msrb.mxu3 %v4515_v56  ;;  %v4615_v56 = vor.u32 %v5622_v49, %v4614_v48  ;;  %v4742_v17 = vld [vmem:[%s6400_s22 + $0x298] sm:$0xf] }
 0x393   : > { %3528 = vmatpush.bf16.msra.mxu2 %v5283_v60  ;;  %v5383_v60 = vor.u32 %v5814_v52, %v5382_v51  ;;  %v4998_v22 = vld [vmem:[%s6400_s22 + $0x498] sm:$0xf] }
 0x394   : > { %3504 = vmatpush.bf16.msra.mxu0 %v4707_v0  ;;  %v5286_v31 = vld [vmem:[%s6400_s22 + $0x6d8] sm:$0xf] }
 0x395   : > { %3517 = vmatpush.bf16.msra.mxu1 %v4963_v4  ;;  %v5790_v32 = vld [vmem:[%s6400_s22 + $0x6f4] sm:$0xf0] }
 0x396   : > { %3490 = vmatpush.bf16.msrb.mxu3 %v4483_v8  ;;  %v4583_v8 = vor.u32 %v5614_v63, %v4582_v62  ;;  %v5646_v37 = vld [vmem:[%s6400_s22 + $0x274] sm:$0xf0]  ;;  %v5287_v41 = vor.u32 %v5790_v32, %v5286_v31  ;;  %v5160_v63 = vld [vmem:[%s6400_s22 + $0x5f8] sm:$0xf0] }
 0x397   : > { %3529 = vmatpush.bf16.msra.mxu2 %v5251_v12  ;;  %v4550_v12 = vld [vmem:[%s6400_s22 + $0x118] sm:$0xf]  ;;  %v5416_v31 = vld [vmem:[%s6400_s22 + $0x7f8] sm:$0xf0] }
 0x398   : > { %3505 = vmatpush.bf16.msra.mxu0 %v4675_v16  ;;  %v6852_v0 = vpop.f32.mrf.mxu0  ;;  %v5798_v16 = vld [vmem:[%s6400_s22 + $0x734] sm:$0xf0] }
 0x399   : > { %3518 = vmatpush.bf16.msra.mxu1 %v4931_v20  ;;  %v6859_v4 = vpop.f32.mrf.mxu1  ;;  %v5654_v20 = vld [vmem:[%s6400_s22 + $0x2b4] sm:$0xf0]  ;;  %v5319_v26 = vor.u32 %v5798_v16, %v5318_v15  ;;  %v5746_v15 = vld [vmem:[%s6400_s22 + $0x59c] sm:$0xf] }
 0x39a   : > { %3491 = vmatpush.bf16.msrb.mxu3 %v4451_v25  ;;  %v6873_v25 = vld [vmem:[%s374_s12] sm:$0xff]  ;;  %v4743_v30 = vor.u32 %v5654_v20, %v4742_v17  ;;  %v4486_v42 = vld [vmem:[%s6400_s22 + $0x98] sm:$0xf]  ;;  %v5128_v16 = vld [vmem:[%s6400_s22 + $0x5b8] sm:$0xf0] }
 0x39b   : > { %3530 = vmatpush.bf16.msra.mxu2 %v5219_v29  ;;  %3506 = vmatmul.bf16.vlgmr.msra.gmra.mxu0 %v6543_v57  ;;  %v1929_v35 = vperm.slane %v6873_v25, 0  ;;  %v5254_v46 = vld [vmem:[%s6400_s22 + $0x698] sm:$0xf]  ;;  %v5131_v32 = vor.u32 %v5746_v15, %v5128_v16  ;;  %v5602_v15 = vld [vmem:[%s6400_s22 + $0x11c] sm:$0xf] }
 0x39c   : > { %3550 = vmatpush.bf16.msrb.mxu0 %v4903_v21  ;;  %3519 = vmatmul.bf16.vlgmr.msra.gmra.mxu1 %v6547_v61  ;;  %v4551_v21 = vor.u32 %v5606_v13, %v4550_v12  ;;  %v4678_v48 = vld [vmem:[%s6400_s22 + $0x218] sm:$0xf]  ;;  %v5163_v12 = vor.u32 %v5754_v59, %v5160_v63  ;;  %v5610_v59 = vld [vmem:[%s6400_s22 + $0x15c] sm:$0xf] }
 0x39d   : > { %3563 = vmatpush.bf16.msrb.mxu1 %v5159_v24  ;;  %v5718_v24 = vld [vmem:[%s6400_s22 + $0x4b4] sm:$0xf0]  ;;  %v4552_v16 = vld [vmem:[%s6400_s22 + $0x138] sm:$0xf0] }
 0x39e   : > { %3492 = vmatpush.bf16.msrb.mxu3 %v4419_v40  ;;  %v4999_v34 = vor.u32 %v5718_v24, %v4998_v22  ;;  %v5710_v40 = vld [vmem:[%s6400_s22 + $0x474] sm:$0xf0] }
 0x39f   : > { %3531 = vmatpush.bf16.msra.mxu2 %v5187_v43  ;;  %v5590_v43 = vld [vmem:[%s6400_s22 + $0xb4] sm:$0xf0] }
 0x3a0   : > { %3551 = vmatpush.bf16.msrb.mxu0 %v4871_v36  ;;  %v3249_v29 = vpop.f32.mrf.mxu0  ;;  %v4710_v36 = vld [vmem:[%s6400_s22 + $0x258] sm:$0xf]  ;;  %v4487_v55 = vor.u32 %v5590_v43, %v4486_v42  ;;  %v5618_v42 = vld [vmem:[%s6400_s22 + $0x19c] sm:$0xf] }
 0x3a1   : > { %3564 = vmatpush.bf16.msrb.mxu1 %v5127_v39  ;;  %3493 = vmatmul.bf16.vlgmr.msrb.gmra.mxu3 %v6561_v19  ;;  %v3262_v33 = vpop.f32.mrf.mxu1  ;;  %v4966_v39 = vld [vmem:[%s6400_s22 + $0x458] sm:$0xf]  ;;  %v4711_v45 = vor.u32 %v5646_v37, %v4710_v36  ;;  %v4616_v43 = vld [vmem:[%s6400_s22 + $0x1b8] sm:$0xf0] }
 0x3a2   : > { %3537 = vmatpush.bf16.msra.mxu3 %v4647_v44  ;;  %3532 = vmatmul.bf16.vlgmr.msra.gmra.mxu2 %v6565_v23  ;;  %v4967_v51 = vor.u32 %v5710_v40, %v4966_v39  ;;  %v5638_v52 = vld [vmem:[%s6400_s22 + $0x234] sm:$0xf0]  ;;  %v5096_v39 = vld [vmem:[%s6400_s22 + $0x578] sm:$0xf0] }
 0x3a3   : > { %3576 = vmatpush.bf16.msrb.mxu2 %v5415_v47  ;;  %v5782_v47 = vld [vmem:[%s6400_s22 + $0x6b4] sm:$0xf0] }
 0x3a4   : > { %3552 = vmatpush.bf16.msrb.mxu0 %v4839_v50  ;;  %v3234_v44 = vpop.f32.mrf.mxu3  ;;  %v5702_v54 = vld [vmem:[%s6400_s22 + $0x434] sm:$0xf0]  ;;  %v5255_v62 = vor.u32 %v5782_v47, %v5254_v46  ;;  %v5810_v47 = vld [vmem:[%s6400_s22 + $0x79c] sm:$0xf] }
 0x3a5   : > { %3565 = vmatpush.bf16.msrb.mxu1 %v5095_v53  ;;  %v3235_v49 = vadd.f32 %v3234_v44, %v1929_v35  ;;  %v3273_v50 = vpop.f32.mrf.mxu2  ;;  %v4934_v53 = vld [vmem:[%s6400_s22 + $0x418] sm:$0xf]  ;;  %v4840_v35 = vld [vmem:[%s6400_s22 + $0x378] sm:$0xf0] }
 0x3a6   : > { %3538 = vmatpush.bf16.msra.mxu3 %v4615_v56  ;;  %v5690_v56 = vld [vmem:[%s6400_s22 + $0x3dc] sm:$0xf]  ;;  %v5582_v2 = vld [vmem:[%s6400_s22 + $0x74] sm:$0xf0]  ;;  %v4935_v9 = vor.u32 %v5702_v54, %v4934_v53  ;;  %v4619_v53 = vor.u32 %v5618_v42, %v4616_v43 }
 0x3a7   : > { %3577 = vmatpush.bf16.msrb.mxu2 %v5383_v60  ;;  %v3248_v60 = vadd.f32 %v6852_v0, %v3235_v49  ;;  %v5222_v6 = vld [vmem:[%s6400_s22 + $0x658] sm:$0xf]  ;;  %v4907_v10 = vor.u32 %v5690_v56, %v4904_v58  ;;  %v5730_v54 = vld [vmem:[%s6400_s22 + $0x51c] sm:$0xf] }
 0x3a8   : > { %3553 = vmatpush.bf16.msrb.mxu0 %v4807_v1  ;;  %v4454_v1 = vld [vmem:[%s6400_s22 + $0x58] sm:$0xf]  ;;  %v6906_v3 = vpop.f32.mrf.mxu0  ;;  %v4968_v42 = vld [vmem:[%s6400_s22 + $0x478] sm:$0xf0] }
 0x3a9   : > { %3566 = vmatpush.bf16.msrb.mxu1 %v5063_v5  ;;  %v4679_v5 = vor.u32 %v5638_v52, %v4678_v48  ;;  %v5774_v7 = vld [vmem:[%s6400_s22 + $0x674] sm:$0xf0]  ;;  %v3261_v0 = vadd.f32 %v6859_v4, %v3248_v60  ;;  %v4455_v13 = vor.u32 %v5582_v2, %v4454_v1  ;;  %v5384_v48 = vld [vmem:[%s6400_s22 + $0x7b8] sm:$0xf0] }
 0x3aa   : > { %3539 = vmatpush.bf16.msra.mxu3 %v4583_v8  ;;  %v6917_v8 = vpop.f32.mrf.mxu1  ;;  %v5223_v4 = vor.u32 %v5774_v7, %v5222_v6  ;;  %v4422_v17 = vld [vmem:[%s6400_s22 + $0x18] sm:$0xf]  ;;  %v5387_v58 = vor.u32 %v5810_v47, %v5384_v48  ;;  %v4584_v60 = vld [vmem:[%s6400_s22 + $0x178] sm:$0xf0]  ;;  %v1931_v48 = vperm.slane %v6873_v25, 2 }
 0x3ab   : > { %3578 = vmatpush.bf16.msrb.mxu2 %v5351_v11  ;;  %v5682_v11 = vld [vmem:[%s6400_s22 + $0x39c] sm:$0xf]  ;;  %v5574_v20 = vld [vmem:[%s6400_s22 + $0x34] sm:$0xf0] }
 0x3ac   : > { %3554 = vmatpush.bf16.msrb.mxu0 %v4775_v14  ;;  %v4872_v14 = vld [vmem:[%s6400_s22 + $0x3b8] sm:$0xf0]  ;;  %v3236_v22 = vpop.f32.mrf.mxu3  ;;  %v5766_v24 = vld [vmem:[%s6400_s22 + $0x634] sm:$0xf0]  ;;  %v4423_v33 = vor.u32 %v5574_v20, %v4422_v17 }
 0x3ad   : > { %3567 = vmatpush.bf16.msrb.mxu1 %v5031_v18  ;;  %v3274_v18 = vadd.f32 %v3273_v50, %v3261_v0  ;;  %v3275_v28 = vpop.f32.mrf.mxu2  ;;  %v4875_v29 = vor.u32 %v5682_v11, %v4872_v14  ;;  %v5666_v50 = vld [vmem:[%s6400_s22 + $0x31c] sm:$0xf] }
 0x3ae   : > { %3540 = vmatpush.bf16.msra.mxu3 %v4551_v21  ;;  %v5190_v21 = vld [vmem:[%s6400_s22 + $0x618] sm:$0xf]  ;;  %v5802_v2 = vld [vmem:[%s6400_s22 + $0x75c] sm:$0xf] }
 0x3af   : > { %3579 = vmatpush.bf16.msrb.mxu2 %v5319_v26  ;;  %v5626_v26 = vld [vmem:[%s6400_s22 + $0x1dc] sm:$0xf]  ;;  %5927 = vtanh.f32 %v3274_v18  ;;  %v5191_v36 = vor.u32 %v5766_v24, %v5190_v21 }
 0x3b0   : > { %3555 = vmatpush.bf16.msrb.mxu0 %v4743_v30  ;;  %v5818_v30 = vld [vmem:[%s6400_s22 + $0x7dc] sm:$0xf]  ;;  %v4651_v37 = vor.u32 %v5626_v26, %v4648_v27  ;;  %v3301_v40 = vpop.f32.mrf.mxu0  ;;  %v4555_v27 = vor.u32 %v5602_v15, %v4552_v16 }
 0x3b1   : > { %3568 = vmatpush.bf16.msrb.mxu1 %v4999_v34  ;;  %v5674_v34 = vld [vmem:[%s6400_s22 + $0x35c] sm:$0xf] }
 0x3b2   : > { %3541 = vmatpush.bf16.msra.mxu3 %v4519_v38  ;;  %v5738_v38 = vld [vmem:[%s6400_s22 + $0x55c] sm:$0xf]  ;;  %v3314_v44 = vpop.f32.mrf.mxu1  ;;  %v4843_v46 = vor.u32 %v5674_v34, %v4840_v35 }
 0x3b3   : > { %3580 = vmatpush.bf16.msrb.mxu2 %v5287_v41  ;;  %v5419_v41 = vor.u32 %v5818_v30, %v5416_v31  ;;  %v5099_v49 = vor.u32 %v5738_v38, %v5096_v39  ;;  %v5658_v7 = vld [vmem:[%s6400_s22 + $0x2dc] sm:$0xf] }
 0x3b4   : > { %3556 = vmatpush.bf16.msrb.mxu0 %v4711_v45  ;;  %v1930_v45 = vperm.slane %v6873_v25, 1  ;;  %v3286_v56 = vpop.f32.mrf.mxu3  ;;  %v4776_v0 = vld [vmem:[%s6400_s22 + $0x2f8] sm:$0xf0] }
 0x3b5   : > { %3569 = vmatpush.bf16.msrb.mxu1 %v4967_v51  ;;  %v4808_v51 = vld [vmem:[%s6400_s22 + $0x338] sm:$0xf0]  ;;  %v5928_v52 = vpop.eup %5927  ;;  %v3325_v63 = vpop.f32.mrf.mxu2 }
 0x3b6   : > { %3542 = vmatpush.bf16.msra.mxu3 %v4487_v55  ;;  %v5064_v55 = vld [vmem:[%s6400_s22 + $0x538] sm:$0xf0]  ;;  %3649 = vst [vmem:[%s6943_s3] sm:$0xff] %v5928_v52  ;;  %v4811_v1 = vor.u32 %v5666_v50, %v4808_v51 }
 0x3b7   : > { %3581 = vmatpush.bf16.msrb.mxu2 %v5255_v62  ;;  %v3287_v62 = vadd.f32 %v3286_v56, %v1930_v45  ;;  %v5067_v6 = vor.u32 %v5730_v54, %v5064_v55  ;;  %v5722_v11 = vld [vmem:[%s6400_s22 + $0x4dc] sm:$0xf] }
 0x3b8   : > { %3557 = vmatpush.bf16.msrb.mxu0 %v4679_v5  ;;  %v5352_v5 = vld [vmem:[%s6400_s22 + $0x778] sm:$0xf0] }
 0x3b9   : > { %3570 = vmatpush.bf16.msrb.mxu1 %v4935_v9  ;;  %v3300_v9 = vadd.f32 %v6906_v3, %v3287_v62  ;;  %v5355_v14 = vor.u32 %v5802_v2, %v5352_v5  ;;  %v4779_v3 = vor.u32 %v5658_v7, %v4776_v0  ;;  %v5794_v17 = vld [vmem:[%s6400_s22 + $0x71c] sm:$0xf] }
 0x3ba   : > { %3543 = vmatpush.bf16.msra.mxu3 %v4455_v13  ;;  %v6964_v13 = vpop.f32.mrf.mxu0  ;;  %v5320_v20 = vld [vmem:[%s6400_s22 + $0x738] sm:$0xf0] }
 0x3bb   : > { %3582 = vmatpush.bf16.msrb.mxu2 %v5223_v4  ;;  %3558 = vmatmul.bf16.vlgmr.msrb.gmra.mxu0 %v6543_v57  ;;  %v3313_v18 = vadd.f32 %v6917_v8, %v3300_v9  ;;  %v6969_v4 = vpop.f32.mrf.mxu1  ;;  %v5650_v22 = vld [vmem:[%s6400_s22 + $0x29c] sm:$0xf]  ;;  %v5323_v30 = vor.u32 %v5794_v17, %v5320_v20 }
 0x3bc   : > { %3602 = vmatpush.bf16.msra.mxu0 %v4907_v10  ;;  %3571 = vmatmul.bf16.vlgmr.msrb.gmra.mxu1 %v6547_v61  ;;  %v4587_v10 = vor.u32 %v5610_v59, %v4584_v60  ;;  %v4744_v24 = vld [vmem:[%s6400_s22 + $0x2b8] sm:$0xf0] }
 0x3bd   : > { %3615 = vmatpush.bf16.msra.mxu1 %v5163_v12  ;;  %v5032_v12 = vld [vmem:[%s6400_s22 + $0x4f8] sm:$0xf0]  ;;  %v3326_v26 = vadd.f32 %v3325_v63, %v3313_v18  ;;  %v4747_v34 = vor.u32 %v5650_v22, %v4744_v24 }
 0x3be   : > { %3544 = vmatpush.bf16.msra.mxu3 %v4423_v33  ;;  %v5035_v21 = vor.u32 %v5722_v11, %v5032_v12  ;;  %v5714_v28 = vld [vmem:[%s6400_s22 + $0x49c] sm:$0xf]  ;;  %v3327_v33 = vpop.f32.mrf.mxu2 }
 0x3bf   : > { %3583 = vmatpush.bf16.msrb.mxu2 %v5191_v36  ;;  %v5000_v8 = vld [vmem:[%s6400_s22 + $0x4b8] sm:$0xf0]  ;;  %5929 = vtanh.f32 %v3326_v26 }
 0x3c0   : > { %3603 = vmatpush.bf16.msra.mxu0 %v4875_v29  ;;  %v3288_v29 = vpop.f32.mrf.mxu3  ;;  %v5594_v31 = vld [vmem:[%s6400_s22 + $0xdc] sm:$0xf] }
 0x3c1   : > { %3616 = vmatpush.bf16.msra.mxu1 %v5131_v32  ;;  %3545 = vmatmul.bf16.vlgmr.msra.gmra.mxu3 %v6561_v19  ;;  %v4520_v32 = vld [vmem:[%s6400_s22 + $0xf8] sm:$0xf0] }
 0x3c2   : > { %3589 = vmatpush.bf16.msrb.mxu3 %v4651_v37  ;;  %3584 = vmatmul.bf16.vlgmr.msrb.gmra.mxu2 %v6565_v23  ;;  %v5786_v35 = vld [vmem:[%s6400_s22 + $0x6dc] sm:$0xf]  ;;  %v5003_v37 = vor.u32 %v5714_v28, %v5000_v8  ;;  %v4523_v40 = vor.u32 %v5594_v31, %v4520_v32  ;;  %v3353_v43 = vpop.f32.mrf.mxu0 }
 0x3c3   : > { %3628 = vmatpush.bf16.msra.mxu2 %v5419_v41  ;;  %v5288_v36 = vld [vmem:[%s6400_s22 + $0x6f8] sm:$0xf0]  ;;  %v3366_v47 = vpop.f32.mrf.mxu1 }
 0x3c4   : > { %3604 = vmatpush.bf16.msra.mxu0 %v4843_v46  ;;  %v5642_v38 = vld [vmem:[%s6400_s22 + $0x25c] sm:$0xf]  ;;  %v5291_v44 = vor.u32 %v5786_v35, %v5288_v36 }
 0x3c5   : > { %3617 = vmatpush.bf16.msra.mxu1 %v5099_v49  ;;  %v4712_v39 = vld [vmem:[%s6400_s22 + $0x278] sm:$0xf0]  ;;  %v5930_v55 = vpop.eup %5929 }
 0x3c6   : > { %3590 = vmatpush.bf16.msrb.mxu3 %v4619_v53  ;;  %v5706_v41 = vld [vmem:[%s6400_s22 + $0x45c] sm:$0xf]  ;;  %v4715_v49 = vor.u32 %v5642_v38, %v4712_v39  ;;  %3650 = vst [vmem:[%s6943_s3 + $0x8] sm:$0xff] %v5930_v55  ;;  %v3377_v5 = vpop.f32.mrf.mxu2  ;;  %v1933_v38 = vperm.slane %v6873_v25, 4 }
 0x3c7   : > { %3629 = vmatpush.bf16.msra.mxu2 %v5387_v58  ;;  %v5586_v45 = vld [vmem:[%s6400_s22 + $0x9c] sm:$0xf]  ;;  %v4971_v52 = vor.u32 %v5706_v41, %v4968_v42 }
 0x3c8   : > { %3605 = vmatpush.bf16.msra.mxu0 %v4811_v1  ;;  %v4488_v46 = vld [vmem:[%s6400_s22 + $0xb8] sm:$0xf0]  ;;  %v3338_v60 = vpop.f32.mrf.mxu3 }
 0x3c9   : > { %3618 = vmatpush.bf16.msra.mxu1 %v5067_v6  ;;  %v5778_v50 = vld [vmem:[%s6400_s22 + $0x69c] sm:$0xf]  ;;  %v4491_v56 = vor.u32 %v5586_v45, %v4488_v46  ;;  %v3339_v2 = vadd.f32 %v3338_v60, %v1931_v48 }
 0x3ca   : > { %3591 = vmatpush.bf16.msrb.mxu3 %v4587_v10  ;;  %v5256_v51 = vld [vmem:[%s6400_s22 + $0x6b8] sm:$0xf0] }
 0x3cb   : > { %3630 = vmatpush.bf16.msra.mxu2 %v5355_v14  ;;  %v5634_v53 = vld [vmem:[%s6400_s22 + $0x21c] sm:$0xf]  ;;  %v5259_v62 = vor.u32 %v5778_v50, %v5256_v51  ;;  %v3352_v10 = vadd.f32 %v6964_v13, %v3339_v2 }
 0x3cc   : > { %3606 = vmatpush.bf16.msra.mxu0 %v4779_v3  ;;  %v4680_v54 = vld [vmem:[%s6400_s22 + $0x238] sm:$0xf0] }
 0x3cd   : > { %3619 = vmatpush.bf16.msra.mxu1 %v5035_v21  ;;  %v5698_v58 = vld [vmem:[%s6400_s22 + $0x41c] sm:$0xf]  ;;  %v4683_v6 = vor.u32 %v5634_v53, %v4680_v54  ;;  %v3365_v16 = vadd.f32 %v6969_v4, %v3352_v10 }
 0x3ce   : > { %3592 = vmatpush.bf16.msrb.mxu3 %v4555_v27  ;;  %v4936_v59 = vld [vmem:[%s6400_s22 + $0x438] sm:$0xf0]  ;;  %v3379_v22 = vpop.f32.mrf.mxu2 }
 0x3cf   : > { %3631 = vmatpush.bf16.msra.mxu2 %v5323_v30  ;;  %v5578_v63 = vld [vmem:[%s6400_s22 + $0x5c] sm:$0xf]  ;;  %v4939_v9 = vor.u32 %v5698_v58, %v4936_v59  ;;  %v3378_v17 = vadd.f32 %v3377_v5, %v3365_v16 }
 0x3d0   : > { %3607 = vmatpush.bf16.msra.mxu0 %v4747_v34  ;;  %v4456_v1 = vld [vmem:[%s6400_s22 + $0x78] sm:$0xf0]  ;;  %v3340_v13 = vpop.f32.mrf.mxu3 }
 0x3d1   : > { %3620 = vmatpush.bf16.msra.mxu1 %v5003_v37  ;;  %v5770_v7 = vld [vmem:[%s6400_s22 + $0x65c] sm:$0xf]  ;;  %v4459_v11 = vor.u32 %v5578_v63, %v4456_v1  ;;  %5931 = vtanh.f32 %v3378_v17 }
 0x3d2   : > { %3593 = vmatpush.bf16.msrb.mxu3 %v4523_v40  ;;  %v5224_v0 = vld [vmem:[%s6400_s22 + $0x678] sm:$0xf0] }
 0x3d3   : > { %3632 = vmatpush.bf16.msra.mxu2 %v5291_v44  ;;  %v5227_v12 = vor.u32 %v5770_v7, %v5224_v0  ;;  %v5570_v14 = vld [vmem:[%s6400_s22 + $0x1c] sm:$0xf]  ;;  %v1935_v7 = vperm.slane %v6873_v25, 6 }
 0x3d4   : > { %3608 = vmatpush.bf16.msra.mxu0 %v4715_v49  ;;  %v4424_v15 = vld [vmem:[%s6400_s22 + $0x38] sm:$0xf0] }
 0x3d5   : > { %3621 = vmatpush.bf16.msra.mxu1 %v4971_v52  ;;  %v5762_v18 = vld [vmem:[%s6400_s22 + $0x61c] sm:$0xf]  ;;  %v4427_v20 = vor.u32 %v5570_v14, %v4424_v15  ;;  %v1934_v52 = vperm.slane %v6873_v25, 5 }
 0x3d6   : > { %3594 = vmatpush.bf16.msrb.mxu3 %v4491_v56  ;;  %v5192_v3 = vld [vmem:[%s6400_s22 + $0x638] sm:$0xf0] }
 0x3d7   : > { %3633 = vmatpush.bf16.msra.mxu2 %v5259_v62  ;;  %v5195_v21 = vor.u32 %v5762_v18, %v5192_v3  ;;  %v5932_v4 = vpop.eup %5931 }
 0x3d8   : > { %3609 = vmatpush.bf16.msra.mxu0 %v4683_v6  ;;  %3651 = vst [vmem:[%s6943_s3 + $0x10] sm:$0xff] %v5932_v4  ;;  %v3403_v24 = vpop.f32.mrf.mxu0 }
 0x3d9   : > { %3622 = vmatpush.bf16.msra.mxu1 %v4939_v9  ;;  %v3416_v26 = vpop.f32.mrf.mxu1 }
 0x3da   : > { %3595 = vmatpush.bf16.msrb.mxu3 %v4459_v11 }
 0x3db   : > { %3634 = vmatpush.bf16.msra.mxu2 %v5227_v12  ;;  %3610 = vmatmul.bf16.vlgmr.msra.gmra.mxu0 %v6543_v57  ;;  %v1932_v57 = vperm.slane %v6873_v25, 3 }
 0x3dc   : > { %3623 = vmatmul.bf16.vlgmr.msra.gmra.mxu1 %v6547_v61 }
 0x3de   : > { %3596 = vmatpush.bf16.msrb.mxu3 %v4427_v20 }
 0x3df   : > { %3635 = vmatpush.bf16.msra.mxu2 %v5195_v21  ;;  %v1936_v21 = vperm.slane %v6873_v25, 7 }
 0x3e0   : > { %v3405_v27 = vpop.f32.mrf.mxu0 }
 0x3e1   : > { %3597 = vmatmul.bf16.vlgmr.msrb.gmra.mxu3 %v6561_v19  ;;  %v3418_v28 = vpop.f32.mrf.mxu1 }
 0x3e2   : > { %3636 = vmatmul.bf16.vlgmr.msra.gmra.mxu2 %v6565_v23 }
 0x3e4   : > { %v3390_v8 = vpop.f32.mrf.mxu3 }
 0x3e5   : > { %v3391_v29 = vadd.f32 %v3390_v8, %v1932_v57  ;;  %v3429_v30 = vpop.f32.mrf.mxu2 }
 0x3e7   : > { %v3404_v61 = vadd.f32 %v3403_v24, %v3391_v29 }
 0x3e9   : > { %v3417_v31 = vadd.f32 %v3416_v26, %v3404_v61 }
 0x3eb   : > { %v3430_v32 = vadd.f32 %v3429_v30, %v3417_v31 }
 0x3ec   : > { %v3392_v33 = vpop.f32.mrf.mxu3 }
 0x3ed   : > { %5933 = vtanh.f32 %v3430_v32  ;;  %v3431_v19 = vpop.f32.mrf.mxu2 }
 0x3f3   : > { %v5934_v34 = vpop.eup %5933 }
 0x3f4   : > { %3652 = vst [vmem:[%s6943_s3 + $0x18] sm:$0xff] %v5934_v34 }
 0x3f8   : > { %v3455_v23 = vpop.f32.mrf.mxu0 }
 0x3f9   : > { %v3468_v35 = vpop.f32.mrf.mxu1 }
 0x400   : > { %v3457_v36 = vpop.f32.mrf.mxu0 }
 0x401   : > { %v3470_v37 = vpop.f32.mrf.mxu1 }
 0x404   : > { %v3442_v39 = vpop.f32.mrf.mxu3 }
 0x405   : > { %v3443_v40 = vadd.f32 %v3442_v39, %v1933_v38  ;;  %v3481_v41 = vpop.f32.mrf.mxu2 }
 0x407   : > { %v3456_v42 = vadd.f32 %v3455_v23, %v3443_v40 }
 0x409   : > { %v3469_v43 = vadd.f32 %v3468_v35, %v3456_v42 }
 0x40b   : > { %v3482_v44 = vadd.f32 %v3481_v41, %v3469_v43 }
 0x40c   : > { %v3444_v45 = vpop.f32.mrf.mxu3 }
 0x40d   : > { %5935 = vtanh.f32 %v3482_v44  ;;  %v3483_v46 = vpop.f32.mrf.mxu2 }
 0x413   : > { %v5936_v47 = vpop.eup %5935 }
 0x414   : > { %3653 = vst [vmem:[%s6943_s3 + $0x20] sm:$0xff] %v5936_v47 }
 0x418   : > { %v3507_v48 = vpop.f32.mrf.mxu0 }
 0x419   : > { %v3520_v49 = vpop.f32.mrf.mxu1 }
 0x420   : > { %v3509_v50 = vpop.f32.mrf.mxu0 }
 0x421   : > { %v3522_v51 = vpop.f32.mrf.mxu1 }
 0x424   : > { %v3494_v53 = vpop.f32.mrf.mxu3 }
 0x425   : > { %v3495_v54 = vadd.f32 %v3494_v53, %v1934_v52  ;;  %v3533_v55 = vpop.f32.mrf.mxu2 }
 0x427   : > { %v3508_v56 = vadd.f32 %v3507_v48, %v3495_v54 }
 0x429   : > { %v3521_v58 = vadd.f32 %v3520_v49, %v3508_v56 }
 0x42b   : > { %v3534_v59 = vadd.f32 %v3533_v55, %v3521_v58 }
 0x42c   : > { %v3496_v60 = vpop.f32.mrf.mxu3 }
 0x42d   : > { %5937 = vtanh.f32 %v3534_v59  ;;  %v3535_v62 = vpop.f32.mrf.mxu2 }
 0x433   : > { %v5938_v63 = vpop.eup %5937 }
 0x434   : > { %3654 = vst [vmem:[%s6943_s3 + $0x28] sm:$0xff] %v5938_v63 }
 0x438   : > { %v3559_v1 = vpop.f32.mrf.mxu0 }
 0x439   : > { %v3572_v2 = vpop.f32.mrf.mxu1 }
 0x440   : > { %v3561_v5 = vpop.f32.mrf.mxu0 }
 0x441   : > { %v3574_v6 = vpop.f32.mrf.mxu1 }
 0x444   : > { %v3546_v0 = vpop.f32.mrf.mxu3 }
 0x445   : > { %v3547_v9 = vadd.f32 %v3546_v0, %v1935_v7  ;;  %v3585_v10 = vpop.f32.mrf.mxu2 }
 0x447   : > { %v3560_v11 = vadd.f32 %v3559_v1, %v3547_v9 }
 0x449   : > { %v3573_v12 = vadd.f32 %v3572_v2, %v3560_v11 }
 0x44b   : > { %v3586_v14 = vadd.f32 %v3585_v10, %v3573_v12 }
 0x44c   : > { %v3548_v15 = vpop.f32.mrf.mxu3 }
 0x44d   : > { %5939 = vtanh.f32 %v3586_v14  ;;  %v3587_v16 = vpop.f32.mrf.mxu2 }
 0x453   : > { %v5940_v18 = vpop.eup %5939 }
 0x454   : > { %3655 = vst [vmem:[%s6943_s3 + $0x30] sm:$0xff] %v5940_v18 }
 0x458   : > { %v3611_v3 = vpop.f32.mrf.mxu0 }
 0x459   : > { %v3624_v17 = vpop.f32.mrf.mxu1 }
 0x460   : > { %v3613_v20 = vpop.f32.mrf.mxu0 }
 0x461   : > { %v3626_v13 = vpop.f32.mrf.mxu1 }
 0x464   : > { %v3598_v22 = vpop.f32.mrf.mxu3 }
 0x465   : > { %v3599_v4 = vadd.f32 %v3598_v22, %v1936_v21  ;;  %v3637_v24 = vpop.f32.mrf.mxu2 }
 0x467   : > { %v3612_v26 = vadd.f32 %v3611_v3, %v3599_v4 }
 0x469   : > { %v3625_v27 = vadd.f32 %v3624_v17, %v3612_v26 }
 0x46b   : > { %v3638_v28 = vadd.f32 %v3637_v24, %v3625_v27 }
 0x46c   : > { %v3600_v57 = vpop.f32.mrf.mxu3 }
 0x46d   : > { %5941 = vtanh.f32 %v3638_v28  ;;  %v3639_v8 = vpop.f32.mrf.mxu2 }
 0x473   : > { %v5942_v29 = vpop.eup %5941 }
 0x474   : > { %3656 = vst [vmem:[%s6943_s3 + $0x38] sm:$0xff] %v5942_v29 }
 0x475 PF: > { %p20_p4 = scmp.ge.s32.totalorder %s6309_s23, 4   ;;  %s7056_s24 = smov %s6191_s25 }
 0x476   : > { %s7057_s25 = smov %s6195_s26  ;;  %s7058_s26 = smov %s6318_s8 }
 0x477   : > { %s7059_s27 = smov %s6309_s23  ;;  %22 = sbr.rel (!%p20_p4) target bundleno = 11 (0xb), region = 122 }
 0x47c   :  { %3679 = vsyncpa [#allocation3], 1 }
 0x47d   :  { %3681 = vsyncpa [#allocation3 + $0x1], 1 }
 0x47e   :  { %3682 = vsyncpa [#allocation5], 1 }
 0x47f   :  { %3683 = vsyncpa [#allocation8], 1 }
 0x480   :  { %3684 = vsyncpa [#allocation11], 1 }
 0x481   :  { %3686 = vsyncpa [#allocation11 + $0x1], 1 }

</bundles_post_ra>
